<compile_context>
chip_gen: v5e
topology: v5e:2x2
jax: 0.10.0
libtpu: 0.0.40
codegen_flags: <defaults>
</compile_context>

<pallas_src>
import functools

import jax
import jax.numpy as jnp
from jax import lax
from jax.experimental import pallas as pl
from jax.experimental.pallas import tpu as pltpu


# ----------------------------- tiling helpers ------------------------------

def _pick_row_tile(m, min_grid=4):
    """Row tile for the encode kernel.

    Prefers large tiles (512-1024 rows reach ~85% of HBM roofline on v5e/v6e)
    but keeps the grid >= min_grid so that, under
    dimension_semantics=("parallel",), each of v7x's two TensorCores still gets
    >= 2 grid steps to double-buffer.  (For realistic M that is not a multiple
    of the tile, pad M in the wrapper instead of shrinking the tile.)
    """
    for t in (1024, 512, 256, 128, 64, 32, 16, 8):
        if m % t == 0 and m // t >= min_grid:
            return t
    for t in (256, 128, 64, 32, 16, 8):
        if m % t == 0:
            return t
    return m


# ------------------- kernel A: embed + mask + encoder MLP -------------------

def _encode_kernel(src_ref, m_ref, ew_ref, eb_ref, me_ref,
                   w1_ref, b1_ref, w2_ref, b2_ref, o_ref):
    # TODO(synk): weights could be stored bf16 (f32 accumulation) for ~2x MXU
    # throughput / half the weight traffic; kept f32 to match torch numerics.
    feats = jnp.dot(src_ref[...], ew_ref[...],
                    preferred_element_type=jnp.float32) + eb_ref[...]
    # apply_mask fused into the epilogue: (tm, 1) mask lane-broadcasts cheaply
    x = jnp.where(m_ref[...] != 0, me_ref[...], feats)
    # TODO(synk): the injected transformer encoder is stood in by a fused
    # 2-layer GELU MLP; attention is out of scope for this synthetic kernel.
    h = jax.nn.gelu(jnp.dot(x, w1_ref[...],
                            preferred_element_type=jnp.float32) + b1_ref[...])
    out = jnp.dot(h, w2_ref[...],
                  preferred_element_type=jnp.float32) + b2_ref[...]
    o_ref[...] = out.astype(o_ref.dtype)


def encode_pallas(src2d, mask2d, ew, eb, me, w1, b1, w2, b2):
    M, Fin = src2d.shape
    D = ew.shape[1]
    H = w1.shape[1]
    tm = _pick_row_tile(M)
    flops = 2 * M * (Fin * D + D * H + H * D)
    bytes_acc = 4 * (M * Fin + M + Fin * D + D * H + H * D + 3 * D + H + M * D)
    # TODO(synk): at real wav2vec2 dims (D=768, FF=3072) mark the constant
    # index_map weight blocks pipeline_mode=pl.Buffered(1) so ~19 MiB of f32
    # weights is not double-buffered on v7x's 64 MiB VMEM.  Note: 128-wide
    # contraction dims half-fill the 256x256 MXU on v6e/v7x (full on v5e).
    return pl.pallas_call(
        _encode_kernel,
        out_shape=jax.ShapeDtypeStruct((M, D), src2d.dtype),
        grid=(M // tm,),
        in_specs=[
            pl.BlockSpec((tm, Fin), lambda i: (i, 0)),   # src rows (pipelined)
            pl.BlockSpec((tm, 1), lambda i: (i, 0)),     # mask rows
            pl.BlockSpec((Fin, D), lambda i: (0, 0)),    # weights: VMEM resident
            pl.BlockSpec((1, D), lambda i: (0, 0)),
            pl.BlockSpec((1, D), lambda i: (0, 0)),
            pl.BlockSpec((D, H), lambda i: (0, 0)),
            pl.BlockSpec((1, H), lambda i: (0, 0)),
            pl.BlockSpec((H, D), lambda i: (0, 0)),
            pl.BlockSpec((1, D), lambda i: (0, 0)),
        ],
        out_specs=pl.BlockSpec((tm, D), lambda i: (i, 0)),
        compiler_params=pltpu.CompilerParams(
            dimension_semantics=("parallel",),            # megacore on v7x
            vmem_limit_bytes=48 * 1024 * 1024,            # <= v7x 64 MiB physical
        ),
        cost_estimate=pl.CostEstimate(
            flops=flops, transcendentals=M * H, bytes_accessed=bytes_acc),
    )(src2d, mask2d, ew, eb.reshape(1, D), me.reshape(1, D),
      w1, b1.reshape(1, H), w2, b2.reshape(1, D))


# --- kernel B: fused gather + project_q + final_proj + cosine-sim logits ----

def _pred_kernel(pos_ref, tgt_ref, src_ref, xenc_ref, ew_ref, eb_ref,
                 qw_ref, qb_ref, fw_ref, fb_ref, o_ref, *, inv_temp, inv_eps):
    rows = pos_ref.shape[0]
    K = tgt_ref.shape[1]
    M = src_ref.shape[0]
    f32 = jnp.float32

    # Masked-position row gather as a one-hot matmul on the MXU (exact for 0/1
    # selectors) instead of a serial per-row dynamic-index copy loop.
    sel = (pos_ref[...] ==
           lax.broadcasted_iota(jnp.int32, (rows, M), 1)).astype(f32)    # (rows, M)
    src_g = jnp.dot(sel, src_ref[...], preferred_element_type=f32)       # (rows, Fin)
    x_g = jnp.dot(sel, xenc_ref[...], preferred_element_type=f32)        # (rows, D)

    # y = project_q(unmasked_features[mask_indices])  -- fused, never hits HBM
    feat_g = jnp.dot(src_g, ew_ref[...], preferred_element_type=f32) + eb_ref[...]
    y = jnp.dot(feat_g, qw_ref[...], preferred_element_type=f32) + qb_ref[...]

    # x = final_proj(x[mask_indices])
    x = jnp.dot(x_g, fw_ref[...], preferred_element_type=f32) + fb_ref[...]

    # cosine similarity against all candidate target rows on the MXU:
    #   y_hat = y / max(||y||, eps)  ->  dots[r, j] = x_r . y_hat_j
    yn2 = jnp.sum(y * y, axis=-1, keepdims=True)                         # (rows, 1)
    y_hat = y * jnp.minimum(lax.rsqrt(yn2), inv_eps)
    dots = lax.dot_general(x, y_hat, (((1,), (1,)), ((), ())),
                           preferred_element_type=f32)                   # (rows, rows)

    # Select the K = 1 + n_neg targets per row (col 0 = positive = own row)
    # with a one-hot compare against the index table -- no gather, no scratch.
    tgt = tgt_ref[...]                                                   # (rows, K) i32
    oneh = tgt[:, :, None] == lax.broadcasted_iota(jnp.int32, (rows, K, rows), 2)
    sim = jnp.sum(jnp.where(oneh, dots[:, None, :], 0.0), axis=-1)       # (rows, K)

    xn2 = jnp.sum(x * x, axis=-1, keepdims=True)                         # (rows, 1)
    logits = sim * jnp.minimum(lax.rsqrt(xn2), inv_eps) * inv_temp       # (rows, K)

    # negative identical to the positive -> -inf.  Index equality is value
    # equality here because negatives are drawn from the same y rows (k = 0,
    # the positive itself, is never masked).
    k_idx = lax.broadcasted_iota(jnp.int32, (rows, K), 1)
    neg_is_pos = jnp.logical_and(tgt == tgt[:, 0:1], k_idx >= 1)
    logits = jnp.where(neg_is_pos, -jnp.inf, logits)
    # TODO(synk): pack logits into a 128-wide lane slab once rows*K grows;
    # masked (rows, K=8) stores are negligible at this size.
    o_ref[...] = logits.astype(o_ref.dtype)


def compute_pred_pallas(flat_pos, tgt_idx, src2d, x_enc,
                        ew, eb, qw, qb, fw, fb, *, logit_temp):
    M, Fin = src2d.shape
    D = x_enc.shape[1]
    Fo = qw.shape[1]
    rows, K = tgt_idx.shape
    kern = functools.partial(_pred_kernel, inv_temp=1.0 / logit_temp, inv_eps=1e8)
    flops = (2 * rows * M * (Fin + D)            # one-hot row gathers
             + 2 * rows * (Fin * D + 2 * D * Fo)  # embed / project_q / final_proj
             + 2 * rows * rows * Fo               # all-pairs dots
             + 6 * rows * K * rows)               # one-hot target selection
    bytes_acc = 4 * (rows * (1 + K) + M * (Fin + D) + Fin * D + 2 * D * Fo
                     + D + 2 * Fo + rows * K)
    full = lambda i: (0, 0)
    # rows = B * num_mask is small: single grid step, everything VMEM resident.
    return pl.pallas_call(
        kern,
        out_shape=jax.ShapeDtypeStruct((rows, K), x_enc.dtype),
        grid=(1,),
        in_specs=[
            pl.BlockSpec((rows, 1), full),    # flat masked-position indices
            pl.BlockSpec((rows, K), full),    # per-row target index table
            pl.BlockSpec((M, Fin), full),     # src (recompute unmasked features)
            pl.BlockSpec((M, D), full),       # encoder output
            pl.BlockSpec((Fin, D), full),     # src_embed W
            pl.BlockSpec((1, D), full),
            pl.BlockSpec((D, Fo), full),      # project_q W
            pl.BlockSpec((1, Fo), full),
            pl.BlockSpec((D, Fo), full),      # final_proj W
            pl.BlockSpec((1, Fo), full),
        ],
        out_specs=pl.BlockSpec((rows, K), full),
        compiler_params=pltpu.CompilerParams(
            dimension_semantics=("arbitrary",),
            vmem_limit_bytes=48 * 1024 * 1024,
        ),
        cost_estimate=pl.CostEstimate(
            flops=flops, transcendentals=2 * rows, bytes_accessed=bytes_acc),
    )(flat_pos.reshape(rows, 1).astype(jnp.int32), tgt_idx.astype(jnp.int32),
      src2d, x_enc, ew, eb.reshape(1, D), qw, qb.reshape(1, Fo),
      fw, fb.reshape(1, Fo))


# ------------------------------ forward glue --------------------------------

def wav2vec2_forward(params, src, src_mask, mask_pos, neg_idxs, *, logit_temp=0.1):
    """Mirrors Wav2vec2.forward with mask=True, quantize_targets=False,
    negatives_from_everywhere=False, cross/codebook negatives = 0, dropout p=0."""
    B, T, Fin = src.shape
    num_mask = mask_pos.shape[1]
    n_neg = neg_idxs.shape[1] // num_mask
    K = 1 + n_neg
    M = B * T
    rows = B * num_mask

    padding_mask = jnp.logical_not(src_mask)[:, 0, :]            # (B, T)

    src2d = src.reshape(M, Fin)
    flat_pos = (jnp.arange(B, dtype=jnp.int32)[:, None] * T
                + mask_pos.astype(jnp.int32)).reshape(-1)        # (rows,)
    mask2d = jnp.zeros((M, 1), jnp.int32).at[flat_pos, 0].set(1)

    # fused src_embed -> apply_mask -> encoder (stand-in MLP): one HBM round trip
    x_enc = encode_pallas(src2d, mask2d,
                          params["embed_w"], params["embed_b"], params["mask_embed"],
                          params["enc_w1"], params["enc_b1"],
                          params["enc_w2"], params["enc_b2"])

    # per-row target index table: column 0 = positive (the row itself), 1.. = negatives
    pos_idx = jnp.arange(rows, dtype=jnp.int32).reshape(B, num_mask, 1)
    neg_mat = neg_idxs.reshape(B, num_mask, n_neg).astype(jnp.int32)
    tgt_idx = jnp.concatenate([pos_idx, neg_mat], axis=-1).reshape(rows, K)

    # single fused kernel: gather masked rows (one-hot MXU), project_q,
    # final_proj, cosine-sim logits.
    logits2d = compute_pred_pallas(flat_pos, tgt_idx, src2d, x_enc,
                                   params["embed_w"], params["embed_b"],
                                   params["proj_q_w"], params["proj_q_b"],
                                   params["final_w"], params["final_b"],
                                   logit_temp=logit_temp)        # (rows, K)
    logits = logits2d.reshape(B, num_mask, K).transpose(2, 0, 1)  # (K, B, Tm)

    return {"x": logits, "padding_mask": padding_mask}


# --------------------------- pure-JAX reference ------------------------------

def reference_forward(params, src, src_mask, mask_pos, neg_idxs, *, logit_temp=0.1):
    hp = functools.partial(jnp.dot, precision=lax.Precision.HIGHEST)
    B, T, Fin = src.shape
    num_mask = mask_pos.shape[1]
    n_neg = neg_idxs.shape[1] // num_mask
    M = B * T
    rows = B * num_mask

    src2d = src.reshape(M, Fin)
    flat_pos = (jnp.arange(B, dtype=jnp.int32)[:, None] * T
                + mask_pos.astype(jnp.int32)).reshape(-1)

    feats = hp(src2d, params["embed_w"]) + params["embed_b"]      # src_embed
    unmasked = feats                                              # dropout p = 0
    mask_vec = jnp.zeros((M,), bool).at[flat_pos].set(True)
    x = jnp.where(mask_vec[:, None], params["mask_embed"][None, :], feats)
    h = jax.nn.gelu(hp(x, params["enc_w1"]) + params["enc_b1"])   # encoder stand-in
    x = hp(h, params["enc_w2"]) + params["enc_b2"]

    y = hp(unmasked[flat_pos], params["proj_q_w"]) + params["proj_q_b"]
    xg = hp(x[flat_pos], params["final_w"]) + params["final_b"]

    pos_idx = jnp.arange(rows, dtype=jnp.int32).reshape(B, num_mask, 1)
    neg_mat = neg_idxs.reshape(B, num_mask, n_neg).astype(jnp.int32)
    tgt_idx = jnp.concatenate([pos_idx, neg_mat], axis=-1).reshape(rows, 1 + n_neg)
    tgt = y[tgt_idx]                                              # (rows, K, F)

    dot = jnp.sum(xg[:, None, :] * tgt, axis=-1)
    xn = jnp.sqrt(jnp.sum(xg * xg, axis=-1, keepdims=True))
    tn = jnp.sqrt(jnp.sum(tgt * tgt, axis=-1))
    cos = dot / (jnp.maximum(xn, 1e-8) * jnp.maximum(tn, 1e-8))
    logits = cos / logit_temp
    neg_is_pos = jnp.all(tgt == tgt[:, 0:1, :], axis=-1)
    neg_is_pos = neg_is_pos & (jnp.arange(1 + n_neg)[None, :] >= 1)
    logits = jnp.where(neg_is_pos, -jnp.inf, logits)
    logits = logits.reshape(B, num_mask, 1 + n_neg).transpose(2, 0, 1)
    return {"x": logits, "padding_mask": jnp.logical_not(src_mask)[:, 0, :]}


# --------------------------------- main --------------------------------------

if __name__ == "__main__":
    B, T, F_IN = 4, 128, 128           # batch, frames, per-frame input features
    D_MODEL, D_FF, FINAL_DIM = 128, 256, 128
    NUM_MASK, N_NEG = 16, 7
    LOGIT_TEMP = 0.1

    key = jax.random.PRNGKey(0)
    ks = jax.random.split(key, 12)

    def w_init(k, shape):
        return (0.02 * jax.random.normal(k, shape)).astype(jnp.float32)

    params = {
        "embed_w": w_init(ks[0], (F_IN, D_MODEL)),
        "embed_b": jnp.zeros((D_MODEL,), jnp.float32),
        "enc_w1": w_init(ks[1], (D_MODEL, D_FF)),
        "enc_b1": jnp.zeros((D_FF,), jnp.float32),
        "enc_w2": w_init(ks[2], (D_FF, D_MODEL)),
        "enc_b2": jnp.zeros((D_MODEL,), jnp.float32),
        "proj_q_w": w_init(ks[3], (D_MODEL, FINAL_DIM)),
        "proj_q_b": jnp.zeros((FINAL_DIM,), jnp.float32),
        "final_w": w_init(ks[4], (D_MODEL, FINAL_DIM)),
        "final_b": jnp.zeros((FINAL_DIM,), jnp.float32),
        "mask_embed": jax.random.uniform(ks[5], (D_MODEL,), jnp.float32),  # uniform_()
    }

    src = jax.random.normal(ks[6], (B, T, F_IN), jnp.float32)
    src_mask = jnp.ones((B, 1, T), dtype=bool)    # no padding

    # deterministic mask positions (same #masks per row, sorted -> matches boolean gather)
    perm_keys = jax.random.split(ks[7], B)
    perm = jax.vmap(lambda k: jax.random.permutation(k, T))(perm_keys)
    mask_pos = jnp.sort(perm[:, :NUM_MASK], axis=1).astype(jnp.int32)

    # negative-sampling indices (torch sample_negatives semantics, cross_sample_negatives=0)
    num, high = NUM_MASK, NUM_MASK
    tszs = jnp.repeat(jnp.arange(num), N_NEG)                        # (num * n_neg,)
    neg = jax.random.randint(ks[8], (B, N_NEG * num), 0, high - 1)   # [0, high-2]
    neg = jnp.where(neg >= tszs[None, :], neg + 1, neg)
    neg_idxs = (neg + jnp.arange(B)[:, None] * high).astype(jnp.int32)

    fwd = jax.jit(functools.partial(wav2vec2_forward, logit_temp=LOGIT_TEMP))
    out = fwd(params, src, src_mask, mask_pos, neg_idxs)
    jax.block_until_ready(out)

    assert out["x"].shape == (1 + N_NEG, B, NUM_MASK)
    assert out["padding_mask"].shape == (B, T)
    assert bool(jnp.isfinite(out["x"][0]).all())   # positive logits always finite

    # correctness vs a pure-JAX reference of the torch semantics
    ref = reference_forward(params, src, src_mask, mask_pos, neg_idxs,
                            logit_temp=LOGIT_TEMP)
    got, want = out["x"], ref["x"]
    fin_g, fin_w = jnp.isfinite(got), jnp.isfinite(want)
    assert bool(jnp.array_equal(fin_g, fin_w))
    max_diff = float(jnp.max(jnp.abs(jnp.where(fin_g, got - want, 0.0))))
    assert max_diff < 5e-2, f"logits mismatch: {max_diff}"
    assert bool(jnp.array_equal(out["padding_mask"], ref["padding_mask"]))

    print("KERNEL_OK")
</pallas_src>

<mosaic_0001>
module attributes {stable_mosaic.version = 11 : i64} {
  func.func @_encode_kernel(%arg0: i32, %arg1: memref<128x128xf32, #tpu.memory_space<vmem>>, %arg2: memref<128x1xi32, #tpu.memory_space<vmem>>, %arg3: memref<128x128xf32, #tpu.memory_space<vmem>>, %arg4: memref<1x128xf32, #tpu.memory_space<vmem>>, %arg5: memref<1x128xf32, #tpu.memory_space<vmem>>, %arg6: memref<128x256xf32, #tpu.memory_space<vmem>>, %arg7: memref<1x256xf32, #tpu.memory_space<vmem>>, %arg8: memref<256x128xf32, #tpu.memory_space<vmem>>, %arg9: memref<1x128xf32, #tpu.memory_space<vmem>>, %arg10: memref<128x128xf32, #tpu.memory_space<vmem>>) attributes {dimension_semantics = [#tpu.dimension_semantics<parallel>], iteration_bounds = array<i64: 4>, scalar_prefetch = 0 : i64, scratch_operands = 0 : i64, tpu.core_type = #tpu.core_type<tc>, window_params = [{transform_indices = @transform_0, window_bounds = array<i64: 128, 128>}, {transform_indices = @transform_1, window_bounds = array<i64: 128, 1>}, {pipeline_mode = #tpu.pipeline_mode<synchronous>, transform_indices = @transform_2, window_bounds = array<i64: 128, 128>}, {pipeline_mode = #tpu.pipeline_mode<synchronous>, transform_indices = @transform_3, window_bounds = array<i64: 1, 128>}, {pipeline_mode = #tpu.pipeline_mode<synchronous>, transform_indices = @transform_4, window_bounds = array<i64: 1, 128>}, {pipeline_mode = #tpu.pipeline_mode<synchronous>, transform_indices = @transform_5, window_bounds = array<i64: 128, 256>}, {pipeline_mode = #tpu.pipeline_mode<synchronous>, transform_indices = @transform_6, window_bounds = array<i64: 1, 256>}, {pipeline_mode = #tpu.pipeline_mode<synchronous>, transform_indices = @transform_7, window_bounds = array<i64: 256, 128>}, {pipeline_mode = #tpu.pipeline_mode<synchronous>, transform_indices = @transform_8, window_bounds = array<i64: 1, 128>}, {transform_indices = @transform_9, window_bounds = array<i64: 128, 128>}]} {
    %c0 = arith.constant 0 : index
    %c0_0 = arith.constant 0 : index
    %0 = vector.load %arg1[%c0, %c0_0] : memref<128x128xf32, #tpu.memory_space<vmem>>, vector<128x128xf32>
    %c0_1 = arith.constant 0 : index
    %c0_2 = arith.constant 0 : index
    %1 = vector.load %arg3[%c0_1, %c0_2] : memref<128x128xf32, #tpu.memory_space<vmem>>, vector<128x128xf32>
    %cst = arith.constant dense<0.000000e+00> : vector<128x128xf32>
    %2 = tpu.matmul %0, %1, %cst {dimension_numbers = #tpu.dot_dimension_numbers<[1], [0], [0], [1], [0, 0, 1, 1], [], []>} : vector<128x128xf32>, vector<128x128xf32>, vector<128x128xf32> -> vector<128x128xf32>
    %c0_3 = arith.constant 0 : index
    %c0_4 = arith.constant 0 : index
    %3 = vector.load %arg4[%c0_3, %c0_4] : memref<1x128xf32, #tpu.memory_space<vmem>>, vector<1x128xf32>
    %4 = vector.broadcast %3 : vector<1x128xf32> to vector<128x128xf32>
    %5 = arith.addf %2, %4 : vector<128x128xf32>
    %c0_5 = arith.constant 0 : index
    %c0_6 = arith.constant 0 : index
    %6 = vector.load %arg2[%c0_5, %c0_6] : memref<128x1xi32, #tpu.memory_space<vmem>>, vector<128x1xi32>
    %c0_i32 = arith.constant 0 : i32
    %7 = vector.broadcast %c0_i32 : i32 to vector<128x1xi32>
    %8 = arith.cmpi ne, %6, %7 : vector<128x1xi32>
    %c0_7 = arith.constant 0 : index
    %c0_8 = arith.constant 0 : index
    %9 = vector.load %arg5[%c0_7, %c0_8] : memref<1x128xf32, #tpu.memory_space<vmem>>, vector<1x128xf32>
    %10 = vector.shape_cast %8 : vector<128x1xi1> to vector<128x1xi1>
    %11 = vector.broadcast %10 : vector<128x1xi1> to vector<128x128xi1>
    %12 = vector.shape_cast %9 : vector<1x128xf32> to vector<1x128xf32>
    %13 = vector.broadcast %12 : vector<1x128xf32> to vector<128x128xf32>
    %14 = arith.select %11, %13, %5 : vector<128x128xi1>, vector<128x128xf32>
    %c0_9 = arith.constant 0 : index
    %c0_10 = arith.constant 0 : index
    %15 = vector.load %arg6[%c0_9, %c0_10] : memref<128x256xf32, #tpu.memory_space<vmem>>, vector<128x256xf32>
    %cst_11 = arith.constant dense<0.000000e+00> : vector<128x256xf32>
    %16 = tpu.matmul %14, %15, %cst_11 {dimension_numbers = #tpu.dot_dimension_numbers<[1], [0], [0], [1], [0, 0, 1, 1], [], []>} : vector<128x128xf32>, vector<128x256xf32>, vector<128x256xf32> -> vector<128x256xf32>
    %c0_12 = arith.constant 0 : index
    %c0_13 = arith.constant 0 : index
    %17 = vector.load %arg7[%c0_12, %c0_13] : memref<1x256xf32, #tpu.memory_space<vmem>>, vector<1x256xf32>
    %18 = vector.broadcast %17 : vector<1x256xf32> to vector<128x256xf32>
    %19 = arith.addf %16, %18 : vector<128x256xf32>
    %20 = arith.mulf %19, %19 : vector<128x256xf32>
    %21 = arith.mulf %19, %20 : vector<128x256xf32>
    %cst_14 = arith.constant 4.471500e-02 : f32
    %22 = vector.broadcast %cst_14 : f32 to vector<128x256xf32>
    %23 = arith.mulf %22, %21 : vector<128x256xf32>
    %24 = arith.addf %19, %23 : vector<128x256xf32>
    %cst_15 = arith.constant 0.797884583 : f32
    %25 = vector.broadcast %cst_15 : f32 to vector<128x256xf32>
    %26 = arith.mulf %25, %24 : vector<128x256xf32>
    %27 = math.tanh %26 : vector<128x256xf32>
    %cst_16 = arith.constant 1.000000e+00 : f32
    %28 = vector.broadcast %cst_16 : f32 to vector<128x256xf32>
    %29 = arith.addf %28, %27 : vector<128x256xf32>
    %cst_17 = arith.constant 5.000000e-01 : f32
    %30 = vector.broadcast %cst_17 : f32 to vector<128x256xf32>
    %31 = arith.mulf %30, %29 : vector<128x256xf32>
    %32 = arith.mulf %19, %31 : vector<128x256xf32>
    %c0_18 = arith.constant 0 : index
    %c0_19 = arith.constant 0 : index
    %33 = vector.load %arg8[%c0_18, %c0_19] : memref<256x128xf32, #tpu.memory_space<vmem>>, vector<256x128xf32>
    %cst_20 = arith.constant dense<0.000000e+00> : vector<128x128xf32>
    %34 = tpu.matmul %32, %33, %cst_20 {dimension_numbers = #tpu.dot_dimension_numbers<[1], [0], [0], [1], [0, 0, 1, 1], [], []>} : vector<128x256xf32>, vector<256x128xf32>, vector<128x128xf32> -> vector<128x128xf32>
    %c0_21 = arith.constant 0 : index
    %c0_22 = arith.constant 0 : index
    %35 = vector.load %arg9[%c0_21, %c0_22] : memref<1x128xf32, #tpu.memory_space<vmem>>, vector<1x128xf32>
    %36 = vector.broadcast %35 : vector<1x128xf32> to vector<128x128xf32>
    %37 = arith.addf %34, %36 : vector<128x128xf32>
    %c0_23 = arith.constant 0 : index
    %c0_24 = arith.constant 0 : index
    %38 = vector.load %arg10[%c0_23, %c0_24] : memref<128x128xf32, #tpu.memory_space<vmem>>, vector<128x128xf32>
    tpu.vector_store %arg10[%c0_23, %c0_24], %37 {strides = array<i32>} : memref<128x128xf32, #tpu.memory_space<vmem>>, vector<128x128xf32>,
    return
  }
  func.func @transform_0(%arg0: i32) -> (i32, i32) {
    %c0_i32 = arith.constant 0 : i32
    %c0_i32_0 = arith.constant 0 : i32
    return %arg0, %c0_i32 : i32, i32
  }
  func.func @transform_1(%arg0: i32) -> (i32, i32) {
    %c0_i32 = arith.constant 0 : i32
    %c0_i32_0 = arith.constant 0 : i32
    return %arg0, %c0_i32 : i32, i32
  }
  func.func @transform_2(%arg0: i32) -> (i32, i32) {
    %c0_i32 = arith.constant 0 : i32
    %c0_i32_0 = arith.constant 0 : i32
    %c0_i32_1 = arith.constant 0 : i32
    return %c0_i32, %c0_i32_0 : i32, i32
  }
  func.func @transform_3(%arg0: i32) -> (i32, i32) {
    %c0_i32 = arith.constant 0 : i32
    %c0_i32_0 = arith.constant 0 : i32
    %c0_i32_1 = arith.constant 0 : i32
    return %c0_i32, %c0_i32_0 : i32, i32
  }
  func.func @transform_4(%arg0: i32) -> (i32, i32) {
    %c0_i32 = arith.constant 0 : i32
    %c0_i32_0 = arith.constant 0 : i32
    %c0_i32_1 = arith.constant 0 : i32
    return %c0_i32, %c0_i32_0 : i32, i32
  }
  func.func @transform_5(%arg0: i32) -> (i32, i32) {
    %c0_i32 = arith.constant 0 : i32
    %c0_i32_0 = arith.constant 0 : i32
    %c0_i32_1 = arith.constant 0 : i32
    return %c0_i32, %c0_i32_0 : i32, i32
  }
  func.func @transform_6(%arg0: i32) -> (i32, i32) {
    %c0_i32 = arith.constant 0 : i32
    %c0_i32_0 = arith.constant 0 : i32
    %c0_i32_1 = arith.constant 0 : i32
    return %c0_i32, %c0_i32_0 : i32, i32
  }
  func.func @transform_7(%arg0: i32) -> (i32, i32) {
    %c0_i32 = arith.constant 0 : i32
    %c0_i32_0 = arith.constant 0 : i32
    %c0_i32_1 = arith.constant 0 : i32
    return %c0_i32, %c0_i32_0 : i32, i32
  }
  func.func @transform_8(%arg0: i32) -> (i32, i32) {
    %c0_i32 = arith.constant 0 : i32
    %c0_i32_0 = arith.constant 0 : i32
    %c0_i32_1 = arith.constant 0 : i32
    return %c0_i32, %c0_i32_0 : i32, i32
  }
  func.func @transform_9(%arg0: i32) -> (i32, i32) {
    %c0_i32 = arith.constant 0 : i32
    %c0_i32_0 = arith.constant 0 : i32
    return %arg0, %c0_i32 : i32, i32
  }
}

module attributes {stable_mosaic.version = 11 : i64} {
  func.func @_pred_kernel(%arg0: i32, %arg1: memref<64x1xi32, #tpu.memory_space<vmem>>, %arg2: memref<64x8xi32, #tpu.memory_space<vmem>>, %arg3: memref<512x128xf32, #tpu.memory_space<vmem>>, %arg4: memref<512x128xf32, #tpu.memory_space<vmem>>, %arg5: memref<128x128xf32, #tpu.memory_space<vmem>>, %arg6: memref<1x128xf32, #tpu.memory_space<vmem>>, %arg7: memref<128x128xf32, #tpu.memory_space<vmem>>, %arg8: memref<1x128xf32, #tpu.memory_space<vmem>>, %arg9: memref<128x128xf32, #tpu.memory_space<vmem>>, %arg10: memref<1x128xf32, #tpu.memory_space<vmem>>, %arg11: memref<64x8xf32, #tpu.memory_space<vmem>>) attributes {dimension_semantics = [#tpu.dimension_semantics<arbitrary>], iteration_bounds = array<i64: 1>, scalar_prefetch = 0 : i64, scratch_operands = 0 : i64, tpu.core_type = #tpu.core_type<tc>, window_params = [{pipeline_mode = #tpu.pipeline_mode<synchronous>, transform_indices = @transform_0, window_bounds = array<i64: 64, 1>}, {pipeline_mode = #tpu.pipeline_mode<synchronous>, transform_indices = @transform_1, window_bounds = array<i64: 64, 8>}, {pipeline_mode = #tpu.pipeline_mode<synchronous>, transform_indices = @transform_2, window_bounds = array<i64: 512, 128>}, {pipeline_mode = #tpu.pipeline_mode<synchronous>, transform_indices = @transform_3, window_bounds = array<i64: 512, 128>}, {pipeline_mode = #tpu.pipeline_mode<synchronous>, transform_indices = @transform_4, window_bounds = array<i64: 128, 128>}, {pipeline_mode = #tpu.pipeline_mode<synchronous>, transform_indices = @transform_5, window_bounds = array<i64: 1, 128>}, {pipeline_mode = #tpu.pipeline_mode<synchronous>, transform_indices = @transform_6, window_bounds = array<i64: 128, 128>}, {pipeline_mode = #tpu.pipeline_mode<synchronous>, transform_indices = @transform_7, window_bounds = array<i64: 1, 128>}, {pipeline_mode = #tpu.pipeline_mode<synchronous>, transform_indices = @transform_8, window_bounds = array<i64: 128, 128>}, {pipeline_mode = #tpu.pipeline_mode<synchronous>, transform_indices = @transform_9, window_bounds = array<i64: 1, 128>}, {pipeline_mode = #tpu.pipeline_mode<synchronous>, transform_indices = @transform_10, window_bounds = array<i64: 64, 8>}]} {
    %c0 = arith.constant 0 : index
    %c0_0 = arith.constant 0 : index
    %0 = vector.load %arg1[%c0, %c0_0] : memref<64x1xi32, #tpu.memory_space<vmem>>, vector<64x1xi32>
    %1 = tpu.iota {dimensions = array<i32: 1>} : vector<64x512xi32>
    %2 = vector.broadcast %0 : vector<64x1xi32> to vector<64x512xi32>
    %3 = arith.cmpi eq, %2, %1 : vector<64x512xi32>
    %4 = arith.extui %3 : vector<64x512xi1> to vector<64x512xi32>
    %5 = arith.sitofp %4 : vector<64x512xi32> to vector<64x512xf32>
    %c0_1 = arith.constant 0 : index
    %c0_2 = arith.constant 0 : index
    %6 = vector.load %arg3[%c0_1, %c0_2] : memref<512x128xf32, #tpu.memory_space<vmem>>, vector<512x128xf32>
    %cst = arith.constant dense<0.000000e+00> : vector<64x128xf32>
    %7 = tpu.matmul %5, %6, %cst {dimension_numbers = #tpu.dot_dimension_numbers<[1], [0], [0], [1], [0, 0, 1, 1], [], []>} : vector<64x512xf32>, vector<512x128xf32>, vector<64x128xf32> -> vector<64x128xf32>
    %c0_3 = arith.constant 0 : index
    %c0_4 = arith.constant 0 : index
    %8 = vector.load %arg4[%c0_3, %c0_4] : memref<512x128xf32, #tpu.memory_space<vmem>>, vector<512x128xf32>
    %cst_5 = arith.constant dense<0.000000e+00> : vector<64x128xf32>
    %9 = tpu.matmul %5, %8, %cst_5 {dimension_numbers = #tpu.dot_dimension_numbers<[1], [0], [0], [1], [0, 0, 1, 1], [], []>} : vector<64x512xf32>, vector<512x128xf32>, vector<64x128xf32> -> vector<64x128xf32>
    %c0_6 = arith.constant 0 : index
    %c0_7 = arith.constant 0 : index
    %10 = vector.load %arg5[%c0_6, %c0_7] : memref<128x128xf32, #tpu.memory_space<vmem>>, vector<128x128xf32>
    %cst_8 = arith.constant dense<0.000000e+00> : vector<64x128xf32>
    %11 = tpu.matmul %7, %10, %cst_8 {dimension_numbers = #tpu.dot_dimension_numbers<[1], [0], [0], [1], [0, 0, 1, 1], [], []>} : vector<64x128xf32>, vector<128x128xf32>, vector<64x128xf32> -> vector<64x128xf32>
    %c0_9 = arith.constant 0 : index
    %c0_10 = arith.constant 0 : index
    %12 = vector.load %arg6[%c0_9, %c0_10] : memref<1x128xf32, #tpu.memory_space<vmem>>, vector<1x128xf32>
    %13 = vector.broadcast %12 : vector<1x128xf32> to vector<64x128xf32>
    %14 = arith.addf %11, %13 : vector<64x128xf32>
    %c0_11 = arith.constant 0 : index
    %c0_12 = arith.constant 0 : index
    %15 = vector.load %arg7[%c0_11, %c0_12] : memref<128x128xf32, #tpu.memory_space<vmem>>, vector<128x128xf32>
    %cst_13 = arith.constant dense<0.000000e+00> : vector<64x128xf32>
    %16 = tpu.matmul %14, %15, %cst_13 {dimension_numbers = #tpu.dot_dimension_numbers<[1], [0], [0], [1], [0, 0, 1, 1], [], []>} : vector<64x128xf32>, vector<128x128xf32>, vector<64x128xf32> -> vector<64x128xf32>
    %c0_14 = arith.constant 0 : index
    %c0_15 = arith.constant 0 : index
    %17 = vector.load %arg8[%c0_14, %c0_15] : memref<1x128xf32, #tpu.memory_space<vmem>>, vector<1x128xf32>
    %18 = vector.broadcast %17 : vector<1x128xf32> to vector<64x128xf32>
    %19 = arith.addf %16, %18 : vector<64x128xf32>
    %c0_16 = arith.constant 0 : index
    %c0_17 = arith.constant 0 : index
    %20 = vector.load %arg9[%c0_16, %c0_17] : memref<128x128xf32, #tpu.memory_space<vmem>>, vector<128x128xf32>
    %cst_18 = arith.constant dense<0.000000e+00> : vector<64x128xf32>
    %21 = tpu.matmul %9, %20, %cst_18 {dimension_numbers = #tpu.dot_dimension_numbers<[1], [0], [0], [1], [0, 0, 1, 1], [], []>} : vector<64x128xf32>, vector<128x128xf32>, vector<64x128xf32> -> vector<64x128xf32>
    %c0_19 = arith.constant 0 : index
    %c0_20 = arith.constant 0 : index
    %22 = vector.load %arg10[%c0_19, %c0_20] : memref<1x128xf32, #tpu.memory_space<vmem>>, vector<1x128xf32>
    %23 = vector.broadcast %22 : vector<1x128xf32> to vector<64x128xf32>
    %24 = arith.addf %21, %23 : vector<64x128xf32>
    %25 = arith.mulf %19, %19 : vector<64x128xf32>
    %cst_21 = arith.constant dense<0.000000e+00> : vector<64xf32>
    %26 = vector.multi_reduction <add>, %25, %cst_21 [1] : vector<64x128xf32> to vector<64xf32>
    %27 = vector.shape_cast %26 : vector<64xf32> to vector<64x1xf32>
    %28 = math.rsqrt %27 : vector<64x1xf32>
    %cst_22 = arith.constant 1.000000e+08 : f32
    %29 = vector.broadcast %cst_22 : f32 to vector<64x1xf32>
    %30 = arith.minimumf %28, %29 : vector<64x1xf32>
    %31 = vector.broadcast %30 : vector<64x1xf32> to vector<64x128xf32>
    %32 = arith.mulf %19, %31 : vector<64x128xf32>
    %cst_23 = arith.constant dense<0.000000e+00> : vector<64x64xf32>
    %33 = tpu.matmul %24, %32, %cst_23 {dimension_numbers = #tpu.dot_dimension_numbers<[1], [1], [0], [0], [0, 0, 1, 0], [], []>} : vector<64x128xf32>, vector<64x128xf32>, vector<64x64xf32> -> vector<64x64xf32>
    %c0_24 = arith.constant 0 : index
    %c0_25 = arith.constant 0 : index
    %34 = vector.load %arg2[%c0_24, %c0_25] : memref<64x8xi32, #tpu.memory_space<vmem>>, vector<64x8xi32>
    %35 = vector.shape_cast %34 : vector<64x8xi32> to vector<64x8x1xi32>
    %36 = tpu.iota {dimensions = array<i32: 2>} : vector<64x8x64xi32>
    %37 = vector.broadcast %35 : vector<64x8x1xi32> to vector<64x8x64xi32>
    %38 = arith.cmpi eq, %37, %36 : vector<64x8x64xi32>
    %39 = vector.shape_cast %33 : vector<64x64xf32> to vector<64x1x64xf32>
    %cst_26 = arith.constant 0.000000e+00 : f32
    %40 = vector.shape_cast %39 : vector<64x1x64xf32> to vector<64x1x64xf32>
    %41 = vector.broadcast %40 : vector<64x1x64xf32> to vector<64x8x64xf32>
    %42 = vector.broadcast %cst_26 : f32 to vector<64x8x64xf32>
    %43 = arith.select %38, %41, %42 : vector<64x8x64xi1>, vector<64x8x64xf32>
    %cst_27 = arith.constant dense<0.000000e+00> : vector<64x8xf32>
    %44 = vector.multi_reduction <add>, %43, %cst_27 [2] : vector<64x8x64xf32> to vector<64x8xf32>
    %45 = arith.mulf %24, %24 : vector<64x128xf32>
    %cst_28 = arith.constant dense<0.000000e+00> : vector<64xf32>
    %46 = vector.multi_reduction <add>, %45, %cst_28 [1] : vector<64x128xf32> to vector<64xf32>
    %47 = vector.shape_cast %46 : vector<64xf32> to vector<64x1xf32>
    %48 = math.rsqrt %47 : vector<64x1xf32>
    %cst_29 = arith.constant 1.000000e+08 : f32
    %49 = vector.broadcast %cst_29 : f32 to vector<64x1xf32>
    %50 = arith.minimumf %48, %49 : vector<64x1xf32>
    %51 = vector.broadcast %50 : vector<64x1xf32> to vector<64x8xf32>
    %52 = arith.mulf %44, %51 : vector<64x8xf32>
    %cst_30 = arith.constant 1.000000e+01 : f32
    %53 = vector.broadcast %cst_30 : f32 to vector<64x8xf32>
    %54 = arith.mulf %52, %53 : vector<64x8xf32>
    %55 = tpu.iota {dimensions = array<i32: 1>} : vector<64x8xi32>
    %56 = vector.extract_strided_slice %34 {offsets = [0, 0], sizes = [64, 1], strides = [1, 1]} : vector<64x8xi32> to vector<64x1xi32>
    %57 = vector.broadcast %56 : vector<64x1xi32> to vector<64x8xi32>
    %58 = arith.cmpi eq, %34, %57 : vector<64x8xi32>
    %c1_i32 = arith.constant 1 : i32
    %59 = vector.broadcast %c1_i32 : i32 to vector<64x8xi32>
    %60 = arith.cmpi sge, %55, %59 : vector<64x8xi32>
    %61 = arith.andi %58, %60 : vector<64x8xi1>
    %cst_31 = arith.constant 0xFF800000 : f32
    %62 = vector.broadcast %cst_31 : f32 to vector<64x8xf32>
    %63 = arith.select %61, %62, %54 : vector<64x8xi1>, vector<64x8xf32>
    %c0_32 = arith.constant 0 : index
    %c0_33 = arith.constant 0 : index
    %64 = vector.load %arg11[%c0_32, %c0_33] : memref<64x8xf32, #tpu.memory_space<vmem>>, vector<64x8xf32>
    tpu.vector_store %arg11[%c0_32, %c0_33], %63 {strides = array<i32>} : memref<64x8xf32, #tpu.memory_space<vmem>>, vector<64x8xf32>,
    return
  }
  func.func @transform_0(%arg0: i32) -> (i32, i32) {
    %c0_i32 = arith.constant 0 : i32
    %c0_i32_0 = arith.constant 0 : i32
    %c0_i32_1 = arith.constant 0 : i32
    return %c0_i32, %c0_i32_0 : i32, i32
  }
  func.func @transform_1(%arg0: i32) -> (i32, i32) {
    %c0_i32 = arith.constant 0 : i32
    %c0_i32_0 = arith.constant 0 : i32
    %c0_i32_1 = arith.constant 0 : i32
    return %c0_i32, %c0_i32_0 : i32, i32
  }
  func.func @transform_2(%arg0: i32) -> (i32, i32) {
    %c0_i32 = arith.constant 0 : i32
    %c0_i32_0 = arith.constant 0 : i32
    %c0_i32_1 = arith.constant 0 : i32
    return %c0_i32, %c0_i32_0 : i32, i32
  }
  func.func @transform_3(%arg0: i32) -> (i32, i32) {
    %c0_i32 = arith.constant 0 : i32
    %c0_i32_0 = arith.constant 0 : i32
    %c0_i32_1 = arith.constant 0 : i32
    return %c0_i32, %c0_i32_0 : i32, i32
  }
  func.func @transform_4(%arg0: i32) -> (i32, i32) {
    %c0_i32 = arith.constant 0 : i32
    %c0_i32_0 = arith.constant 0 : i32
    %c0_i32_1 = arith.constant 0 : i32
    return %c0_i32, %c0_i32_0 : i32, i32
  }
  func.func @transform_5(%arg0: i32) -> (i32, i32) {
    %c0_i32 = arith.constant 0 : i32
    %c0_i32_0 = arith.constant 0 : i32
    %c0_i32_1 = arith.constant 0 : i32
    return %c0_i32, %c0_i32_0 : i32, i32
  }
  func.func @transform_6(%arg0: i32) -> (i32, i32) {
    %c0_i32 = arith.constant 0 : i32
    %c0_i32_0 = arith.constant 0 : i32
    %c0_i32_1 = arith.constant 0 : i32
    return %c0_i32, %c0_i32_0 : i32, i32
  }
  func.func @transform_7(%arg0: i32) -> (i32, i32) {
    %c0_i32 = arith.constant 0 : i32
    %c0_i32_0 = arith.constant 0 : i32
    %c0_i32_1 = arith.constant 0 : i32
    return %c0_i32, %c0_i32_0 : i32, i32
  }
  func.func @transform_8(%arg0: i32) -> (i32, i32) {
    %c0_i32 = arith.constant 0 : i32
    %c0_i32_0 = arith.constant 0 : i32
    %c0_i32_1 = arith.constant 0 : i32
    return %c0_i32, %c0_i32_0 : i32, i32
  }
  func.func @transform_9(%arg0: i32) -> (i32, i32) {
    %c0_i32 = arith.constant 0 : i32
    %c0_i32_0 = arith.constant 0 : i32
    %c0_i32_1 = arith.constant 0 : i32
    return %c0_i32, %c0_i32_0 : i32, i32
  }
  func.func @transform_10(%arg0: i32) -> (i32, i32) {
    %c0_i32 = arith.constant 0 : i32
    %c0_i32_0 = arith.constant 0 : i32
    %c0_i32_1 = arith.constant 0 : i32
    return %c0_i32, %c0_i32_0 : i32, i32
  }
}

</mosaic_0001>

<bundles_post_ra>
// kernel: wav2vec2_forward.2
= control target key start
LH: loop header
LB: loop body
LE: loop exit
PB: predicated region body
PF: predicated region fallthrough
CT: control target
= control target key end

     0   :  { %14 = vsyncpa [#allocation3], 0  ;;  %s2182_s0 = inlined_call_operand.vmem [shape: f32[512,128], index: 0, kind: input, shape index: {}]   ;;  %s2183_s1 = inlined_call_operand.vmem [shape: s32[512,1], index: 1, kind: input, shape index: {}]   ;;  %s2184_s2 = inlined_call_operand.hbm [shape: f32[128,128], index: 2, kind: input, shape index: {}]   ;;  %s2185_s3 = inlined_call_operand.vmem [shape: f32[1,128], index: 3, kind: input, shape index: {}]   ;;  %s2186_s4 = inlined_call_operand.vmem [shape: f32[1,128], index: 4, kind: input, shape index: {}]   ;;  %s2187_s5 = inlined_call_operand.hbm [shape: f32[128,256], index: 5, kind: input, shape index: {}]   ;;  %s2188_s6 = inlined_call_operand.vmem [shape: f32[1,256], index: 6, kind: input, shape index: {}]   ;;  %s2189_s7 = inlined_call_operand.hbm [shape: f32[256,128], index: 7, kind: input, shape index: {}]   ;;  %s2190_s8 = inlined_call_operand.vmem [shape: f32[1,128], index: 8, kind: input, shape index: {}]   ;;  %s2191_s9 = inlined_call_operand.vmem [shape: f32[512,128], index: 9, kind: output, shape index: {}]  }
   0x1   :  { %15 = vsyncpa [#allocation5], 0  ;;  %s1723_s30 = smov 0  }
   0x2 LB: > { %s282_s12 = sshll.u32 %s2187_s5, 4  ;;  %s1378_s13 = sadd.s32 4294967295, %s1663_s30   ;;  %s1663_s30 = sphi %s1723_s30, %s21_s30   ;;  %s283_s12 = int_to_ptr.hbm [resolvable:$true] %s282_s12 }
   0x3   : > { %p1380_p0 = scmp.ge.s32.totalorder %s1663_s30, 1  ;;  %p251_p1 = scmp.lt.s32.totalorder %s1663_s30, 5 }
   0x4   : > { %p1736_p2 = scmp.eq.s32.totalorder %s1378_s13, 0  ;;  %s1665_s16 = smov [#allocation4]  }
   0x5   : > { %p1740_p3 = pnand %p1380_p0, %p251_p1  ;;  %s284_s17 = sshll.u32 %s1665_s16, 4  ;;  %s285_s17 = int_to_ptr.vmem [resolvable:$true] %s284_s17 }
   0x6   : > { %s262_s20 = sshll.u32 %s2184_s2, 4  ;;  %s1666_s22 = smov [#allocation2]   ;;  %s263_s20 = int_to_ptr.hbm [resolvable:$true] %s262_s20 }
   0x7   : > { %p1457_p4 = pneg %p1740_p3  ;;  %s264_s23 = sshll.u32 %s1666_s22, 4  ;;  %s265_s23 = int_to_ptr.vmem [resolvable:$true] %s264_s23 }
   0x8   : > { %s1667_s24 = smov 256   ;;  %s1668_s25 = smov 16  }
   0x9   : > { %p1751_p5 = pnand %p1736_p2, %p1457_p4  ;;  %s299_s28 = sshll.u32 %s2189_s7, 4  ;;  %s300_s28 = int_to_ptr.hbm [resolvable:$true] %s299_s28 }
   0xa   : > { %s1669_s29 = smov 128   ;;  %s1670_s10 = smov 8  }
   0xb   : > { %1463 = dma.hbm_to_vmem [thread:$0]  (!%p1751_p5), %s283_s12, 4096, %s285_s17, [#allocation5], %s1667_s24, %s1667_s24, %s1668_s25  }
   0xc   : > { %1460 = dma.hbm_to_vmem [thread:$0]  (!%p1751_p5), %s263_s20, 2048, %s265_s23, [#allocation3], %s1669_s29, %s1669_s29, %s1670_s10  }
   0xd   : > { %s1671_s11 = smov [#allocation6]   ;;  %338 = sbr.rel (%p1740_p3) target bundleno = 595 (0x253), region = 56 }
   0xe   : > { %s301_s16 = sshll.u32 %s1671_s11, 4  ;;  %s302_s16 = int_to_ptr.vmem [resolvable:$true] %s301_s16 }
   0xf   : > { %1466 = dma.hbm_to_vmem [thread:$0]  (!%p1751_p5), %s300_s28, 4096, %s302_s16, [#allocation5], %s1669_s29, %s1669_s29, %s1670_s10  }
  0x12   : > { %1654 = dma.done.wait (%p1736_p2), [#allocation3], 2048  }
  0x13   : > { %1656 = vsyncadd (%p1736_p2), [#allocation3], 4294965248 }
  0x14   : > { %1658 = dma.done.wait (%p1736_p2), [#allocation5], 8192  }
  0x15   : > { %1660 = vsyncadd (%p1736_p2), [#allocation5], 4294959104  ;;  %s1389_s12 = sshll.u32 %s1378_s13, 4  ;;  %v1672_v0 = vmov 0   ;;  %v439_v1 = vld [vmem:[#allocation2 + $0x78] sm:$0xff]  ;;  %v438_v2 = vld [vmem:[#allocation2 + $0x70] sm:$0xff] }
  0x16   : > { %1489 = vset.pattern.permute.xlu0 %v1672_v0  ;;  %p391_p6 = scmp.lt.s32.totalorder %s1389_s12, 63  ;;  %1490 = vset.pattern.permute.xlu1 %v1672_v0  ;;  %v437_v5 = vld [vmem:[#allocation2 + $0x68] sm:$0xff]  ;;  %v436_v6 = vld [vmem:[#allocation2 + $0x60] sm:$0xff]  ;;  %v435_v8 = vld [vmem:[#allocation2 + $0x58] sm:$0xff] }
  0x17   : > { %1491 = vset.pattern.permute.xlu2 %v1672_v0  ;;  %444 = vmatpush.msra.mxu0 %v439_v1  ;;  %v434_v9 = vld [vmem:[#allocation2 + $0x50] sm:$0xff]  ;;  %v433_v11 = vld [vmem:[#allocation2 + $0x48] sm:$0xff]  ;;  %v432_v12 = vld [vmem:[#allocation2 + $0x40] sm:$0xff] }
  0x18   : > { %s2196_s12 = smov (!%p391_p6, %s1389_s12), 63  ;;  %1397 = vmatpush.msra.mxu1 %v439_v1  ;;  %1398 = vmatpush.msra.mxu2 %v439_v1  ;;  %v431_v14 = vld [vmem:[#allocation2 + $0x38] sm:$0xff]  ;;  %v430_v15 = vld [vmem:[#allocation2 + $0x30] sm:$0xff]  ;;  %v429_v17 = vld [vmem:[#allocation2 + $0x28] sm:$0xff] }
  0x19   : > { %s1779_s15 = sshll.u32 %s2196_s12, 3  ;;  %1399 = vmatpush.msra.mxu3 %v439_v1  ;;  %445 = vmatpush.msra.mxu0 %v438_v2  ;;  %v428_v18 = vld [vmem:[#allocation2 + $0x20] sm:$0xff]  ;;  %v427_v21 = vld [vmem:[#allocation2 + $0x18] sm:$0xff]  ;;  %v426_v22 = vld [vmem:[#allocation2 + $0x10] sm:$0xff] }
  0x1a   : > { %s1785_s14 = scalar_lea.vmem %s2183_s1, %s1779_s15  ;;  %1400 = vmatpush.msra.mxu1 %v438_v2  ;;  %1401 = vmatpush.msra.mxu2 %v438_v2  ;;  %v425_v25 = vld [vmem:[#allocation2 + $0x8] sm:$0xff]  ;;  %s1801_s20 = scalar_lea.vmem %s2182_s0, %s1779_s15  ;;  %v424_v27 = vld [vmem:[#allocation2] sm:$0xff] }
  0x1b   : > { %v509_v3 = vld [vmem:[%s1785_s14] sm:$0xff]  ;;  %1402 = vmatpush.msra.mxu3 %v438_v2  ;;  %v510_v7 = vld [vmem:[%s1785_s14 + $0x8] sm:$0xff]  ;;  %446 = vmatpush.msra.mxu0 %v437_v5  ;;  %v515_v13 = vld [vmem:[%s1785_s14 + $0x30] sm:$0xff]  ;;  %s2146_s11 = scalar_lea.vmem %s2191_s9, %s1779_s15 }
  0x1c   : > { %vm525_vm0 = vcmp.ne.s32.totalorder %v509_v3, 0  ;;  %1403 = vmatpush.msra.mxu1 %v437_v5  ;;  %1404 = vmatpush.msra.mxu2 %v437_v5  ;;  %vm526_vm1 = vcmp.ne.s32.totalorder %v510_v7, 0  ;;  %vm531_vm2 = vcmp.ne.s32.totalorder %v515_v13, 0  ;;  %v511_v19 = vld [vmem:[%s1785_s14 + $0x10] sm:$0xff]  ;;  %v518_v20 = vld [vmem:[%s1785_s14 + $0x48] sm:$0xff]  ;;  %v512_v26 = vld [vmem:[%s1785_s14 + $0x18] sm:$0xff] }
  0x1d   : > { %v542_v4 = vsel %vm525_vm0, 1, %v1672_v0  ;;  %1405 = vmatpush.msra.mxu3 %v437_v5  ;;  %447 = vmatpush.msra.mxu0 %v436_v6  ;;  %v543_v10 = vsel %vm526_vm1, 1, %v1672_v0  ;;  %v548_v16 = vsel %vm531_vm2, 1, %v1672_v0  ;;  %vm527_vm3 = vcmp.ne.s32.totalorder %v511_v19, 0  ;;  %v521_v28 = vld [vmem:[%s1785_s14 + $0x60] sm:$0xff]  ;;  %v523_v30 = vld [vmem:[%s1785_s14 + $0x70] sm:$0xff] }
  0x1e   : > { %559 = vperm.xlu0 %1489, %v542_v4   ;;  %1406 = vmatpush.msra.mxu1 %v436_v6  ;;  %vm534_vm4 = vcmp.ne.s32.totalorder %v518_v20, 0  ;;  %v544_v23 = vsel %vm527_vm3, 1, %v1672_v0  ;;  %v513_v29 = vld [vmem:[%s1785_s14 + $0x20] sm:$0xff]  ;;  %vm528_vm6 = vcmp.ne.s32.totalorder %v512_v26, 0  ;;  %vm537_vm7 = vcmp.ne.s32.totalorder %v521_v28, 0  ;;  %v514_v39 = vld [vmem:[%s1785_s14 + $0x28] sm:$0xff] }
  0x1f   : > { %1407 = vmatpush.msra.mxu2 %v436_v6  ;;  %1408 = vmatpush.msra.mxu3 %v436_v6  ;;  %v551_v24 = vsel %vm534_vm4, 1, %v1672_v0  ;;  %vm529_vm5 = vcmp.ne.s32.totalorder %v513_v29, 0  ;;  %v408_v31 = vld [vmem:[%s1801_s20] sm:$0xff]  ;;  %vm539_vm8 = vcmp.ne.s32.totalorder %v523_v30, 0  ;;  %v545_v37 = vsel %vm528_vm6, 1, %v1672_v0  ;;  %v516_v40 = vld [vmem:[%s1785_s14 + $0x38] sm:$0xff] }
  0x20   : > { %448 = vmatpush.msra.mxu0 %v435_v8  ;;  %1409 = vmatpush.msra.mxu1 %v435_v8  ;;  %v412_v32 = vld [vmem:[%s1801_s20 + $0x20] sm:$0xff]  ;;  %v546_v35 = vsel %vm529_vm5, 1, %v1672_v0  ;;  %v556_v36 = vsel %vm539_vm8, 1, %v1672_v0  ;;  %v554_v38 = vsel %vm537_vm7, 1, %v1672_v0  ;;  %v524_v41 = vld [vmem:[%s1785_s14 + $0x78] sm:$0xff]  ;;  %vm530_vm9 = vcmp.ne.s32.totalorder %v514_v39, 0 }
  0x21   : > { %1410 = vmatpush.msra.mxu2 %v435_v8  ;;  %1411 = vmatpush.msra.mxu3 %v435_v8  ;;  %v416_v33 = vld [vmem:[%s1801_s20 + $0x40] sm:$0xff]  ;;  %v409_v42 = vld [vmem:[%s1801_s20 + $0x8] sm:$0xff]  ;;  %vm532_vm10 = vcmp.ne.s32.totalorder %v516_v40, 0  ;;  %vm540_vm11 = vcmp.ne.s32.totalorder %v524_v41, 0  ;;  %v547_v46 = vsel %vm530_vm9, 1, %v1672_v0  ;;  %v519_v50 = vld [vmem:[%s1785_s14 + $0x50] sm:$0xff] }
  0x22   : > { %449 = vmatpush.msra.mxu0 %v434_v9  ;;  %1412 = vmatpush.msra.mxu1 %v434_v9  ;;  %v420_v34 = vld [vmem:[%s1801_s20 + $0x60] sm:$0xff]  ;;  %v413_v43 = vld [vmem:[%s1801_s20 + $0x28] sm:$0xff]  ;;  %v549_v47 = vsel %vm532_vm10, 1, %v1672_v0  ;;  %v557_v48 = vsel %vm540_vm11, 1, %v1672_v0  ;;  %v410_v51 = vld [vmem:[%s1801_s20 + $0x10] sm:$0xff]  ;;  %vm535_vm13 = vcmp.ne.s32.totalorder %v519_v50, 0 }
  0x23   : > { %1413 = vmatpush.msra.mxu2 %v434_v9  ;;  %1414 = vmatpush.msra.mxu3 %v434_v9  ;;  %v417_v44 = vld [vmem:[%s1801_s20 + $0x48] sm:$0xff]  ;;  %v517_v49 = vld [vmem:[%s1785_s14 + $0x40] sm:$0xff]  ;;  %v414_v52 = vld [vmem:[%s1801_s20 + $0x30] sm:$0xff]  ;;  %v552_v56 = vsel %vm535_vm13, 1, %v1672_v0 }
  0x24   : > { %450 = vmatpush.msra.mxu0 %v433_v11  ;;  %1415 = vmatpush.msra.mxu1 %v433_v11  ;;  %v421_v45 = vld [vmem:[%s1801_s20 + $0x68] sm:$0xff]  ;;  %vm533_vm12 = vcmp.ne.s32.totalorder %v517_v49, 0  ;;  %v418_v53 = vld [vmem:[%s1801_s20 + $0x50] sm:$0xff]  ;;  %v520_v57 = vld [vmem:[%s1785_s14 + $0x58] sm:$0xff] }
  0x25   : > { %1416 = vmatpush.msra.mxu2 %v433_v11  ;;  %1417 = vmatpush.msra.mxu3 %v433_v11  ;;  %v422_v54 = vld [vmem:[%s1801_s20 + $0x70] sm:$0xff]  ;;  %v550_v55 = vsel %vm533_vm12, 1, %v1672_v0  ;;  %v522_v58 = vld [vmem:[%s1785_s14 + $0x68] sm:$0xff]  ;;  %vm536_vm14 = vcmp.ne.s32.totalorder %v520_v57, 0  ;;  %v411_v59 = vld [vmem:[%s1801_s20 + $0x18] sm:$0xff] }
  0x26   : > { %562 = vperm.xlu0 %1489, %v543_v10   ;;  %451 = vmatpush.msra.mxu0 %v432_v12  ;;  %vm538_vm15 = vcmp.ne.s32.totalorder %v522_v58, 0  ;;  %v415_v60 = vld [vmem:[%s1801_s20 + $0x38] sm:$0xff]  ;;  %v553_v63 = vsel %vm536_vm14, 1, %v1672_v0  ;;  %v671_v2 = vld [vmem:[#allocation4 + $0xf0] sm:$0xff]  ;;  %v669_v4 = vld [vmem:[#allocation4 + $0xe0] sm:$0xff] }
  0x27   : > { %1418 = vmatpush.msra.mxu1 %v432_v12  ;;  %1419 = vmatpush.msra.mxu2 %v432_v12  ;;  %v419_v61 = vld [vmem:[%s1801_s20 + $0x58] sm:$0xff]  ;;  %v555_v1 = vsel %vm538_vm15, 1, %v1672_v0  ;;  %v670_v5 = vld [vmem:[#allocation4 + $0xe8] sm:$0xff]  ;;  %v667_v6 = vld [vmem:[#allocation4 + $0xd0] sm:$0xff] }
  0x28   : > { %1420 = vmatpush.msra.mxu3 %v432_v12  ;;  %452 = vmatpush.msra.mxu0 %v431_v14  ;;  %v423_v62 = vld [vmem:[%s1801_s20 + $0x78] sm:$0xff]  ;;  %v665_v8 = vld [vmem:[#allocation4 + $0xc0] sm:$0xff]  ;;  %v666_v9 = vld [vmem:[#allocation4 + $0xc8] sm:$0xff] }
  0x29   : > { %1421 = vmatpush.msra.mxu1 %v431_v14  ;;  %1422 = vmatpush.msra.mxu2 %v431_v14  ;;  %v672_v3 = vld [vmem:[#allocation4 + $0xf8] sm:$0xff]  ;;  %v663_v0 = vld [vmem:[#allocation4 + $0xb0] sm:$0xff]  ;;  %v661_v11 = vld [vmem:[#allocation4 + $0xa0] sm:$0xff] }
  0x2a   : > { %1423 = vmatpush.msra.mxu3 %v431_v14  ;;  %453 = vmatpush.msra.mxu0 %v430_v15  ;;  %v668_v7 = vld [vmem:[#allocation4 + $0xd8] sm:$0xff]  ;;  %v662_v12 = vld [vmem:[#allocation4 + $0xa8] sm:$0xff]  ;;  %v659_v13 = vld [vmem:[#allocation4 + $0x90] sm:$0xff] }
  0x2b   : > { %1424 = vmatpush.msra.mxu1 %v430_v15  ;;  %1425 = vmatpush.msra.mxu2 %v430_v15  ;;  %v664_v10 = vld [vmem:[#allocation4 + $0xb8] sm:$0xff]  ;;  %v653_v19 = vld [vmem:[#allocation4 + $0x60] sm:$0xff]  ;;  %v654_v20 = vld [vmem:[#allocation4 + $0x68] sm:$0xff] }
  0x2c   : > { %1426 = vmatpush.msra.mxu3 %v430_v15  ;;  %454 = vmatpush.msra.mxu0 %v429_v17  ;;  %v660_v14 = vld [vmem:[#allocation4 + $0x98] sm:$0xff]  ;;  %v657_v15 = vld [vmem:[#allocation4 + $0x80] sm:$0xff]  ;;  %v646_v28 = vld [vmem:[#allocation4 + $0x28] sm:$0xff] }
  0x2d   : > { %1427 = vmatpush.msra.mxu1 %v429_v17  ;;  %1428 = vmatpush.msra.mxu2 %v429_v17  ;;  %v648_v26 = vld [vmem:[#allocation4 + $0x38] sm:$0xff]  ;;  %v643_v30 = vld [vmem:[#allocation4 + $0x10] sm:$0xff]  ;;  %v1850_v40 = vld [vmem:[%s2185_s3] ss:$0 sm:$0xff] }
  0x2e   : > { %577 = vperm.xlu0 %1489, %v548_v16   ;;  %1429 = vmatpush.msra.mxu3 %v429_v17  ;;  %v658_v16 = vld [vmem:[#allocation4 + $0x88] sm:$0xff]  ;;  %v655_v17 = vld [vmem:[#allocation4 + $0x70] sm:$0xff] }
  0x2f   : > { %455 = vmatpush.msra.mxu0 %v428_v18  ;;  %1430 = vmatpush.msra.mxu1 %v428_v18 }
  0x30   : > { %1431 = vmatpush.msra.mxu2 %v428_v18  ;;  %1432 = vmatpush.msra.mxu3 %v428_v18  ;;  %v656_v18 = vld [vmem:[#allocation4 + $0x78] sm:$0xff] }
  0x31   : > { %456 = vmatpush.msra.mxu0 %v427_v21  ;;  %1433 = vmatpush.msra.mxu1 %v427_v21 }
  0x32   : > { %1434 = vmatpush.msra.mxu2 %v427_v21  ;;  %1435 = vmatpush.msra.mxu3 %v427_v21  ;;  %v651_v21 = vld [vmem:[#allocation4 + $0x50] sm:$0xff] }
  0x33   : > { %457 = vmatpush.msra.mxu0 %v426_v22  ;;  %1436 = vmatpush.msra.mxu1 %v426_v22 }
  0x34   : > { %1437 = vmatpush.msra.mxu2 %v426_v22  ;;  %1438 = vmatpush.msra.mxu3 %v426_v22  ;;  %v652_v22 = vld [vmem:[#allocation4 + $0x58] sm:$0xff] }
  0x35   : > { %565 = vperm.xlu1 %1490, %v544_v23   ;;  %458 = vmatpush.msra.mxu0 %v425_v25  ;;  %v649_v23 = vld [vmem:[#allocation4 + $0x40] sm:$0xff] }
  0x36   : > { %586 = vperm.xlu0 %1489, %v551_v24   ;;  %1439 = vmatpush.msra.mxu1 %v425_v25  ;;  %v650_v24 = vld [vmem:[#allocation4 + $0x48] sm:$0xff] }
  0x37   : > { %1440 = vmatpush.msra.mxu2 %v425_v25  ;;  %1441 = vmatpush.msra.mxu3 %v425_v25  ;;  %v647_v25 = vld [vmem:[#allocation4 + $0x30] sm:$0xff] }
  0x38   : > { %459 = vmatpush.msra.mxu0 %v424_v27  ;;  %1442 = vmatpush.msra.mxu1 %v424_v27 }
  0x39   : > { %1443 = vmatpush.msra.mxu2 %v424_v27  ;;  %1444 = vmatpush.msra.mxu3 %v424_v27  ;;  %v645_v27 = vld [vmem:[#allocation4 + $0x20] sm:$0xff] }
  0x3a   : > { %460 = vmatmul.f32.vlgmr.msra.gmra.mxu0 %v408_v31  ;;  %472 = vmatmul.f32.vlgmr.msra.gmra.mxu1 %v412_v32  ;;  %v644_v31 = vld [vmem:[#allocation4 + $0x18] sm:$0xff]  ;;  %v641_v32 = vld [vmem:[#allocation4] sm:$0xff] }
  0x3b   : > { %484 = vmatmul.f32.vlgmr.msra.gmra.mxu2 %v416_v33  ;;  %496 = vmatmul.f32.vlgmr.msra.gmra.mxu3 %v420_v34  ;;  %v642_v33 = vld [vmem:[#allocation4 + $0x8] sm:$0xff] }
  0x3c   : > { %571 = vperm.xlu2 %1491, %v546_v35   ;;  %679 = vmatpush.msrb.mxu1 %v671_v2 }
  0x3d   : > { %568 = vperm.xlu1 %1490, %v545_v37   ;;  %744 = vmatpush.msrb.mxu2 %v672_v3 }
  0x3e   : > { %595 = vperm.xlu0 %1489, %v554_v38   ;;  %680 = vmatpush.msrb.mxu1 %v669_v4 }
  0x3f   : > { %745 = vmatpush.msrb.mxu2 %v670_v5 }
  0x40   : > { %681 = vmatpush.msrb.mxu1 %v667_v6 }
  0x41   : > { %746 = vmatpush.msrb.mxu2 %v668_v7 }
  0x42   : > { %463 = vmatmul.f32.gmra.mxu0 %v409_v42  ;;  %475 = vmatmul.f32.gmra.mxu1 %v413_v43  ;;  %v1855_v42 = vld [vmem:[%s2186_s4] ss:$0 sm:$0xff] }
  0x43   : > { %487 = vmatmul.f32.gmra.mxu2 %v417_v44  ;;  %499 = vmatmul.f32.gmra.mxu3 %v421_v45 }
  0x44   : > { %574 = vperm.xlu2 %1491, %v547_v46   ;;  %682 = vmatpush.msrb.mxu1 %v665_v8 }
  0x45   : > { %580 = vperm.xlu1 %1490, %v549_v47   ;;  %747 = vmatpush.msrb.mxu2 %v666_v9 }
  0x46   : > { %604 = vperm.xlu0 %1489, %v557_v48   ;;  %683 = vmatpush.msrb.mxu1 %v663_v0 }
  0x47   : > { %748 = vmatpush.msrb.mxu2 %v664_v10 }
  0x48   : > { %684 = vmatpush.msrb.mxu1 %v661_v11 }
  0x49   : > { %749 = vmatpush.msrb.mxu2 %v662_v12 }
  0x4a   : > { %466 = vmatmul.f32.gmra.mxu0 %v410_v51  ;;  %478 = vmatmul.f32.gmra.mxu1 %v414_v52 }
  0x4b   : > { %490 = vmatmul.f32.gmra.mxu2 %v418_v53  ;;  %502 = vmatmul.f32.gmra.mxu3 %v422_v54 }
  0x4c   : > { %583 = vperm.xlu2 %1491, %v550_v55   ;;  %685 = vmatpush.msrb.mxu1 %v659_v13 }
  0x4d   : > { %589 = vperm.xlu1 %1490, %v552_v56   ;;  %750 = vmatpush.msrb.mxu2 %v660_v14 }
  0x4e   : > { %686 = vmatpush.msrb.mxu1 %v657_v15 }
  0x4f   : > { %751 = vmatpush.msrb.mxu2 %v658_v16 }
  0x50   : > { %687 = vmatpush.msrb.mxu1 %v655_v17 }
  0x51   : > { %752 = vmatpush.msrb.mxu2 %v656_v18 }
  0x52   : > { %469 = vmatmul.f32.gmra.mxu0 %v411_v59  ;;  %481 = vmatmul.f32.gmra.mxu1 %v415_v60 }
  0x53   : > { %493 = vmatmul.f32.gmra.mxu2 %v419_v61  ;;  %505 = vmatmul.f32.gmra.mxu3 %v423_v62 }
  0x54   : > { %592 = vperm.xlu2 %1491, %v553_v63   ;;  %688 = vmatpush.msrb.mxu1 %v653_v19 }
  0x55   : > { %598 = vperm.xlu1 %1490, %v555_v1   ;;  %753 = vmatpush.msrb.mxu2 %v654_v20 }
  0x56   : > { %689 = vmatpush.msrb.mxu1 %v651_v21 }
  0x57   : > { %754 = vmatpush.msrb.mxu2 %v652_v22 }
  0x58   : > { %690 = vmatpush.msrb.mxu1 %v649_v23 }
  0x59   : > { %755 = vmatpush.msrb.mxu2 %v650_v24 }
  0x5a   : > { %691 = vmatpush.msrb.mxu1 %v647_v25 }
  0x5b   : > { %756 = vmatpush.msrb.mxu2 %v648_v26 }
  0x5c   : > { %601 = vperm.xlu2 %1491, %v556_v36   ;;  %692 = vmatpush.msrb.mxu1 %v645_v27 }
  0x5d   : > { %757 = vmatpush.msrb.mxu2 %v646_v28 }
  0x5e   : > { %693 = vmatpush.msrb.mxu1 %v643_v30 }
  0x5f   : > { %758 = vmatpush.msrb.mxu2 %v644_v31 }
  0x60   : > { %694 = vmatpush.msrb.mxu1 %v641_v32 }
  0x61   : > { %759 = vmatpush.msrb.mxu2 %v642_v33 }
  0x90   : > { %v560_v29 = vpop.permute.xlu0 %559 }
  0x91   : > { %vm606_vm0 = vcmp.eq.s32.totalorder %v560_v29, 1 }
  0x96   : > { %v1841_v35 = vpop.permute.xlu2 %571 }
  0x97   : > { %vm610_vm10 = vcmp.eq.s32.totalorder %v1841_v35, 1  ;;  %v1112_v35 = vld [vmem:[#allocation6 + $0x78] sm:$0xff] }
  0x98   : > { %v563_v34 = vpop.permute.xlu0 %562  ;;  %1133 = vmatpush.msrb.mxu3 %v1112_v35 }
  0x99   : > { %vm607_vm2 = vcmp.eq.s32.totalorder %v563_v34, 1 }
  0x9e   : > { %v1845_v38 = vpop.permute.xlu2 %574 }
  0x9f   : > { %vm611_vm13 = vcmp.eq.s32.totalorder %v1845_v38, 1  ;;  %v1109_v38 = vld [vmem:[#allocation6 + $0x60] sm:$0xff] }
  0xa0   : > { %v1843_v37 = vpop.permute.xlu0 %577 }
  0xa1   : > { %vm612_vm14 = vcmp.eq.s32.totalorder %v1843_v37, 1  ;;  %v1110_v37 = vld [vmem:[#allocation6 + $0x68] sm:$0xff] }
  0xa6   : > { %v584_v46 = vpop.permute.xlu2 %583 }
  0xa7   : > { %v566_v36 = vpop.permute.xlu1 %565  ;;  %vm614_vm1 = vcmp.eq.s32.totalorder %v584_v46, 1  ;;  %v1105_v46 = vld [vmem:[#allocation6 + $0x40] sm:$0xff] }
  0xa8   : > { %v587_v41 = vpop.permute.xlu0 %586  ;;  %vm608_vm4 = vcmp.eq.s32.totalorder %v566_v36, 1  ;;  %v1111_v36 = vld [vmem:[#allocation6 + $0x70] sm:$0xff] }
  0xa9   : > { %vm615_vm5 = vcmp.eq.s32.totalorder %v587_v41, 1  ;;  %1134 = vmatpush.msrb.mxu3 %v1111_v36  ;;  %v1127_v41 = vld [vmem:[#allocation6 + $0xf0] sm:$0xff] }
  0xab   : > { %1135 = vmatpush.msrb.mxu3 %v1110_v37 }
  0xad   : > { %1136 = vmatpush.msrb.mxu3 %v1109_v38 }
  0xae   : > { %v593_v58 = vpop.permute.xlu2 %592 }
  0xaf   : > { %v569_v39 = vpop.permute.xlu1 %568  ;;  %vm617_vm11 = vcmp.eq.s32.totalorder %v593_v58, 1  ;;  %v1099_v58 = vld [vmem:[#allocation6 + $0x10] sm:$0xff] }
  0xb0   : > { %v596_v52 = vpop.permute.xlu0 %595  ;;  %vm609_vm9 = vcmp.eq.s32.totalorder %v569_v39, 1  ;;  %v1128_v39 = vld [vmem:[#allocation6 + $0xf8] sm:$0xff] }
  0xb1   : > { %vm618_vm3 = vcmp.eq.s32.totalorder %v596_v52, 1  ;;  %1198 = vmatpush.msrb.mxu0 %v1128_v39  ;;  %v1102_v52 = vld [vmem:[#allocation6 + $0x28] sm:$0xff] }
  0xb3   : > { %1199 = vmatpush.msrb.mxu0 %v1127_v41 }
  0xb6   : > { %v602_v7 = vpop.permute.xlu2 %601 }
  0xb7   : > { %v461_v43 = vpop.f32.mrf.mxu0  ;;  %v1857_v44 = vpop.permute.xlu1 %580  ;;  %vm620_vm7 = vcmp.eq.s32.totalorder %v602_v7, 1 }
  0xb8   : > { %v462_v45 = vadd.f32 %v1850_v40, %v461_v43  ;;  %v473_v8 = vpop.f32.mrf.mxu1  ;;  %v605_v18 = vpop.permute.xlu0 %604  ;;  %vm613_vm15 = vcmp.eq.s32.totalorder %v1857_v44, 1  ;;  %v1126_v43 = vld [vmem:[#allocation6 + $0xe8] sm:$0xff] }
  0xb9   : > { %v474_v17 = vadd.f32 %v1850_v40, %v473_v8  ;;  %vm621_vm12 = vcmp.eq.s32.totalorder %v605_v18, 1  ;;  %1200 = vmatpush.msrb.mxu0 %v1126_v43  ;;  %v1106_v44 = vld [vmem:[#allocation6 + $0x48] sm:$0xff] }
  0xba   : > { %v625_v47 = vsel %vm606_vm0, %v1855_v42, %v462_v45  ;;  %v1125_v45 = vld [vmem:[#allocation6 + $0xe0] sm:$0xff] }
  0xbb   : > { %695 = vmatmul.f32.vlgmr.msrb.gmra.mxu1 %v625_v47  ;;  %760 = vmatmul.f32.vlgmr.msrb.gmra.mxu2 %v625_v47  ;;  %v629_v24 = vsel %vm610_vm10, %v1855_v42, %v474_v17  ;;  %v1124_v47 = vld [vmem:[#allocation6 + $0xd8] sm:$0xff] }
  0xbc   : > { %1201 = vmatpush.msrb.mxu0 %v1125_v45 }
  0xbe   : > { %v485_v48 = vpop.f32.mrf.mxu2  ;;  %v497_v50 = vpop.f32.mrf.mxu3  ;;  %1202 = vmatpush.msrb.mxu0 %v1124_v47 }
  0xbf   : > { %v486_v49 = vadd.f32 %v1850_v40, %v485_v48  ;;  %v464_v51 = vpop.f32.mrf.mxu0  ;;  %v498_v53 = vadd.f32 %v1850_v40, %v497_v50  ;;  %v590_v55 = vpop.permute.xlu1 %589  ;;  %v1104_v48 = vld [vmem:[#allocation6 + $0x38] sm:$0xff]  ;;  %v1103_v50 = vld [vmem:[#allocation6 + $0x30] sm:$0xff] }
  0xc0   : > { %v465_v54 = vadd.f32 %v1850_v40, %v464_v51  ;;  %vm616_vm8 = vcmp.eq.s32.totalorder %v590_v55, 1  ;;  %v476_v20 = vpop.f32.mrf.mxu1  ;;  %v1122_v51 = vld [vmem:[#allocation6 + $0xc8] sm:$0xff]  ;;  %v1120_v55 = vld [vmem:[#allocation6 + $0xb8] sm:$0xff] }
  0xc1   : > { %v1865_v56 = vsel %vm614_vm1, %v1855_v42, %v486_v49  ;;  %v1869_v59 = vsel %vm618_vm3, %v1855_v42, %v498_v53  ;;  %v477_v27 = vadd.f32 %v1850_v40, %v476_v20  ;;  %v1123_v49 = vld [vmem:[#allocation6 + $0xd0] sm:$0xff]  ;;  %v1121_v53 = vld [vmem:[#allocation6 + $0xc0] sm:$0xff] }
  0xc2   : > { %v626_v57 = vsel %vm607_vm2, %v1855_v42, %v465_v54  ;;  %1203 = vmatpush.msrb.mxu0 %v1123_v49  ;;  %v1101_v54 = vld [vmem:[#allocation6 + $0x20] sm:$0xff] }
  0xc3   : > { %698 = vmatmul.f32.gmra.mxu1 %v626_v57  ;;  %763 = vmatmul.f32.gmra.mxu2 %v626_v57  ;;  %v630_v29 = vsel %vm611_vm13, %v1855_v42, %v477_v27  ;;  %v1119_v57 = vld [vmem:[#allocation6 + $0xb0] sm:$0xff] }
  0xc4   : > { %1204 = vmatpush.msrb.mxu0 %v1122_v51 }
  0xc6   : > { %v488_v60 = vpop.f32.mrf.mxu2  ;;  %v500_v62 = vpop.f32.mrf.mxu3  ;;  %1205 = vmatpush.msrb.mxu0 %v1121_v53 }
  0xc7   : > { %v489_v61 = vadd.f32 %v1850_v40, %v488_v60  ;;  %v467_v63 = vpop.f32.mrf.mxu0  ;;  %v501_v1 = vadd.f32 %v1850_v40, %v500_v62  ;;  %v599_v3 = vpop.permute.xlu1 %598  ;;  %v1098_v60 = vld [vmem:[#allocation6 + $0x8] sm:$0xff]  ;;  %v673_v62 = vld [vmem:[%s2188_s6] sm:$0x3] }
  0xc8   : > { %v468_v2 = vadd.f32 %v1850_v40, %v467_v63  ;;  %vm619_vm6 = vcmp.eq.s32.totalorder %v599_v3, 1  ;;  %v479_v28 = vpop.f32.mrf.mxu1  ;;  %1206 = vmatpush.msrb.mxu0 %v1120_v55  ;;  %v1097_v63 = vld [vmem:[#allocation6] sm:$0xff]  ;;  %v1918_v3 = vperm.slane %v673_v62, 0 }
  0xc9   : > { %v634_v4 = vsel %vm615_vm5, %v1855_v42, %v489_v61  ;;  %v1877_v6 = vsel %vm619_vm6, %v1855_v42, %v501_v1  ;;  %v480_v30 = vadd.f32 %v1850_v40, %v479_v28  ;;  %v1117_v61 = vld [vmem:[#allocation6 + $0xa0] sm:$0xff]  ;;  %v1116_v1 = vld [vmem:[#allocation6 + $0x98] sm:$0xff] }
  0xca   : > { %v627_v5 = vsel %vm608_vm4, %v1855_v42, %v468_v2  ;;  %1207 = vmatpush.msrb.mxu0 %v1119_v57  ;;  %v1115_v2 = vld [vmem:[#allocation6 + $0x90] sm:$0xff] }
  0xcb   : > { %701 = vmatmul.f32.gmra.mxu1 %v627_v5  ;;  %766 = vmatmul.f32.gmra.mxu2 %v627_v5  ;;  %v631_v31 = vsel %vm612_vm14, %v1855_v42, %v480_v30 }
  0xce   : > { %v491_v9 = vpop.f32.mrf.mxu2  ;;  %v503_v10 = vpop.f32.mrf.mxu3 }
  0xcf   : > { %v492_v0 = vadd.f32 %v1850_v40, %v491_v9  ;;  %v470_v11 = vpop.f32.mrf.mxu0  ;;  %v504_v12 = vadd.f32 %v1850_v40, %v503_v10  ;;  %v1921_v9 = vperm.slane %v673_v62, 1 }
  0xd0   : > { %v471_v13 = vadd.f32 %v1850_v40, %v470_v11  ;;  %v482_v32 = vpop.f32.mrf.mxu1 }
  0xd1   : > { %v635_v14 = vsel %vm616_vm8, %v1855_v42, %v492_v0  ;;  %v1885_v16 = vsel %vm620_vm7, %v1855_v42, %v504_v12  ;;  %v483_v33 = vadd.f32 %v1850_v40, %v482_v32 }
  0xd2   : > { %v628_v15 = vsel %vm609_vm9, %v1855_v42, %v471_v13 }
  0xd3   : > { %704 = vmatmul.f32.gmra.mxu1 %v628_v15  ;;  %769 = vmatmul.f32.gmra.mxu2 %v628_v15  ;;  %v632_v34 = vsel %vm613_vm15, %v1855_v42, %v483_v33 }
  0xd6   : > { %v494_v19 = vpop.f32.mrf.mxu2  ;;  %v506_v21 = vpop.f32.mrf.mxu3 }
  0xd7   : > { %v495_v22 = vadd.f32 %v1850_v40, %v494_v19  ;;  %v507_v23 = vadd.f32 %v1850_v40, %v506_v21  ;;  %v1108_v40 = vld [vmem:[#allocation6 + $0x58] sm:$0xff] }
  0xd8   : > { %1137 = vmatpush.msrb.mxu3 %v1108_v40 }
  0xd9   : > { %v636_v25 = vsel %vm617_vm11, %v1855_v42, %v495_v22  ;;  %v1894_v26 = vsel %vm621_vm12, %v1855_v42, %v507_v23  ;;  %v1107_v42 = vld [vmem:[#allocation6 + $0x50] sm:$0xff] }
  0xda   : > { %1138 = vmatpush.msrb.mxu3 %v1107_v42 }
  0xdb   : > { %707 = vmatmul.f32.gmra.mxu1 %v629_v24  ;;  %772 = vmatmul.f32.gmra.mxu2 %v629_v24 }
  0xdc   : > { %1139 = vmatpush.msrb.mxu3 %v1106_v44 }
  0xde   : > { %1140 = vmatpush.msrb.mxu3 %v1105_v46 }
  0xe0   : > { %1141 = vmatpush.msrb.mxu3 %v1104_v48 }
  0xe2   : > { %1142 = vmatpush.msrb.mxu3 %v1103_v50 }
  0xe3   : > { %710 = vmatmul.f32.gmra.mxu1 %v630_v29  ;;  %775 = vmatmul.f32.gmra.mxu2 %v630_v29 }
  0xe4   : > { %1143 = vmatpush.msrb.mxu3 %v1102_v52 }
  0xe6   : > { %1144 = vmatpush.msrb.mxu3 %v1101_v54 }
  0xeb   : > { %713 = vmatmul.f32.gmra.mxu1 %v631_v31  ;;  %778 = vmatmul.f32.gmra.mxu2 %v631_v31 }
  0xf3   : > { %716 = vmatmul.f32.gmra.mxu1 %v632_v34  ;;  %781 = vmatmul.f32.gmra.mxu2 %v632_v34 }
  0xfb   : > { %719 = vmatmul.f32.gmra.mxu1 %v1865_v56  ;;  %784 = vmatmul.f32.gmra.mxu2 %v1865_v56  ;;  %v1100_v56 = vld [vmem:[#allocation6 + $0x18] sm:$0xff] }
  0xfc   : > { %1145 = vmatpush.msrb.mxu3 %v1100_v56 }
  0xfe   : > { %1146 = vmatpush.msrb.mxu3 %v1099_v58 }
 0x100   : > { %1147 = vmatpush.msrb.mxu3 %v1098_v60 }
 0x102   : > { %1148 = vmatpush.msrb.mxu3 %v1097_v63 }
 0x103   : > { %722 = vmatmul.f32.gmra.mxu1 %v634_v4  ;;  %787 = vmatmul.f32.gmra.mxu2 %v634_v4  ;;  %v1114_v4 = vld [vmem:[#allocation6 + $0x88] sm:$0xff] }
 0x10b   : > { %725 = vmatmul.f32.gmra.mxu1 %v635_v14  ;;  %790 = vmatmul.f32.gmra.mxu2 %v635_v14 }
 0x113   : > { %728 = vmatmul.f32.gmra.mxu1 %v636_v25  ;;  %793 = vmatmul.f32.gmra.mxu2 %v636_v25 }
 0x11b   : > { %731 = vmatmul.f32.gmra.mxu1 %v1869_v59  ;;  %796 = vmatmul.f32.gmra.mxu2 %v1869_v59  ;;  %v1118_v59 = vld [vmem:[#allocation6 + $0xa8] sm:$0xff] }
 0x11c   : > { %1208 = vmatpush.msrb.mxu0 %v1118_v59 }
 0x11e   : > { %1209 = vmatpush.msrb.mxu0 %v1117_v61 }
 0x120   : > { %1210 = vmatpush.msrb.mxu0 %v1116_v1 }
 0x122   : > { %1211 = vmatpush.msrb.mxu0 %v1115_v2 }
 0x123   : > { %734 = vmatmul.f32.gmra.mxu1 %v1877_v6  ;;  %799 = vmatmul.f32.gmra.mxu2 %v1877_v6  ;;  %v1113_v6 = vld [vmem:[#allocation6 + $0x80] sm:$0xff] }
 0x124   : > { %1212 = vmatpush.msrb.mxu0 %v1114_v4 }
 0x126   : > { %1213 = vmatpush.msrb.mxu0 %v1113_v6 }
 0x12b   : > { %737 = vmatmul.f32.gmra.mxu1 %v1885_v16  ;;  %802 = vmatmul.f32.gmra.mxu2 %v1885_v16 }
 0x133   : > { %740 = vmatmul.f32.gmra.mxu1 %v1894_v26  ;;  %805 = vmatmul.f32.gmra.mxu2 %v1894_v26 }
 0x138   : > { %v696_v5 = vpop.f32.mrf.mxu1 }
 0x139   : > { %v697_v7 = vadd.f32 %v696_v5, %v1918_v3 }
 0x13b   : > { %v809_v8 = vmul.f32 %v697_v7, %v697_v7 }
 0x13d   : > { %v841_v0 = vmul.f32 %v809_v8, %v697_v7 }
 0x13e   : > { %v761_v10 = vpop.f32.mrf.mxu2 }
 0x13f   : > { %v873_v11 = vmul.f32 0.044715, %v841_v0  ;;  %v762_v12 = vadd.f32 %v761_v10, %v1921_v9 }
 0x140   : > { %v699_v13 = vpop.f32.mrf.mxu1 }
 0x141   : > { %v905_v14 = vadd.f32 %v873_v11, %v697_v7  ;;  %v810_v15 = vmul.f32 %v762_v12, %v762_v12  ;;  %v700_v16 = vadd.f32 %v699_v13, %v1918_v3 }
 0x143   : > { %v842_v17 = vmul.f32 %v810_v15, %v762_v12  ;;  %v811_v18 = vmul.f32 %v700_v16, %v700_v16  ;;  %v937_v19 = vmul.f32 0.7978846, %v905_v14 }
 0x145   : > { %v874_v20 = vmul.f32 0.044715, %v842_v17  ;;  %v843_v21 = vmul.f32 %v811_v18, %v700_v16  ;;  %1495 = vtanh.f32 %v937_v19 }
 0x146   : > { %v764_v22 = vpop.f32.mrf.mxu2 }
 0x147   : > { %v906_v23 = vadd.f32 %v874_v20, %v762_v12  ;;  %v1926_v24 = vadd.f32 %v764_v22, %v1921_v9  ;;  %v875_v25 = vmul.f32 0.044715, %v843_v21 }
 0x148   : > { %v702_v26 = vpop.f32.mrf.mxu1 }
 0x149   : > { %v812_v27 = vmul.f32 %v1926_v24, %v1926_v24  ;;  %v1931_v28 = vadd.f32 %v702_v26, %v1918_v3  ;;  %v938_v29 = vmul.f32 0.7978846, %v906_v23  ;;  %v907_v30 = vadd.f32 %v875_v25, %v700_v16 }
 0x14b   : > { %v1496_v31 = vpop.eup %1495  ;;  %v844_v32 = vmul.f32 %v812_v27, %v1926_v24  ;;  %v813_v33 = vmul.f32 %v1931_v28, %v1931_v28  ;;  %1497 = vtanh.f32 %v938_v29  ;;  %v939_v34 = vmul.f32 0.7978846, %v907_v30 }
 0x14c   : > { %v1001_v35 = vadd.f32 1.0, %v1496_v31 }
 0x14d   : > { %v845_v36 = vmul.f32 %v813_v33, %v1931_v28  ;;  %1499 = vtanh.f32 %v939_v34  ;;  %v876_v37 = vmul.f32 0.044715, %v844_v32 }
 0x14e   : > { %v767_v38 = vpop.f32.mrf.mxu2  ;;  %v1033_v39 = vmul.f32 0.5, %v1001_v35 }
 0x14f   : > { %v1938_v40 = vadd.f32 %v767_v38, %v1921_v9  ;;  %v908_v41 = vadd.f32 %v876_v37, %v1926_v24  ;;  %v877_v42 = vmul.f32 0.044715, %v845_v36 }
 0x150   : > { %v705_v43 = vpop.f32.mrf.mxu1  ;;  %v1065_v44 = vmul.f32 %v1033_v39, %v697_v7 }
 0x151   : > { %v1498_v45 = vpop.eup %1497  ;;  %v814_v46 = vmul.f32 %v1938_v40, %v1938_v40  ;;  %v1944_v47 = vadd.f32 %v705_v43, %v1918_v3  ;;  %v940_v48 = vmul.f32 0.7978846, %v908_v41  ;;  %v909_v49 = vadd.f32 %v877_v42, %v1931_v28 }
 0x152   : > { %1149 = vmatmul.f32.vlgmr.msrb.gmra.mxu3 %v1065_v44  ;;  %v1002_v50 = vadd.f32 1.0, %v1498_v45 }
 0x153   : > { %v1500_v51 = vpop.eup %1499  ;;  %v846_v52 = vmul.f32 %v814_v46, %v1938_v40  ;;  %v815_v53 = vmul.f32 %v1944_v47, %v1944_v47  ;;  %1501 = vtanh.f32 %v940_v48  ;;  %v941_v54 = vmul.f32 0.7978846, %v909_v49 }
 0x154   : > { %v1034_v55 = vmul.f32 0.5, %v1002_v50  ;;  %v1003_v56 = vadd.f32 1.0, %v1500_v51 }
 0x155   : > { %v847_v57 = vmul.f32 %v815_v53, %v1944_v47  ;;  %1503 = vtanh.f32 %v941_v54  ;;  %v878_v58 = vmul.f32 0.044715, %v846_v52 }
 0x156   : > { %v770_v59 = vpop.f32.mrf.mxu2  ;;  %v1066_v60 = vmul.f32 %v1034_v55, %v762_v12  ;;  %v1035_v61 = vmul.f32 0.5, %v1003_v56 }
 0x157   : > { %v1952_v62 = vadd.f32 %v770_v59, %v1921_v9  ;;  %v910_v63 = vadd.f32 %v878_v58, %v1938_v40  ;;  %v879_v1 = vmul.f32 0.044715, %v847_v57 }
 0x158   : > { %v708_v2 = vpop.f32.mrf.mxu1  ;;  %1214 = vmatmul.f32.vlgmr.msrb.gmra.mxu0 %v1066_v60  ;;  %v1067_v4 = vmul.f32 %v1035_v61, %v700_v16 }
 0x159   : > { %v1502_v5 = vpop.eup %1501  ;;  %v816_v6 = vmul.f32 %v1952_v62, %v1952_v62  ;;  %v1958_v7 = vadd.f32 %v708_v2, %v1918_v3  ;;  %v942_v8 = vmul.f32 0.7978846, %v910_v63  ;;  %v911_v0 = vadd.f32 %v879_v1, %v1944_v47 }
 0x15a   : > { %1152 = vmatmul.f32.gmra.mxu3 %v1067_v4  ;;  %v1004_v10 = vadd.f32 1.0, %v1502_v5 }
 0x15b   : > { %v1504_v11 = vpop.eup %1503  ;;  %v848_v12 = vmul.f32 %v816_v6, %v1952_v62  ;;  %v817_v13 = vmul.f32 %v1958_v7, %v1958_v7  ;;  %1505 = vtanh.f32 %v942_v8  ;;  %v943_v14 = vmul.f32 0.7978846, %v911_v0 }
 0x15c   : > { %v1036_v15 = vmul.f32 0.5, %v1004_v10  ;;  %v1005_v16 = vadd.f32 1.0, %v1504_v11 }
 0x15d   : > { %v849_v17 = vmul.f32 %v817_v13, %v1958_v7  ;;  %1507 = vtanh.f32 %v943_v14  ;;  %v880_v18 = vmul.f32 0.044715, %v848_v12 }
 0x15e   : > { %v773_v19 = vpop.f32.mrf.mxu2  ;;  %v1068_v20 = vmul.f32 %v1036_v15, %v1926_v24  ;;  %v1037_v21 = vmul.f32 0.5, %v1005_v16 }
 0x15f   : > { %v1967_v22 = vadd.f32 %v773_v19, %v1921_v9  ;;  %v912_v23 = vadd.f32 %v880_v18, %v1952_v62  ;;  %v881_v25 = vmul.f32 0.044715, %v849_v17 }
 0x160   : > { %v711_v26 = vpop.f32.mrf.mxu1  ;;  %1217 = vmatmul.f32.gmra.mxu0 %v1068_v20  ;;  %v1069_v27 = vmul.f32 %v1037_v21, %v1931_v28 }
 0x161   : > { %v1506_v29 = vpop.eup %1505  ;;  %v818_v30 = vmul.f32 %v1967_v22, %v1967_v22  ;;  %v1974_v31 = vadd.f32 %v711_v26, %v1918_v3  ;;  %v944_v32 = vmul.f32 0.7978846, %v912_v23  ;;  %v913_v24 = vadd.f32 %v881_v25, %v1958_v7 }
 0x162   : > { %1155 = vmatmul.f32.gmra.mxu3 %v1069_v27  ;;  %v1006_v33 = vadd.f32 1.0, %v1506_v29 }
 0x163   : > { %v1508_v34 = vpop.eup %1507  ;;  %v850_v35 = vmul.f32 %v818_v30, %v1967_v22  ;;  %v819_v36 = vmul.f32 %v1974_v31, %v1974_v31  ;;  %1509 = vtanh.f32 %v944_v32  ;;  %v945_v28 = vmul.f32 0.7978846, %v913_v24 }
 0x164   : > { %v1038_v37 = vmul.f32 0.5, %v1006_v33  ;;  %v1007_v38 = vadd.f32 1.0, %v1508_v34 }
 0x165   : > { %v851_v39 = vmul.f32 %v819_v36, %v1974_v31  ;;  %1511 = vtanh.f32 %v945_v28  ;;  %v882_v41 = vmul.f32 0.044715, %v850_v35 }
 0x166   : > { %v776_v42 = vpop.f32.mrf.mxu2  ;;  %v1070_v43 = vmul.f32 %v1038_v37, %v1938_v40  ;;  %v1039_v44 = vmul.f32 0.5, %v1007_v38 }
 0x167   : > { %v1983_v45 = vadd.f32 %v776_v42, %v1921_v9  ;;  %v914_v46 = vadd.f32 %v882_v41, %v1967_v22  ;;  %v883_v48 = vmul.f32 0.044715, %v851_v39 }
 0x168   : > { %v714_v49 = vpop.f32.mrf.mxu1  ;;  %1220 = vmatmul.f32.gmra.mxu0 %v1070_v43  ;;  %v1071_v50 = vmul.f32 %v1039_v44, %v1944_v47 }
 0x169   : > { %v1510_v51 = vpop.eup %1509  ;;  %v820_v52 = vmul.f32 %v1983_v45, %v1983_v45  ;;  %v1990_v53 = vadd.f32 %v714_v49, %v1918_v3  ;;  %v946_v54 = vmul.f32 0.7978846, %v914_v46  ;;  %v915_v40 = vadd.f32 %v883_v48, %v1974_v31 }
 0x16a   : > { %1158 = vmatmul.f32.gmra.mxu3 %v1071_v50  ;;  %v1008_v55 = vadd.f32 1.0, %v1510_v51 }
 0x16b   : > { %v1512_v56 = vpop.eup %1511  ;;  %v852_v57 = vmul.f32 %v820_v52, %v1983_v45  ;;  %v821_v58 = vmul.f32 %v1990_v53, %v1990_v53  ;;  %1513 = vtanh.f32 %v946_v54  ;;  %v947_v47 = vmul.f32 0.7978846, %v915_v40 }
 0x16c   : > { %v1040_v59 = vmul.f32 0.5, %v1008_v55  ;;  %v1009_v60 = vadd.f32 1.0, %v1512_v56 }
 0x16d   : > { %v853_v61 = vmul.f32 %v821_v58, %v1990_v53  ;;  %1515 = vtanh.f32 %v947_v47  ;;  %v884_v63 = vmul.f32 0.044715, %v852_v57 }
 0x16e   : > { %v779_v1 = vpop.f32.mrf.mxu2  ;;  %v1072_v2 = vmul.f32 %v1040_v59, %v1952_v62  ;;  %v1041_v4 = vmul.f32 0.5, %v1009_v60 }
 0x16f   : > { %v1999_v5 = vadd.f32 %v779_v1, %v1921_v9  ;;  %v916_v6 = vadd.f32 %v884_v63, %v1983_v45  ;;  %v885_v8 = vmul.f32 0.044715, %v853_v61 }
 0x170   : > { %v717_v0 = vpop.f32.mrf.mxu1  ;;  %1223 = vmatmul.f32.gmra.mxu0 %v1072_v2  ;;  %v1073_v10 = vmul.f32 %v1041_v4, %v1958_v7 }
 0x171   : > { %v1514_v11 = vpop.eup %1513  ;;  %v822_v12 = vmul.f32 %v1999_v5, %v1999_v5  ;;  %v2006_v13 = vadd.f32 %v717_v0, %v1918_v3  ;;  %v948_v14 = vmul.f32 0.7978846, %v916_v6  ;;  %v917_v62 = vadd.f32 %v885_v8, %v1990_v53 }
 0x172   : > { %1161 = vmatmul.f32.gmra.mxu3 %v1073_v10  ;;  %v1010_v15 = vadd.f32 1.0, %v1514_v11 }
 0x173   : > { %v1516_v16 = vpop.eup %1515  ;;  %v854_v17 = vmul.f32 %v822_v12, %v1999_v5  ;;  %v823_v18 = vmul.f32 %v2006_v13, %v2006_v13  ;;  %1517 = vtanh.f32 %v948_v14  ;;  %v949_v7 = vmul.f32 0.7978846, %v917_v62 }
 0x174   : > { %v1042_v19 = vmul.f32 0.5, %v1010_v15  ;;  %v1011_v20 = vadd.f32 1.0, %v1516_v16 }
 0x175   : > { %v855_v21 = vmul.f32 %v823_v18, %v2006_v13  ;;  %1519 = vtanh.f32 %v949_v7  ;;  %v886_v23 = vmul.f32 0.044715, %v854_v17 }
 0x176   : > { %v782_v25 = vpop.f32.mrf.mxu2  ;;  %v1074_v26 = vmul.f32 %v1042_v19, %v1967_v22  ;;  %v1043_v27 = vmul.f32 0.5, %v1011_v20 }
 0x177   : > { %v2015_v29 = vadd.f32 %v782_v25, %v1921_v9  ;;  %v918_v30 = vadd.f32 %v886_v23, %v1999_v5  ;;  %v887_v32 = vmul.f32 0.044715, %v855_v21 }
 0x178   : > { %v720_v24 = vpop.f32.mrf.mxu1  ;;  %1226 = vmatmul.f32.gmra.mxu0 %v1074_v26  ;;  %v1075_v33 = vmul.f32 %v1043_v27, %v1974_v31 }
 0x179   : > { %v1518_v34 = vpop.eup %1517  ;;  %v824_v35 = vmul.f32 %v2015_v29, %v2015_v29  ;;  %v2022_v36 = vadd.f32 %v720_v24, %v1918_v3  ;;  %v950_v28 = vmul.f32 0.7978846, %v918_v30  ;;  %v919_v22 = vadd.f32 %v887_v32, %v2006_v13 }
 0x17a   : > { %1164 = vmatmul.f32.gmra.mxu3 %v1075_v33  ;;  %v1012_v37 = vadd.f32 1.0, %v1518_v34 }
 0x17b   : > { %v1520_v38 = vpop.eup %1519  ;;  %v856_v39 = vmul.f32 %v824_v35, %v2015_v29  ;;  %v825_v41 = vmul.f32 %v2022_v36, %v2022_v36  ;;  %1521 = vtanh.f32 %v950_v28  ;;  %v951_v31 = vmul.f32 0.7978846, %v919_v22 }
 0x17c   : > { %v1044_v42 = vmul.f32 0.5, %v1012_v37  ;;  %v1013_v43 = vadd.f32 1.0, %v1520_v38 }
 0x17d   : > { %v857_v44 = vmul.f32 %v825_v41, %v2022_v36  ;;  %1523 = vtanh.f32 %v951_v31  ;;  %v888_v46 = vmul.f32 0.044715, %v856_v39 }
 0x17e   : > { %v785_v48 = vpop.f32.mrf.mxu2  ;;  %v1076_v49 = vmul.f32 %v1044_v42, %v1983_v45  ;;  %v1045_v50 = vmul.f32 0.5, %v1013_v43 }
 0x17f   : > { %v2031_v51 = vadd.f32 %v785_v48, %v1921_v9  ;;  %v920_v52 = vadd.f32 %v888_v46, %v2015_v29  ;;  %v889_v54 = vmul.f32 0.044715, %v857_v44 }
 0x180   : > { %v723_v40 = vpop.f32.mrf.mxu1  ;;  %1229 = vmatmul.f32.gmra.mxu0 %v1076_v49  ;;  %v1077_v55 = vmul.f32 %v1045_v50, %v1990_v53 }
 0x181   : > { %v1522_v56 = vpop.eup %1521  ;;  %v826_v57 = vmul.f32 %v2031_v51, %v2031_v51  ;;  %v2038_v58 = vadd.f32 %v723_v40, %v1918_v3  ;;  %v952_v47 = vmul.f32 0.7978846, %v920_v52  ;;  %v921_v45 = vadd.f32 %v889_v54, %v2022_v36 }
 0x182   : > { %1167 = vmatmul.f32.gmra.mxu3 %v1077_v55  ;;  %v1014_v59 = vadd.f32 1.0, %v1522_v56 }
 0x183   : > { %v1524_v60 = vpop.eup %1523  ;;  %v858_v61 = vmul.f32 %v826_v57, %v2031_v51  ;;  %v827_v63 = vmul.f32 %v2038_v58, %v2038_v58  ;;  %1525 = vtanh.f32 %v952_v47  ;;  %v953_v53 = vmul.f32 0.7978846, %v921_v45 }
 0x184   : > { %v1046_v1 = vmul.f32 0.5, %v1014_v59  ;;  %v1015_v2 = vadd.f32 1.0, %v1524_v60 }
 0x185   : > { %v859_v4 = vmul.f32 %v827_v63, %v2038_v58  ;;  %1527 = vtanh.f32 %v953_v53  ;;  %v890_v6 = vmul.f32 0.044715, %v858_v61 }
 0x186   : > { %v788_v8 = vpop.f32.mrf.mxu2  ;;  %v1078_v0 = vmul.f32 %v1046_v1, %v1999_v5  ;;  %v1047_v10 = vmul.f32 0.5, %v1015_v2 }
 0x187   : > { %v2047_v11 = vadd.f32 %v788_v8, %v1921_v9  ;;  %v922_v12 = vadd.f32 %v890_v6, %v2031_v51  ;;  %v891_v14 = vmul.f32 0.044715, %v859_v4 }
 0x188   : > { %v726_v62 = vpop.f32.mrf.mxu1  ;;  %1232 = vmatmul.f32.gmra.mxu0 %v1078_v0  ;;  %v1079_v15 = vmul.f32 %v1047_v10, %v2006_v13 }
 0x189   : > { %v1526_v16 = vpop.eup %1525  ;;  %v828_v17 = vmul.f32 %v2047_v11, %v2047_v11  ;;  %v2054_v18 = vadd.f32 %v726_v62, %v1918_v3  ;;  %v954_v7 = vmul.f32 0.7978846, %v922_v12  ;;  %v923_v5 = vadd.f32 %v891_v14, %v2038_v58 }
 0x18a   : > { %1170 = vmatmul.f32.gmra.mxu3 %v1079_v15  ;;  %v1016_v19 = vadd.f32 1.0, %v1526_v16 }
 0x18b   : > { %v1528_v20 = vpop.eup %1527  ;;  %v860_v21 = vmul.f32 %v828_v17, %v2047_v11  ;;  %v829_v23 = vmul.f32 %v2054_v18, %v2054_v18  ;;  %1529 = vtanh.f32 %v954_v7  ;;  %v955_v13 = vmul.f32 0.7978846, %v923_v5 }
 0x18c   : > { %v1048_v25 = vmul.f32 0.5, %v1016_v19  ;;  %v1017_v26 = vadd.f32 1.0, %v1528_v20 }
 0x18d   : > { %v861_v27 = vmul.f32 %v829_v23, %v2054_v18  ;;  %1531 = vtanh.f32 %v955_v13  ;;  %v892_v30 = vmul.f32 0.044715, %v860_v21 }
 0x18e   : > { %v791_v32 = vpop.f32.mrf.mxu2  ;;  %v1080_v24 = vmul.f32 %v1048_v25, %v2015_v29  ;;  %v1049_v33 = vmul.f32 0.5, %v1017_v26 }
 0x18f   : > { %v2063_v34 = vadd.f32 %v791_v32, %v1921_v9  ;;  %v924_v35 = vadd.f32 %v892_v30, %v2047_v11  ;;  %v893_v28 = vmul.f32 0.044715, %v861_v27 }
 0x190   : > { %v729_v22 = vpop.f32.mrf.mxu1  ;;  %1235 = vmatmul.f32.gmra.mxu0 %v1080_v24  ;;  %v1081_v37 = vmul.f32 %v1049_v33, %v2022_v36 }
 0x191   : > { %v1530_v38 = vpop.eup %1529  ;;  %v830_v39 = vmul.f32 %v2063_v34, %v2063_v34  ;;  %v2070_v41 = vadd.f32 %v729_v22, %v1918_v3  ;;  %v956_v31 = vmul.f32 0.7978846, %v924_v35  ;;  %v925_v29 = vadd.f32 %v893_v28, %v2054_v18 }
 0x192   : > { %1173 = vmatmul.f32.gmra.mxu3 %v1081_v37  ;;  %v1018_v42 = vadd.f32 1.0, %v1530_v38 }
 0x193   : > { %v1532_v43 = vpop.eup %1531  ;;  %v862_v44 = vmul.f32 %v830_v39, %v2063_v34  ;;  %v831_v46 = vmul.f32 %v2070_v41, %v2070_v41  ;;  %1533 = vtanh.f32 %v956_v31  ;;  %v957_v36 = vmul.f32 0.7978846, %v925_v29 }
 0x194   : > { %v1050_v48 = vmul.f32 0.5, %v1018_v42  ;;  %v1019_v49 = vadd.f32 1.0, %v1532_v43 }
 0x195   : > { %v863_v50 = vmul.f32 %v831_v46, %v2070_v41  ;;  %1535 = vtanh.f32 %v957_v36  ;;  %v894_v52 = vmul.f32 0.044715, %v862_v44 }
 0x196   : > { %v794_v54 = vpop.f32.mrf.mxu2  ;;  %v1082_v40 = vmul.f32 %v1050_v48, %v2031_v51  ;;  %v1051_v55 = vmul.f32 0.5, %v1019_v49 }
 0x197   : > { %v2079_v56 = vadd.f32 %v794_v54, %v1921_v9  ;;  %v926_v57 = vadd.f32 %v894_v52, %v2063_v34  ;;  %v895_v47 = vmul.f32 0.044715, %v863_v50 }
 0x198   : > { %v732_v45 = vpop.f32.mrf.mxu1  ;;  %1238 = vmatmul.f32.gmra.mxu0 %v1082_v40  ;;  %v1083_v59 = vmul.f32 %v1051_v55, %v2038_v58 }
 0x199   : > { %v1534_v60 = vpop.eup %1533  ;;  %v832_v61 = vmul.f32 %v2079_v56, %v2079_v56  ;;  %v2086_v63 = vadd.f32 %v732_v45, %v1918_v3  ;;  %v958_v53 = vmul.f32 0.7978846, %v926_v57  ;;  %v927_v51 = vadd.f32 %v895_v47, %v2070_v41 }
 0x19a   : > { %1176 = vmatmul.f32.gmra.mxu3 %v1083_v59  ;;  %v1020_v1 = vadd.f32 1.0, %v1534_v60 }
 0x19b   : > { %v1536_v2 = vpop.eup %1535  ;;  %v864_v4 = vmul.f32 %v832_v61, %v2079_v56  ;;  %v833_v6 = vmul.f32 %v2086_v63, %v2086_v63  ;;  %1537 = vtanh.f32 %v958_v53  ;;  %v959_v58 = vmul.f32 0.7978846, %v927_v51 }
 0x19c   : > { %v1052_v8 = vmul.f32 0.5, %v1020_v1  ;;  %v1021_v0 = vadd.f32 1.0, %v1536_v2 }
 0x19d   : > { %v865_v10 = vmul.f32 %v833_v6, %v2086_v63  ;;  %1539 = vtanh.f32 %v959_v58  ;;  %v896_v12 = vmul.f32 0.044715, %v864_v4 }
 0x19e   : > { %v797_v14 = vpop.f32.mrf.mxu2  ;;  %v1084_v62 = vmul.f32 %v1052_v8, %v2047_v11  ;;  %v1053_v15 = vmul.f32 0.5, %v1021_v0 }
 0x19f   : > { %v2095_v16 = vadd.f32 %v797_v14, %v1921_v9  ;;  %v928_v17 = vadd.f32 %v896_v12, %v2079_v56  ;;  %v897_v7 = vmul.f32 0.044715, %v865_v10 }
 0x1a0   : > { %v735_v5 = vpop.f32.mrf.mxu1  ;;  %1241 = vmatmul.f32.gmra.mxu0 %v1084_v62  ;;  %v1085_v19 = vmul.f32 %v1053_v15, %v2054_v18 }
 0x1a1   : > { %v1538_v20 = vpop.eup %1537  ;;  %v834_v21 = vmul.f32 %v2095_v16, %v2095_v16  ;;  %v2102_v23 = vadd.f32 %v735_v5, %v1918_v3  ;;  %v960_v13 = vmul.f32 0.7978846, %v928_v17  ;;  %v929_v11 = vadd.f32 %v897_v7, %v2086_v63 }
 0x1a2   : > { %1179 = vmatmul.f32.gmra.mxu3 %v1085_v19  ;;  %v1022_v25 = vadd.f32 1.0, %v1538_v20 }
 0x1a3   : > { %v1540_v26 = vpop.eup %1539  ;;  %v866_v27 = vmul.f32 %v834_v21, %v2095_v16  ;;  %v835_v30 = vmul.f32 %v2102_v23, %v2102_v23  ;;  %1541 = vtanh.f32 %v960_v13  ;;  %v961_v18 = vmul.f32 0.7978846, %v929_v11 }
 0x1a4   : > { %v1054_v32 = vmul.f32 0.5, %v1022_v25  ;;  %v1023_v24 = vadd.f32 1.0, %v1540_v26 }
 0x1a5   : > { %v867_v33 = vmul.f32 %v835_v30, %v2102_v23  ;;  %1543 = vtanh.f32 %v961_v18  ;;  %v898_v35 = vmul.f32 0.044715, %v866_v27 }
 0x1a6   : > { %v800_v28 = vpop.f32.mrf.mxu2  ;;  %v1086_v22 = vmul.f32 %v1054_v32, %v2063_v34  ;;  %v1055_v37 = vmul.f32 0.5, %v1023_v24 }
 0x1a7   : > { %v2111_v38 = vadd.f32 %v800_v28, %v1921_v9  ;;  %v930_v39 = vadd.f32 %v898_v35, %v2095_v16  ;;  %v899_v31 = vmul.f32 0.044715, %v867_v33 }
 0x1a8   : > { %v738_v29 = vpop.f32.mrf.mxu1  ;;  %1244 = vmatmul.f32.gmra.mxu0 %v1086_v22  ;;  %v1087_v42 = vmul.f32 %v1055_v37, %v2070_v41 }
 0x1a9   : > { %v1542_v43 = vpop.eup %1541  ;;  %v836_v44 = vmul.f32 %v2111_v38, %v2111_v38  ;;  %v2118_v46 = vadd.f32 %v738_v29, %v1918_v3  ;;  %v962_v36 = vmul.f32 0.7978846, %v930_v39  ;;  %v931_v34 = vadd.f32 %v899_v31, %v2102_v23 }
 0x1aa   : > { %1182 = vmatmul.f32.gmra.mxu3 %v1087_v42  ;;  %v1024_v48 = vadd.f32 1.0, %v1542_v43 }
 0x1ab   : > { %v1544_v49 = vpop.eup %1543  ;;  %v868_v50 = vmul.f32 %v836_v44, %v2111_v38  ;;  %v837_v52 = vmul.f32 %v2118_v46, %v2118_v46  ;;  %1545 = vtanh.f32 %v962_v36  ;;  %v963_v41 = vmul.f32 0.7978846, %v931_v34 }
 0x1ac   : > { %v1056_v54 = vmul.f32 0.5, %v1024_v48  ;;  %v1025_v40 = vadd.f32 1.0, %v1544_v49 }
 0x1ad   : > { %v869_v55 = vmul.f32 %v837_v52, %v2118_v46  ;;  %1547 = vtanh.f32 %v963_v41  ;;  %v900_v57 = vmul.f32 0.044715, %v868_v50 }
 0x1ae   : > { %v803_v47 = vpop.f32.mrf.mxu2  ;;  %v1088_v45 = vmul.f32 %v1056_v54, %v2079_v56  ;;  %v1057_v59 = vmul.f32 0.5, %v1025_v40 }
 0x1af   : > { %v804_v60 = vadd.f32 %v803_v47, %v1921_v9  ;;  %v932_v61 = vadd.f32 %v900_v57, %v2111_v38  ;;  %v901_v53 = vmul.f32 0.044715, %v869_v55 }
 0x1b0   : > { %v741_v51 = vpop.f32.mrf.mxu1  ;;  %1247 = vmatmul.f32.gmra.mxu0 %v1088_v45  ;;  %v1089_v1 = vmul.f32 %v1057_v59, %v2086_v63 }
 0x1b1   : > { %v1546_v2 = vpop.eup %1545  ;;  %v838_v4 = vmul.f32 %v804_v60, %v804_v60  ;;  %v742_v6 = vadd.f32 %v741_v51, %v1918_v3  ;;  %v964_v58 = vmul.f32 0.7978846, %v932_v61  ;;  %v933_v8 = vadd.f32 %v901_v53, %v2118_v46 }
 0x1b2   : > { %1185 = vmatmul.f32.gmra.mxu3 %v1089_v1  ;;  %v1026_v0 = vadd.f32 1.0, %v1546_v2 }
 0x1b3   : > { %v1548_v56 = vpop.eup %1547  ;;  %v870_v10 = vmul.f32 %v838_v4, %v804_v60  ;;  %v839_v12 = vmul.f32 %v742_v6, %v742_v6  ;;  %1549 = vtanh.f32 %v964_v58  ;;  %v965_v14 = vmul.f32 0.7978846, %v933_v8 }
 0x1b4   : > { %v1058_v62 = vmul.f32 0.5, %v1026_v0  ;;  %v1027_v15 = vadd.f32 1.0, %v1548_v56 }
 0x1b5   : > { %v871_v17 = vmul.f32 %v839_v12, %v742_v6  ;;  %1551 = vtanh.f32 %v965_v14  ;;  %v902_v7 = vmul.f32 0.044715, %v870_v10 }
 0x1b6   : > { %v806_v63 = vpop.f32.mrf.mxu2  ;;  %v1090_v5 = vmul.f32 %v1058_v62, %v2095_v16  ;;  %v1059_v19 = vmul.f32 0.5, %v1027_v15 }
 0x1b7   : > { %v807_v3 = vadd.f32 %v806_v63, %v1921_v9  ;;  %v934_v20 = vadd.f32 %v902_v7, %v804_v60  ;;  %v903_v21 = vmul.f32 0.044715, %v871_v17 }
 0x1b8   : > { %1250 = vmatmul.f32.gmra.mxu0 %v1090_v5  ;;  %v1091_v13 = vmul.f32 %v1059_v19, %v2102_v23 }
 0x1b9   : > { %v1550_v11 = vpop.eup %1549  ;;  %v840_v25 = vmul.f32 %v807_v3, %v807_v3  ;;  %v966_v26 = vmul.f32 0.7978846, %v934_v20  ;;  %v935_v27 = vadd.f32 %v903_v21, %v742_v6 }
 0x1ba   : > { %1188 = vmatmul.f32.gmra.mxu3 %v1091_v13  ;;  %v1028_v30 = vadd.f32 1.0, %v1550_v11 }
 0x1bb   : > { %v1552_v18 = vpop.eup %1551  ;;  %v872_v32 = vmul.f32 %v840_v25, %v807_v3  ;;  %1553 = vtanh.f32 %v966_v26  ;;  %v967_v24 = vmul.f32 0.7978846, %v935_v27 }
 0x1bc   : > { %v1060_v33 = vmul.f32 0.5, %v1028_v30  ;;  %v1029_v16 = vadd.f32 1.0, %v1552_v18 }
 0x1bd   : > { %1555 = vtanh.f32 %v967_v24  ;;  %v904_v35 = vmul.f32 0.044715, %v872_v32 }
 0x1be   : > { %v1092_v9 = vmul.f32 %v1060_v33, %v2111_v38  ;;  %v1061_v28 = vmul.f32 0.5, %v1029_v16 }
 0x1bf   : > { %v936_v22 = vadd.f32 %v904_v35, %v807_v3 }
 0x1c0   : > { %1253 = vmatmul.f32.gmra.mxu0 %v1092_v9  ;;  %v1093_v23 = vmul.f32 %v1061_v28, %v2118_v46  ;;  %v2139_v46 = vld [vmem:[%s2190_s8] ss:$0 sm:$0xff] }
 0x1c1   : > { %v1554_v37 = vpop.eup %1553  ;;  %v968_v39 = vmul.f32 0.7978846, %v936_v22 }
 0x1c2   : > { %1191 = vmatmul.f32.gmra.mxu3 %v1093_v23  ;;  %v1030_v31 = vadd.f32 1.0, %v1554_v37 }
 0x1c3   : > { %v1556_v29 = vpop.eup %1555  ;;  %1557 = vtanh.f32 %v968_v39 }
 0x1c4   : > { %v1062_v42 = vmul.f32 0.5, %v1030_v31  ;;  %v1031_v43 = vadd.f32 1.0, %v1556_v29 }
 0x1c6   : > { %v1094_v44 = vmul.f32 %v1062_v42, %v804_v60  ;;  %v1063_v36 = vmul.f32 0.5, %v1031_v43 }
 0x1c8   : > { %1256 = vmatmul.f32.gmra.mxu0 %v1094_v44  ;;  %v1095_v34 = vmul.f32 %v1063_v36, %v742_v6 }
 0x1c9   : > { %v1558_v48 = vpop.eup %1557 }
 0x1ca   : > { %1194 = vmatmul.f32.gmra.mxu3 %v1095_v34  ;;  %v1032_v38 = vadd.f32 1.0, %v1558_v48 }
 0x1cc   : > { %v1064_v49 = vmul.f32 0.5, %v1032_v38 }
 0x1ce   : > { %v1096_v50 = vmul.f32 %v1064_v49, %v807_v3 }
 0x1d0   : > { %1259 = vmatmul.f32.gmra.mxu0 %v1096_v50 }
 0x1d5   : > { %v1150_v52 = vpop.f32.mrf.mxu3  ;;  %v1215_v41 = vpop.f32.mrf.mxu0 }
 0x1d6   : > { %v1151_v54 = vadd.f32 %v2139_v46, %v1150_v52 }
 0x1d8   : > { %v1216_v40 = vadd.f32 %v1215_v41, %v1151_v54 }
 0x1da   : > { %1263 = vst [vmem:[%s2146_s11] sm:$0xff] %v1216_v40 }
 0x1dd   : > { %v1153_v55 = vpop.f32.mrf.mxu3  ;;  %v1218_v57 = vpop.f32.mrf.mxu0 }
 0x1de   : > { %v1154_v47 = vadd.f32 %v2139_v46, %v1153_v55 }
 0x1e0   : > { %v1219_v45 = vadd.f32 %v1218_v57, %v1154_v47 }
 0x1e2   : > { %1264 = vst [vmem:[%s2146_s11 + $0x8] sm:$0xff] %v1219_v45 }
 0x1e5   : > { %v1156_v59 = vpop.f32.mrf.mxu3  ;;  %v1221_v60 = vpop.f32.mrf.mxu0 }
 0x1e6   : > { %v1157_v61 = vadd.f32 %v2139_v46, %v1156_v59 }
 0x1e8   : > { %v1222_v53 = vadd.f32 %v1221_v60, %v1157_v61 }
 0x1ea   : > { %1265 = vst [vmem:[%s2146_s11 + $0x10] sm:$0xff] %v1222_v53 }
 0x1ed   : > { %v1159_v51 = vpop.f32.mrf.mxu3  ;;  %v1224_v1 = vpop.f32.mrf.mxu0 }
 0x1ee   : > { %v1160_v2 = vadd.f32 %v2139_v46, %v1159_v51 }
 0x1f0   : > { %v1225_v4 = vadd.f32 %v1224_v1, %v1160_v2 }
 0x1f2   : > { %1266 = vst [vmem:[%s2146_s11 + $0x18] sm:$0xff] %v1225_v4 }
 0x1f5   : > { %v1162_v6 = vpop.f32.mrf.mxu3  ;;  %v1227_v58 = vpop.f32.mrf.mxu0 }
 0x1f6   : > { %v1163_v8 = vadd.f32 %v2139_v46, %v1162_v6 }
 0x1f8   : > { %v1228_v0 = vadd.f32 %v1227_v58, %v1163_v8 }
 0x1fa   : > { %1267 = vst [vmem:[%s2146_s11 + $0x20] sm:$0xff] %v1228_v0 }
 0x1fd   : > { %v1165_v56 = vpop.f32.mrf.mxu3  ;;  %v1230_v10 = vpop.f32.mrf.mxu0 }
 0x1fe   : > { %v1166_v12 = vadd.f32 %v2139_v46, %v1165_v56 }
 0x200   : > { %v1231_v14 = vadd.f32 %v1230_v10, %v1166_v12 }
 0x202   : > { %1268 = vst [vmem:[%s2146_s11 + $0x28] sm:$0xff] %v1231_v14 }
 0x205   : > { %v1168_v62 = vpop.f32.mrf.mxu3  ;;  %v1233_v15 = vpop.f32.mrf.mxu0 }
 0x206   : > { %v1169_v17 = vadd.f32 %v2139_v46, %v1168_v62 }
 0x208   : > { %v1234_v7 = vadd.f32 %v1233_v15, %v1169_v17 }
 0x20a   : > { %1269 = vst [vmem:[%s2146_s11 + $0x30] sm:$0xff] %v1234_v7 }
 0x20d   : > { %v1171_v63 = vpop.f32.mrf.mxu3  ;;  %v1236_v5 = vpop.f32.mrf.mxu0 }
 0x20e   : > { %v1172_v19 = vadd.f32 %v2139_v46, %v1171_v63 }
 0x210   : > { %v1237_v3 = vadd.f32 %v1236_v5, %v1172_v19 }
 0x212   : > { %1270 = vst [vmem:[%s2146_s11 + $0x38] sm:$0xff] %v1237_v3 }
 0x215   : > { %v1174_v20 = vpop.f32.mrf.mxu3  ;;  %v1239_v21 = vpop.f32.mrf.mxu0 }
 0x216   : > { %v1175_v13 = vadd.f32 %v2139_v46, %v1174_v20 }
 0x218   : > { %v1240_v11 = vadd.f32 %v1239_v21, %v1175_v13 }
 0x21a   : > { %1271 = vst [vmem:[%s2146_s11 + $0x40] sm:$0xff] %v1240_v11 }
 0x21d   : > { %v1177_v25 = vpop.f32.mrf.mxu3  ;;  %v1242_v26 = vpop.f32.mrf.mxu0 }
 0x21e   : > { %v1178_v27 = vadd.f32 %v2139_v46, %v1177_v25 }
 0x220   : > { %v1243_v30 = vadd.f32 %v1242_v26, %v1178_v27 }
 0x222   : > { %1272 = vst [vmem:[%s2146_s11 + $0x48] sm:$0xff] %v1243_v30 }
 0x225   : > { %v1180_v18 = vpop.f32.mrf.mxu3  ;;  %v1245_v32 = vpop.f32.mrf.mxu0 }
 0x226   : > { %v1181_v24 = vadd.f32 %v2139_v46, %v1180_v18 }
 0x228   : > { %v1246_v33 = vadd.f32 %v1245_v32, %v1181_v24 }
 0x22a   : > { %1273 = vst [vmem:[%s2146_s11 + $0x50] sm:$0xff] %v1246_v33 }
 0x22d   : > { %v1183_v16 = vpop.f32.mrf.mxu3  ;;  %v1248_v35 = vpop.f32.mrf.mxu0 }
 0x22e   : > { %v1184_v9 = vadd.f32 %v2139_v46, %v1183_v16 }
 0x230   : > { %v1249_v28 = vadd.f32 %v1248_v35, %v1184_v9 }
 0x232   : > { %1274 = vst [vmem:[%s2146_s11 + $0x58] sm:$0xff] %v1249_v28 }
 0x235   : > { %v1186_v22 = vpop.f32.mrf.mxu3  ;;  %v1251_v23 = vpop.f32.mrf.mxu0 }
 0x236   : > { %v1187_v37 = vadd.f32 %v2139_v46, %v1186_v22 }
 0x238   : > { %v1252_v39 = vadd.f32 %v1251_v23, %v1187_v37 }
 0x23a   : > { %1275 = vst [vmem:[%s2146_s11 + $0x60] sm:$0xff] %v1252_v39 }
 0x23d   : > { %v1189_v31 = vpop.f32.mrf.mxu3  ;;  %v1254_v29 = vpop.f32.mrf.mxu0 }
 0x23e   : > { %v1190_v42 = vadd.f32 %v2139_v46, %v1189_v31 }
 0x240   : > { %v1255_v43 = vadd.f32 %v1254_v29, %v1190_v42 }
 0x242   : > { %1276 = vst [vmem:[%s2146_s11 + $0x68] sm:$0xff] %v1255_v43 }
 0x245   : > { %v1192_v44 = vpop.f32.mrf.mxu3  ;;  %v1257_v36 = vpop.f32.mrf.mxu0 }
 0x246   : > { %v1193_v34 = vadd.f32 %v2139_v46, %v1192_v44 }
 0x248   : > { %v1258_v48 = vadd.f32 %v1257_v36, %v1193_v34 }
 0x24a   : > { %1277 = vst [vmem:[%s2146_s11 + $0x70] sm:$0xff] %v1258_v48 }
 0x24d   : > { %v1195_v38 = vpop.f32.mrf.mxu3  ;;  %v1260_v50 = vpop.f32.mrf.mxu0 }
 0x24e   : > { %v1196_v49 = vadd.f32 %v2139_v46, %v1195_v38 }
 0x250   : > { %v1261_v52 = vadd.f32 %v1260_v50, %v1196_v49 }
 0x252   : > { %1278 = vst [vmem:[%s2146_s11 + $0x78] sm:$0xff] %v1261_v52 }
 0x253 PF: > { %s21_s30 = sadd.s32 1, %s1663_s30  }
 0x254   : > { %p18_p7 = scmp.ge.s32.totalorder %s21_s30, 6  }
 0x256   :  { %20 = sbr.rel (!%p18_p7) target bundleno = 2 (0x2), region = 102 }
 0x25b   :  { %1301 = vsyncpa [#allocation3], 1 }
 0x25c   :  { %1303 = vsyncpa [#allocation3 + $0x1], 1 }
 0x25d   :  { %1304 = vsyncpa [#allocation5], 1 }

// kernel: wav2vec2_forward.3
= control target key start
LH: loop header
LB: loop body
LE: loop exit
PB: predicated region body
PF: predicated region fallthrough
CT: control target
= control target key end

     0   :  { %v2915_v0 = vmov 0   ;;  %v43_v49 = vlaneseq  ;;  %s5044_s0 = inlined_call_operand.vmem [shape: s32[64,1], index: 0, kind: input, shape index: {}]   ;;  %s5045_s2 = inlined_call_operand.vmem [shape: f32[512,128], index: 2, kind: input, shape index: {}]   ;;  %s5046_s1 = inlined_call_operand.vmem [shape: s32[64,8], index: 1, kind: input, shape index: {}]   ;;  %s5047_s3 = inlined_call_operand.vmem [shape: f32[512,128], index: 3, kind: input, shape index: {}]   ;;  %s5048_s4 = inlined_call_operand.vmem [shape: f32[128,128], index: 4, kind: input, shape index: {}]   ;;  %s5049_s5 = inlined_call_operand.vmem [shape: f32[1,128], index: 5, kind: input, shape index: {}]   ;;  %s5050_s8 = inlined_call_operand.vmem [shape: f32[128,128], index: 8, kind: input, shape index: {}]   ;;  %s5051_s9 = inlined_call_operand.vmem [shape: f32[1,128], index: 9, kind: input, shape index: {}]   ;;  %s5052_s6 = inlined_call_operand.vmem [shape: f32[128,128], index: 6, kind: input, shape index: {}]   ;;  %s5053_s7 = inlined_call_operand.vmem [shape: f32[1,128], index: 7, kind: input, shape index: {}]   ;;  %s5054_s10 = inlined_call_operand.vmem [shape: f32[64,8], index: 10, kind: output, shape index: {}]  }
   0x1   :  { %2865 = vset.pattern.permute.xlu1 %v2915_v0  ;;  %2864 = vset.pattern.permute.xlu0 %v2915_v0  ;;  %v37_v1 = vld [vmem:[%s5044_s0 + $0x10] sm:$0xff]  ;;  %v35_v2 = vld [vmem:[%s5044_s0] sm:$0xff]  ;;  %v183_v4 = vld [vmem:[%s5045_s2 + $0x78] sm:$0xff] }
   0x2   :  { %55 = vperm.xlu1 %2865, %v37_v1   ;;  %49 = vperm.xlu0 %2864, %v35_v2   ;;  %v39_v3 = vld [vmem:[%s5044_s0 + $0x20] sm:$0xff]  ;;  %v199_v5 = vld [vmem:[%s5045_s2 + $0xf8] sm:$0xff]  ;;  %v182_v8 = vld [vmem:[%s5045_s2 + $0x70] sm:$0xff]  ;;  %v978_v58 = vshrl.u32 %v43_v49, 7 }
   0x3   :  { %2866 = vset.pattern.permute.xlu2 %v2915_v0  ;;  %232 = vmatpush.msra.mxu0 %v183_v4  ;;  %v215_v6 = vld [vmem:[%s5045_s2 + $0x178] sm:$0xff]  ;;  %v198_v9 = vld [vmem:[%s5045_s2 + $0xf0] sm:$0xff]  ;;  %v181_v12 = vld [vmem:[%s5045_s2 + $0x68] sm:$0xff] }
   0x4   :  { %61 = vperm.xlu2 %2866, %v39_v3   ;;  %v231_v7 = vld [vmem:[%s5045_s2 + $0x1f8] sm:$0xff]  ;;  %273 = vmatpush.msra.mxu1 %v199_v5  ;;  %v214_v10 = vld [vmem:[%s5045_s2 + $0x170] sm:$0xff]  ;;  %v197_v13 = vld [vmem:[%s5045_s2 + $0xe8] sm:$0xff] }
   0x5   :  { %314 = vmatpush.msra.mxu2 %v215_v6  ;;  %355 = vmatpush.msra.mxu3 %v231_v7  ;;  %v230_v11 = vld [vmem:[%s5045_s2 + $0x1f0] sm:$0xff]  ;;  %v38_v14 = vld [vmem:[%s5044_s0 + $0x18] sm:$0xff]  ;;  %v36_v15 = vld [vmem:[%s5044_s0 + $0x8] sm:$0xff] }
   0x6   :  { %233 = vmatpush.msra.mxu0 %v182_v8  ;;  %274 = vmatpush.msra.mxu1 %v198_v9  ;;  %v213_v16 = vld [vmem:[%s5045_s2 + $0x168] sm:$0xff]  ;;  %v180_v18 = vld [vmem:[%s5045_s2 + $0x60] sm:$0xff]  ;;  %v179_v23 = vld [vmem:[%s5045_s2 + $0x58] sm:$0xff] }
   0x7   :  { %315 = vmatpush.msra.mxu2 %v214_v10  ;;  %356 = vmatpush.msra.mxu3 %v230_v11  ;;  %v229_v17 = vld [vmem:[%s5045_s2 + $0x1e8] sm:$0xff]  ;;  %v196_v20 = vld [vmem:[%s5045_s2 + $0xe0] sm:$0xff]  ;;  %v195_v24 = vld [vmem:[%s5045_s2 + $0xd8] sm:$0xff] }
   0x8   :  { %234 = vmatpush.msra.mxu0 %v181_v12  ;;  %v40_v19 = vld [vmem:[%s5044_s0 + $0x28] sm:$0xff]  ;;  %275 = vmatpush.msra.mxu1 %v197_v13  ;;  %v212_v21 = vld [vmem:[%s5045_s2 + $0x160] sm:$0xff]  ;;  %v211_v25 = vld [vmem:[%s5045_s2 + $0x158] sm:$0xff] }
   0x9   :  { %316 = vmatpush.msra.mxu2 %v213_v16  ;;  %v228_v22 = vld [vmem:[%s5045_s2 + $0x1e0] sm:$0xff]  ;;  %357 = vmatpush.msra.mxu3 %v229_v17  ;;  %v227_v26 = vld [vmem:[%s5045_s2 + $0x1d8] sm:$0xff]  ;;  %v178_v27 = vld [vmem:[%s5045_s2 + $0x50] sm:$0xff] }
   0xa   :  { %58 = vperm.xlu1 %2865, %v38_v14   ;;  %52 = vperm.xlu0 %2864, %v36_v15   ;;  %v194_v28 = vld [vmem:[%s5045_s2 + $0xd0] sm:$0xff]  ;;  %v42_v31 = vld [vmem:[%s5044_s0 + $0x38] sm:$0xff]  ;;  %v177_v33 = vld [vmem:[%s5045_s2 + $0x48] sm:$0xff] }
   0xb   :  { %235 = vmatpush.msra.mxu0 %v180_v18  ;;  %276 = vmatpush.msra.mxu1 %v196_v20  ;;  %v210_v29 = vld [vmem:[%s5045_s2 + $0x150] sm:$0xff]  ;;  %v193_v34 = vld [vmem:[%s5045_s2 + $0xc8] sm:$0xff]  ;;  %v176_v37 = vld [vmem:[%s5045_s2 + $0x40] sm:$0xff] }
   0xc   :  { %64 = vperm.xlu2 %2866, %v40_v19   ;;  %317 = vmatpush.msra.mxu2 %v212_v21  ;;  %v226_v30 = vld [vmem:[%s5045_s2 + $0x1d0] sm:$0xff]  ;;  %v209_v35 = vld [vmem:[%s5045_s2 + $0x148] sm:$0xff]  ;;  %v192_v38 = vld [vmem:[%s5045_s2 + $0xc0] sm:$0xff]  ;;  %v3208_v19 = vand.u32 127, %v43_v49 }
   0xd   :  { %358 = vmatpush.msra.mxu3 %v228_v22  ;;  %236 = vmatpush.msra.mxu0 %v179_v23  ;;  %v41_v32 = vld [vmem:[%s5044_s0 + $0x30] sm:$0xff]  ;;  %v225_v36 = vld [vmem:[%s5045_s2 + $0x1c8] sm:$0xff]  ;;  %v208_v39 = vld [vmem:[%s5045_s2 + $0x140] sm:$0xff] }
   0xe   :  { %277 = vmatpush.msra.mxu1 %v195_v24  ;;  %318 = vmatpush.msra.mxu2 %v211_v25  ;;  %v224_v40 = vld [vmem:[%s5045_s2 + $0x1c0] sm:$0xff]  ;;  %v175_v41 = vld [vmem:[%s5045_s2 + $0x38] sm:$0xff]  ;;  %v174_v45 = vld [vmem:[%s5045_s2 + $0x30] sm:$0xff]  ;;  %v3212_v21 = vadd.s32 128, %v3208_v19  ;;  %v3215_v22 = vadd.s32 256, %v3208_v19  ;;  %v3218_v23 = vadd.s32 384, %v3208_v19 }
   0xf   :  { %359 = vmatpush.msra.mxu3 %v227_v26  ;;  %237 = vmatpush.msra.mxu0 %v178_v27  ;;  %v191_v42 = vld [vmem:[%s5045_s2 + $0xb8] sm:$0xff]  ;;  %v190_v46 = vld [vmem:[%s5045_s2 + $0xb0] sm:$0xff]  ;;  %v173_v50 = vld [vmem:[%s5045_s2 + $0x28] sm:$0xff]  ;;  %v2916_v26 = vmov 1.0  }
  0x10   :  { %278 = vmatpush.msra.mxu1 %v194_v28  ;;  %319 = vmatpush.msra.mxu2 %v210_v29  ;;  %v207_v43 = vld [vmem:[%s5045_s2 + $0x138] sm:$0xff]  ;;  %v206_v47 = vld [vmem:[%s5045_s2 + $0x130] sm:$0xff]  ;;  %v189_v51 = vld [vmem:[%s5045_s2 + $0xa8] sm:$0xff] }
  0x11   :  { %360 = vmatpush.msra.mxu3 %v226_v30  ;;  %238 = vmatpush.msra.mxu0 %v177_v33  ;;  %v223_v44 = vld [vmem:[%s5045_s2 + $0x1b8] sm:$0xff]  ;;  %v222_v48 = vld [vmem:[%s5045_s2 + $0x1b0] sm:$0xff]  ;;  %v205_v52 = vld [vmem:[%s5045_s2 + $0x128] sm:$0xff] }
  0x12   :  { %70 = vperm.xlu1 %2865, %v42_v31   ;;  %67 = vperm.xlu0 %2864, %v41_v32   ;;  %v221_v53 = vld [vmem:[%s5045_s2 + $0x1a8] sm:$0xff]  ;;  %v172_v54 = vld [vmem:[%s5045_s2 + $0x20] sm:$0xff]  ;;  %v171_v59 = vld [vmem:[%s5045_s2 + $0x18] sm:$0xff] }
  0x13   :  { %279 = vmatpush.msra.mxu1 %v193_v34  ;;  %320 = vmatpush.msra.mxu2 %v209_v35  ;;  %v188_v55 = vld [vmem:[%s5045_s2 + $0xa0] sm:$0xff]  ;;  %v187_v60 = vld [vmem:[%s5045_s2 + $0x98] sm:$0xff]  ;;  %v170_v63 = vld [vmem:[%s5045_s2 + $0x10] sm:$0xff] }
  0x14   :  { %361 = vmatpush.msra.mxu3 %v225_v36  ;;  %239 = vmatpush.msra.mxu0 %v176_v37  ;;  %v204_v56 = vld [vmem:[%s5045_s2 + $0x120] sm:$0xff]  ;;  %v203_v61 = vld [vmem:[%s5045_s2 + $0x118] sm:$0xff]  ;;  %v186_v1 = vld [vmem:[%s5045_s2 + $0x90] sm:$0xff] }
  0x15   :  { %280 = vmatpush.msra.mxu1 %v192_v38  ;;  %321 = vmatpush.msra.mxu2 %v208_v39  ;;  %v220_v57 = vld [vmem:[%s5045_s2 + $0x1a0] sm:$0xff]  ;;  %v219_v62 = vld [vmem:[%s5045_s2 + $0x198] sm:$0xff]  ;;  %v202_v2 = vld [vmem:[%s5045_s2 + $0x110] sm:$0xff] }
  0x16   :  { %362 = vmatpush.msra.mxu3 %v224_v40  ;;  %240 = vmatpush.msra.mxu0 %v175_v41  ;;  %v218_v3 = vld [vmem:[%s5045_s2 + $0x190] sm:$0xff]  ;;  %v169_v4 = vld [vmem:[%s5045_s2 + $0x8] sm:$0xff]  ;;  %v3183_v8 = vld [vmem:[%s5046_s1] sm:$0xff] }
  0x17   :  { %281 = vmatpush.msra.mxu1 %v191_v42  ;;  %322 = vmatpush.msra.mxu2 %v207_v43  ;;  %v185_v5 = vld [vmem:[%s5045_s2 + $0x88] sm:$0xff]  ;;  %v168_v9 = vld [vmem:[%s5045_s2] sm:$0xff]  ;;  %v990_v12 = vperm.slane %v3183_v8, 2  ;;  %v1004_v14 = vperm.slane %v3183_v8, 4  ;;  %v1018_v15 = vperm.slane %v3183_v8, 6  ;;  %v983_v16 = vperm.slane %v3183_v8, 1 }
  0x18   :  { %363 = vmatpush.msra.mxu3 %v223_v44  ;;  %241 = vmatpush.msra.mxu0 %v174_v45  ;;  %v201_v6 = vld [vmem:[%s5045_s2 + $0x108] sm:$0xff]  ;;  %v184_v10 = vld [vmem:[%s5045_s2 + $0x80] sm:$0xff]  ;;  %v997_v20 = vperm.slane %v3183_v8, 3  ;;  %v411_v27 = vld [vmem:[%s5047_s3 + $0x78] sm:$0xff]  ;;  %v1011_v44 = vperm.slane %v3183_v8, 5 }
  0x19   :  { %282 = vmatpush.msra.mxu1 %v190_v46  ;;  %323 = vmatpush.msra.mxu2 %v206_v47  ;;  %v217_v7 = vld [vmem:[%s5045_s2 + $0x188] sm:$0xff]  ;;  %v200_v11 = vld [vmem:[%s5045_s2 + $0x100] sm:$0xff]  ;;  %v427_v28 = vld [vmem:[%s5047_s3 + $0xf8] sm:$0xff] }
  0x1a   :  { %364 = vmatpush.msra.mxu3 %v222_v48  ;;  %242 = vmatpush.msra.mxu0 %v173_v50  ;;  %v216_v13 = vld [vmem:[%s5045_s2 + $0x180] sm:$0xff]  ;;  %v3204_v17 = vld [vmem:[%s5046_s1 + $0x8] sm:$0xff]  ;;  %v443_v29 = vld [vmem:[%s5047_s3 + $0x178] sm:$0xff] }
  0x1b   :  { %283 = vmatpush.msra.mxu1 %v189_v51  ;;  %324 = vmatpush.msra.mxu2 %v205_v52  ;;  %v1039_v18 = vperm.slane %v3204_v17, 1  ;;  %v1060_v25 = vperm.slane %v3204_v17, 4  ;;  %v459_v30 = vld [vmem:[%s5047_s3 + $0x1f8] sm:$0xff]  ;;  %v410_v31 = vld [vmem:[%s5047_s3 + $0x70] sm:$0xff]  ;;  %v409_v35 = vld [vmem:[%s5047_s3 + $0x68] sm:$0xff]  ;;  %v1081_v45 = vperm.slane %v3204_v17, 7 }
  0x1c   :  { %365 = vmatpush.msra.mxu3 %v221_v53  ;;  %243 = vmatpush.msra.mxu0 %v172_v54  ;;  %v426_v32 = vld [vmem:[%s5047_s3 + $0xf0] sm:$0xff]  ;;  %v425_v36 = vld [vmem:[%s5047_s3 + $0xe8] sm:$0xff]  ;;  %v408_v40 = vld [vmem:[%s5047_s3 + $0x60] sm:$0xff] }
  0x1d   :  { %284 = vmatpush.msra.mxu1 %v188_v55  ;;  %325 = vmatpush.msra.mxu2 %v204_v56  ;;  %v442_v33 = vld [vmem:[%s5047_s3 + $0x170] sm:$0xff]  ;;  %v441_v38 = vld [vmem:[%s5047_s3 + $0x168] sm:$0xff]  ;;  %v424_v41 = vld [vmem:[%s5047_s3 + $0xe0] sm:$0xff] }
  0x1e   :  { %366 = vmatpush.msra.mxu3 %v220_v57  ;;  %2869 = vset.pattern.permute.xlu2 %v978_v58  ;;  %v458_v34 = vld [vmem:[%s5047_s3 + $0x1f0] sm:$0xff]  ;;  %v457_v39 = vld [vmem:[%s5047_s3 + $0x1e8] sm:$0xff]  ;;  %v440_v42 = vld [vmem:[%s5047_s3 + $0x160] sm:$0xff] }
  0x1f   :  { %244 = vmatpush.msra.mxu0 %v171_v59  ;;  %285 = vmatpush.msra.mxu1 %v187_v60  ;;  %v456_v43 = vld [vmem:[%s5047_s3 + $0x1e0] sm:$0xff]  ;;  %v407_v46 = vld [vmem:[%s5047_s3 + $0x58] sm:$0xff]  ;;  %v406_v51 = vld [vmem:[%s5047_s3 + $0x50] sm:$0xff] }
  0x20   :  { %326 = vmatpush.msra.mxu2 %v203_v61  ;;  %367 = vmatpush.msra.mxu3 %v219_v62  ;;  %v423_v47 = vld [vmem:[%s5047_s3 + $0xd8] sm:$0xff]  ;;  %v422_v52 = vld [vmem:[%s5047_s3 + $0xd0] sm:$0xff]  ;;  %v405_v55 = vld [vmem:[%s5047_s3 + $0x48] sm:$0xff] }
  0x21   :  { %245 = vmatpush.msra.mxu0 %v170_v63  ;;  %286 = vmatpush.msra.mxu1 %v186_v1  ;;  %v439_v49 = vld [vmem:[%s5047_s3 + $0x158] sm:$0xff]  ;;  %v438_v53 = vld [vmem:[%s5047_s3 + $0x150] sm:$0xff]  ;;  %v421_v56 = vld [vmem:[%s5047_s3 + $0xc8] sm:$0xff] }
  0x22   :  { %327 = vmatpush.msra.mxu2 %v202_v2  ;;  %368 = vmatpush.msra.mxu3 %v218_v3  ;;  %v455_v50 = vld [vmem:[%s5047_s3 + $0x1d8] sm:$0xff]  ;;  %v454_v54 = vld [vmem:[%s5047_s3 + $0x1d0] sm:$0xff]  ;;  %v437_v57 = vld [vmem:[%s5047_s3 + $0x148] sm:$0xff]  ;;  %v1032_v2 = vperm.slane %v3204_v17, 0 }
  0x23   :  { %246 = vmatpush.msra.mxu0 %v169_v4  ;;  %287 = vmatpush.msra.mxu1 %v185_v5  ;;  %v404_v59 = vld [vmem:[%s5047_s3 + $0x40] sm:$0xff]  ;;  %v3394_v61 = vld [vmem:[%s5046_s1 + $0x10] sm:$0xff]  ;;  %v403_v4 = vld [vmem:[%s5047_s3 + $0x38] sm:$0xff] }
  0x24   :  { %328 = vmatpush.msra.mxu2 %v201_v6  ;;  %369 = vmatpush.msra.mxu3 %v217_v7  ;;  %v420_v60 = vld [vmem:[%s5047_s3 + $0xc0] sm:$0xff]  ;;  %v1102_v3 = vperm.slane %v3394_v61, 2  ;;  %v419_v5 = vld [vmem:[%s5047_s3 + $0xb8] sm:$0xff] }
  0x25   :  { %2868 = vset.pattern.permute.xlu1 %v978_v58  ;;  %2867 = vset.pattern.permute.xlu0 %v978_v58  ;;  %v453_v58 = vld [vmem:[%s5047_s3 + $0x1c8] sm:$0xff]  ;;  %v436_v62 = vld [vmem:[%s5047_s3 + $0x140] sm:$0xff]  ;;  %v435_v6 = vld [vmem:[%s5047_s3 + $0x138] sm:$0xff] }
  0x26   :  { %247 = vmatpush.msra.mxu0 %v168_v9  ;;  %288 = vmatpush.msra.mxu1 %v184_v10  ;;  %v452_v63 = vld [vmem:[%s5047_s3 + $0x1c0] sm:$0xff]  ;;  %v451_v7 = vld [vmem:[%s5047_s3 + $0x1b8] sm:$0xff]  ;;  %v402_v10 = vld [vmem:[%s5047_s3 + $0x30] sm:$0xff] }
  0x27   :  { %329 = vmatpush.msra.mxu2 %v200_v11  ;;  %370 = vmatpush.msra.mxu3 %v216_v13  ;;  %v418_v11 = vld [vmem:[%s5047_s3 + $0xb0] sm:$0xff] }
  0x28   :  { %995 = vperm.xlu2 %2869, %v990_v12   ;;  %460 = vmatpush.msrb.mxu0 %v411_v27  ;;  %v434_v12 = vld [vmem:[%s5047_s3 + $0x130] sm:$0xff]  ;;  %v432_v27 = vld [vmem:[%s5047_s3 + $0x120] sm:$0xff] }
  0x29   :  { %501 = vmatpush.msrb.mxu1 %v427_v28  ;;  %542 = vmatpush.msrb.mxu2 %v443_v29  ;;  %v450_v13 = vld [vmem:[%s5047_s3 + $0x1b0] sm:$0xff]  ;;  %v448_v28 = vld [vmem:[%s5047_s3 + $0x1a0] sm:$0xff]  ;;  %v1053_v29 = vperm.slane %v3204_v17, 3 }
  0x2a   :  { %583 = vmatpush.msrb.mxu3 %v459_v30  ;;  %461 = vmatpush.msrb.mxu0 %v410_v31  ;;  %v1123_v30 = vperm.slane %v3394_v61, 5  ;;  %v399_v31 = vld [vmem:[%s5047_s3 + $0x18] sm:$0xff] }
  0x2b   :  { %502 = vmatpush.msrb.mxu1 %v426_v32  ;;  %543 = vmatpush.msrb.mxu2 %v442_v33  ;;  %v415_v32 = vld [vmem:[%s5047_s3 + $0x98] sm:$0xff] }
  0x2c   :  { %584 = vmatpush.msrb.mxu3 %v458_v34  ;;  %462 = vmatpush.msrb.mxu0 %v409_v35  ;;  %v431_v34 = vld [vmem:[%s5047_s3 + $0x118] sm:$0xff] }
  0x2d   :  { %988 = vperm.xlu1 %2868, %v983_v16   ;;  %503 = vmatpush.msrb.mxu1 %v425_v36  ;;  %v433_v16 = vld [vmem:[%s5047_s3 + $0x128] sm:$0xff]  ;;  %v447_v35 = vld [vmem:[%s5047_s3 + $0x198] sm:$0xff]  ;;  %v398_v36 = vld [vmem:[%s5047_s3 + $0x10] sm:$0xff] }
  0x2e   :  { %544 = vmatpush.msrb.mxu2 %v441_v38  ;;  %585 = vmatpush.msrb.mxu3 %v457_v39  ;;  %v414_v38 = vld [vmem:[%s5047_s3 + $0x90] sm:$0xff] }
  0x2f   :  { %463 = vmatpush.msrb.mxu0 %v408_v40  ;;  %504 = vmatpush.msrb.mxu1 %v424_v41  ;;  %v430_v39 = vld [vmem:[%s5047_s3 + $0x110] sm:$0xff]  ;;  %v397_v41 = vld [vmem:[%s5047_s3 + $0x8] sm:$0xff] }
  0x30   :  { %1009 = vperm.xlu2 %2869, %v1004_v14   ;;  %545 = vmatpush.msrb.mxu2 %v440_v42  ;;  %v401_v14 = vld [vmem:[%s5047_s3 + $0x28] sm:$0xff]  ;;  %v446_v40 = vld [vmem:[%s5047_s3 + $0x190] sm:$0xff] }
  0x31   :  { %586 = vmatpush.msrb.mxu3 %v456_v43  ;;  %464 = vmatpush.msrb.mxu0 %v407_v46  ;;  %v413_v42 = vld [vmem:[%s5047_s3 + $0x88] sm:$0xff]  ;;  %v412_v46 = vld [vmem:[%s5047_s3 + $0x80] sm:$0xff] }
  0x32   :  { %505 = vmatpush.msrb.mxu1 %v423_v47  ;;  %546 = vmatpush.msrb.mxu2 %v439_v49  ;;  %v429_v43 = vld [vmem:[%s5047_s3 + $0x108] sm:$0xff]  ;;  %v3577_v47 = vld [vmem:[%s5046_s1 + $0x18] sm:$0xff] }
  0x33   :  { %587 = vmatpush.msrb.mxu3 %v455_v50  ;;  %465 = vmatpush.msrb.mxu0 %v406_v51  ;;  %v428_v50 = vld [vmem:[%s5047_s3 + $0x100] sm:$0xff] }
  0x34   :  { %506 = vmatpush.msrb.mxu1 %v422_v52  ;;  %547 = vmatpush.msrb.mxu2 %v438_v53  ;;  %v444_v51 = vld [vmem:[%s5047_s3 + $0x180] sm:$0xff]  ;;  %v1074_v52 = vperm.slane %v3204_v17, 6  ;;  %v1144_v53 = vperm.slane %v3577_v47, 0 }
  0x35   :  { %1002 = vperm.xlu1 %2868, %v997_v20   ;;  %588 = vmatpush.msrb.mxu3 %v454_v54  ;;  %v400_v20 = vld [vmem:[%s5047_s3 + $0x20] sm:$0xff]  ;;  %v976_v54 = vperm.slane %v3183_v8, 0 }
  0x36   :  { %466 = vmatpush.msrb.mxu0 %v405_v55  ;;  %507 = vmatpush.msrb.mxu1 %v421_v56  ;;  %v1095_v56 = vperm.slane %v3394_v61, 1 }
  0x37   :  { %548 = vmatpush.msrb.mxu2 %v437_v57  ;;  %589 = vmatpush.msrb.mxu3 %v453_v58  ;;  %v1165_v57 = vperm.slane %v3577_v47, 3  ;;  %v1025_v58 = vperm.slane %v3183_v8, 7  ;;  %v1116_v8 = vperm.slane %v3394_v61, 4 }
  0x38   :  { %1023 = vperm.xlu2 %2869, %v1018_v15   ;;  %467 = vmatpush.msrb.mxu0 %v404_v59  ;;  %v417_v15 = vld [vmem:[%s5047_s3 + $0xa8] sm:$0xff]  ;;  %v1186_v59 = vperm.slane %v3577_v47, 6 }
  0x39   :  { %508 = vmatpush.msrb.mxu1 %v420_v60  ;;  %549 = vmatpush.msrb.mxu2 %v436_v62  ;;  %v1046_v60 = vperm.slane %v3204_v17, 2  ;;  %v3665_v62 = vld [vmem:[%s5046_s1 + $0x20] sm:$0xff] }
  0x3a   :  { %590 = vmatpush.msrb.mxu3 %v452_v63  ;;  %468 = vmatpush.msrb.mxu0 %v403_v4  ;;  %v1137_v63 = vperm.slane %v3394_v61, 7  ;;  %v638_v4 = vld [vmem:[%s5048_s4 + $0x70] sm:$0xff] }
  0x3b   :  { %509 = vmatpush.msrb.mxu1 %v419_v5  ;;  %550 = vmatpush.msrb.mxu2 %v435_v6  ;;  %v637_v5 = vld [vmem:[%s5048_s4 + $0x68] sm:$0xff]  ;;  %v1228_v6 = vperm.slane %v3665_v62, 4 }
  0x3c   :  { %591 = vmatpush.msrb.mxu3 %v451_v7  ;;  %469 = vmatpush.msrb.mxu0 %v402_v10  ;;  %v1088_v7 = vperm.slane %v3394_v61, 0  ;;  %v636_v10 = vld [vmem:[%s5048_s4 + $0x60] sm:$0xff] }
  0x3d   :  { %1016 = vperm.xlu1 %2868, %v1011_v44   ;;  %510 = vmatpush.msrb.mxu1 %v418_v11  ;;  %v445_v44 = vld [vmem:[%s5047_s3 + $0x188] sm:$0xff]  ;;  %v635_v11 = vld [vmem:[%s5048_s4 + $0x58] sm:$0xff] }
  0x3e   :  { %551 = vmatpush.msrb.mxu2 %v434_v12  ;;  %592 = vmatpush.msrb.mxu3 %v450_v13  ;;  %v634_v12 = vld [vmem:[%s5048_s4 + $0x50] sm:$0xff]  ;;  %v1179_v13 = vperm.slane %v3577_v47, 5 }
  0x3f   :  { %470 = vmatpush.msrb.mxu0 %v401_v14  ;;  %511 = vmatpush.msrb.mxu1 %v417_v15  ;;  %v1249_v14 = vperm.slane %v3665_v62, 7  ;;  %v633_v15 = vld [vmem:[%s5048_s4 + $0x48] sm:$0xff] }
  0x40   :  { %1044 = vperm.xlu2 %2869, %v1039_v18   ;;  %v449_v18 = vld [vmem:[%s5047_s3 + $0x1a8] sm:$0xff]  ;;  %552 = vmatpush.msrb.mxu2 %v433_v16  ;;  %v632_v16 = vld [vmem:[%s5048_s4 + $0x40] sm:$0xff] }
  0x41   :  { %593 = vmatpush.msrb.mxu3 %v449_v18  ;;  %471 = vmatpush.msrb.mxu0 %v400_v20  ;;  %v3751_v18 = vld [vmem:[%s5046_s1 + $0x28] sm:$0xff]  ;;  %v631_v20 = vld [vmem:[%s5048_s4 + $0x38] sm:$0xff] }
  0x42   :  { %553 = vmatpush.msrb.mxu2 %v432_v27  ;;  %981 = vperm.xlu0 %2867, %v976_v54   ;;  %v1130_v27 = vperm.slane %v3394_v61, 6 }
  0x43   :  { %594 = vmatpush.msrb.mxu3 %v448_v28  ;;  %472 = vmatpush.msrb.mxu0 %v399_v31  ;;  %v630_v28 = vld [vmem:[%s5048_s4 + $0x30] sm:$0xff]  ;;  %v1221_v31 = vperm.slane %v3665_v62, 3 }
  0x44   :  { %554 = vmatpush.msrb.mxu2 %v431_v34  ;;  %v627_v34 = vld [vmem:[%s5048_s4 + $0x18] sm:$0xff] }
  0x45   :  { %1037 = vperm.xlu1 %2868, %v1032_v2   ;;  %595 = vmatpush.msrb.mxu3 %v447_v35  ;;  %v1207_v2 = vperm.slane %v3665_v62, 1  ;;  %v626_v35 = vld [vmem:[%s5048_s4 + $0x10] sm:$0xff] }
  0x46   :  { %473 = vmatpush.msrb.mxu0 %v398_v36  ;;  %555 = vmatpush.msrb.mxu2 %v430_v39  ;;  %v3812_v36 = vld [vmem:[%s5046_s1 + $0x30] sm:$0xff] }
  0x47   :  { %596 = vmatpush.msrb.mxu3 %v446_v40  ;;  %v1312_v39 = vperm.slane %v3812_v36, 0  ;;  %v1172_v40 = vperm.slane %v3577_v47, 4 }
  0x48   :  { %1065 = vperm.xlu2 %2869, %v1060_v25   ;;  %v416_v25 = vld [vmem:[%s5047_s3 + $0xa0] sm:$0xff]  ;;  %474 = vmatpush.msrb.mxu0 %v397_v41 }
  0x49   :  { %512 = vmatpush.msrb.mxu1 %v416_v25  ;;  %556 = vmatpush.msrb.mxu2 %v429_v43  ;;  %v1270_v25 = vperm.slane %v3751_v18, 2  ;;  %v624_v41 = vld [vmem:[%s5048_s4] sm:$0xff]  ;;  %v1333_v43 = vperm.slane %v3812_v36, 3 }
  0x4a   :  { %597 = vmatpush.msrb.mxu3 %v445_v44  ;;  %1030 = vperm.xlu0 %2867, %v1025_v58   ;;  %v1193_v44 = vperm.slane %v3577_v47, 7  ;;  %v1235_v58 = vperm.slane %v3665_v62, 5 }
  0x4b   :  { %513 = vmatpush.msrb.mxu1 %v415_v32  ;;  %557 = vmatpush.msrb.mxu2 %v428_v50  ;;  %v1291_v32 = vperm.slane %v3751_v18, 5  ;;  %v1214_v50 = vperm.slane %v3665_v62, 2 }
  0x4c   :  { %598 = vmatpush.msrb.mxu3 %v444_v51  ;;  %v3864_v51 = vld [vmem:[%s5046_s1 + $0x38] sm:$0xff] }
  0x4d   :  { %1058 = vperm.xlu1 %2868, %v1053_v29   ;;  %514 = vmatpush.msrb.mxu1 %v414_v38  ;;  %v629_v29 = vld [vmem:[%s5048_s4 + $0x28] sm:$0xff] }
  0x4e   :  { %v625_v38 = vld [vmem:[%s5048_s4 + $0x8] sm:$0xff] }
  0x4f   :  { %515 = vmatpush.msrb.mxu1 %v413_v42  ;;  %v1263_v42 = vperm.slane %v3751_v18, 1 }
  0x50   :  { %1086 = vperm.xlu2 %2869, %v1081_v45   ;;  %v396_v45 = vld [vmem:[%s5047_s3] sm:$0xff] }
  0x51   :  { %475 = vmatpush.msrb.mxu0 %v396_v45  ;;  %516 = vmatpush.msrb.mxu1 %v412_v46 }
  0x52   :  { %1051 = vperm.xlu0 %2867, %v1046_v60  }
  0x55   :  { %1079 = vperm.xlu1 %2868, %v1074_v52  }
  0x58   :  { %1107 = vperm.xlu2 %2869, %v1102_v3   ;;  %v1067_v3 = vperm.slane %v3204_v17, 5 }
  0x5a   :  { %1072 = vperm.xlu0 %2867, %v1067_v3  }
  0x5d   :  { %1100 = vperm.xlu1 %2868, %v1095_v56   ;;  %v1375_v56 = vperm.slane %v3864_v51, 1 }
  0x5e   :  { %v3442_v9 = vpop.permute.xlu2 %61 }
  0x60   :  { %1128 = vperm.xlu2 %2869, %v1123_v30   ;;  %v628_v30 = vld [vmem:[%s5048_s4 + $0x20] sm:$0xff] }
  0x62   :  { %1093 = vperm.xlu0 %2867, %v1088_v7  }
  0x65   :  { %1121 = vperm.xlu1 %2868, %v1116_v8   ;;  %v761_v8 = vld [vmem:[%s5050_s8 + $0x78] sm:$0xff] }
  0x66   :  { %v3512_v33 = vpop.permute.xlu2 %64 }
  0x68   :  { %1149 = vperm.xlu2 %2869, %v1144_v53  }
  0x6d   :  { %1142 = vperm.xlu1 %2868, %v1137_v63  }
  0x70   :  { %1170 = vperm.xlu2 %2869, %v1165_v57  }
  0x74   :  { %v3220_v24 = vpop.permute.xlu0 %49  ;;  %v3329_v48 = vpop.permute.xlu1 %55 }
  0x75   :  { %vm72_vm0 = vcmp.eq.s32.totalorder %v3220_v24, %v3208_v19  ;;  %vm73_vm1 = vcmp.eq.s32.totalorder %v3220_v24, %v3212_v21  ;;  %vm74_vm2 = vcmp.eq.s32.totalorder %v3220_v24, %v3215_v22  ;;  %vm75_vm3 = vcmp.eq.s32.totalorder %v3220_v24, %v3218_v23  ;;  %v639_v24 = vld [vmem:[%s5048_s4 + $0x78] sm:$0xff] }
  0x76   :  { %2798 = vmatmul.msk.f32.vlgmr.msra.gmra.mxu0 %vm72_vm0, %v2916_v26  ;;  %2806 = vmatmul.msk.f32.vlgmr.msra.gmra.mxu1 %vm73_vm1, %v2916_v26  ;;  %vm80_vm8 = vcmp.eq.s32.totalorder %v3329_v48, %v3208_v19  ;;  %vm81_vm9 = vcmp.eq.s32.totalorder %v3329_v48, %v3212_v21  ;;  %vm82_vm10 = vcmp.eq.s32.totalorder %v3329_v48, %v3215_v22 }
  0x77   :  { %2814 = vmatmul.msk.f32.vlgmr.msra.gmra.mxu2 %vm74_vm2, %v2916_v26  ;;  %2822 = vmatmul.msk.f32.vlgmr.msra.gmra.mxu3 %vm75_vm3, %v2916_v26  ;;  %vm83_vm11 = vcmp.eq.s32.totalorder %v3329_v48, %v3218_v23  ;;  %v1109_v48 = vperm.slane %v3394_v61, 3 }
  0x78   :  { %1191 = vperm.xlu2 %2869, %v1186_v59   ;;  %644 = vmatpush.msra.mxu0 %v639_v24 }
  0x79   :  { %1114 = vperm.xlu0 %2867, %v1109_v48   ;;  %766 = vmatpush.msra.mxu2 %v761_v8 }
  0x7a   :  { %645 = vmatpush.msra.mxu0 %v638_v4 }
  0x7c   :  { %v3277_v37 = vpop.permute.xlu0 %52  ;;  %v3402_v1 = vpop.permute.xlu1 %58  ;;  %646 = vmatpush.msra.mxu0 %v637_v5  ;;  %v1326_v5 = vperm.slane %v3812_v36, 2 }
  0x7d   :  { %vm76_vm4 = vcmp.eq.s32.totalorder %v3277_v37, %v3208_v19  ;;  %vm77_vm5 = vcmp.eq.s32.totalorder %v3277_v37, %v3212_v21  ;;  %vm78_vm6 = vcmp.eq.s32.totalorder %v3277_v37, %v3215_v22  ;;  %vm79_vm7 = vcmp.eq.s32.totalorder %v3277_v37, %v3218_v23 }
  0x7e   :  { %2799 = vmatmul.msk.f32.gmra.mxu0 %vm76_vm4, %v2916_v26  ;;  %2807 = vmatmul.msk.f32.gmra.mxu1 %vm77_vm5, %v2916_v26  ;;  %vm5058_vm12 = vcmp.eq.s32.totalorder %v3402_v1, %v3208_v19  ;;  %vm5057_vm13 = vcmp.eq.s32.totalorder %v3402_v1, %v3212_v21  ;;  %vm5056_vm14 = vcmp.eq.s32.totalorder %v3402_v1, %v3215_v22  ;;  %v1158_v37 = vperm.slane %v3577_v47, 2 }
  0x7f   :  { %2815 = vmatmul.msk.f32.gmra.mxu2 %vm78_vm6, %v2916_v26  ;;  %2823 = vmatmul.msk.f32.gmra.mxu3 %vm79_vm7, %v2916_v26  ;;  %vm5055_vm15 = vcmp.eq.s32.totalorder %v3402_v1, %v3218_v23 }
  0x80   :  { %1212 = vperm.xlu2 %2869, %v1207_v2   ;;  %1163 = vperm.xlu1 %2868, %v1158_v37   ;;  %v760_v2 = vld [vmem:[%s5050_s8 + $0x70] sm:$0xff]  ;;  %v1396_v37 = vperm.slane %v3864_v51, 4 }
  0x81   :  { %647 = vmatpush.msra.mxu0 %v636_v10  ;;  %1135 = vperm.xlu0 %2867, %v1130_v27   ;;  %v1256_v10 = vperm.slane %v3751_v18, 0  ;;  %v1417_v27 = vperm.slane %v3864_v51, 7 }
  0x82   :  { %767 = vmatpush.msra.mxu2 %v760_v2  ;;  %v1410_v2 = vperm.slane %v3864_v51, 6 }
  0x83   :  { %648 = vmatpush.msra.mxu0 %v635_v11  ;;  %v758_v11 = vld [vmem:[%s5050_s8 + $0x60] sm:$0xff] }
  0x84   :  { %v3579_v49 = vpop.permute.xlu0 %67  ;;  %v3614_v55 = vpop.permute.xlu1 %70 }
  0x85   :  { %649 = vmatpush.msra.mxu0 %v634_v12  ;;  %v757_v12 = vld [vmem:[%s5050_s8 + $0x58] sm:$0xff] }
  0x86   :  { %2800 = vmatmul.msk.f32.gmra.mxu0 %vm80_vm8, %v2916_v26  ;;  %2808 = vmatmul.msk.f32.gmra.mxu1 %vm81_vm9, %v2916_v26 }
  0x87   :  { %2816 = vmatmul.msk.f32.gmra.mxu2 %vm82_vm10, %v2916_v26  ;;  %2824 = vmatmul.msk.f32.gmra.mxu3 %vm83_vm11, %v2916_v26 }
  0x88   :  { %1233 = vperm.xlu2 %2869, %v1228_v6   ;;  %1184 = vperm.xlu1 %2868, %v1179_v13   ;;  %v759_v6 = vld [vmem:[%s5050_s8 + $0x68] sm:$0xff] }
  0x89   :  { %650 = vmatpush.msra.mxu0 %v633_v15  ;;  %768 = vmatpush.msra.mxu2 %v759_v6  ;;  %v756_v15 = vld [vmem:[%s5050_s8 + $0x50] sm:$0xff] }
  0x8b   :  { %651 = vmatpush.msra.mxu0 %v632_v16  ;;  %769 = vmatpush.msra.mxu2 %v758_v11 }
  0x8d   :  { %652 = vmatpush.msra.mxu0 %v631_v20  ;;  %770 = vmatpush.msra.mxu2 %v757_v12  ;;  %v1361_v12 = vperm.slane %v3812_v36, 7 }
  0x8e   :  { %2801 = vmatmul.msk.f32.gmra.mxu0 %vm5058_vm12, %v2916_v26  ;;  %2809 = vmatmul.msk.f32.gmra.mxu1 %vm5057_vm13, %v2916_v26  ;;  %vm5060_vm13 = vcmp.eq.s32.totalorder %v3442_v9, %v3215_v22  ;;  %vm5059_vm12 = vcmp.eq.s32.totalorder %v3442_v9, %v3218_v23 }
  0x8f   :  { %2817 = vmatmul.msk.f32.gmra.mxu2 %vm5056_vm14, %v2916_v26  ;;  %2825 = vmatmul.msk.f32.gmra.mxu3 %vm5055_vm15, %v2916_v26  ;;  %vm5062_vm15 = vcmp.eq.s32.totalorder %v3442_v9, %v3208_v19  ;;  %vm5061_vm14 = vcmp.eq.s32.totalorder %v3442_v9, %v3212_v21 }
  0x90   :  { %1254 = vperm.xlu2 %2869, %v1249_v14   ;;  %653 = vmatpush.msra.mxu0 %v630_v28  ;;  %v755_v28 = vld [vmem:[%s5050_s8 + $0x48] sm:$0xff] }
  0x91   :  { %771 = vmatpush.msra.mxu2 %v756_v15 }
  0x92   :  { %654 = vmatpush.msra.mxu0 %v629_v29 }
  0x93   :  { %772 = vmatpush.msra.mxu2 %v755_v28 }
  0x94   :  { %655 = vmatpush.msra.mxu0 %v628_v30  ;;  %v1277_v30 = vperm.slane %v3751_v18, 3 }
  0x96   :  { %2802 = vmatmul.msk.f32.gmra.mxu0 %vm5062_vm15, %v2916_v26  ;;  %2810 = vmatmul.msk.f32.gmra.mxu1 %vm5061_vm14, %v2916_v26  ;;  %vm5064_vm14 = vcmp.eq.s32.totalorder %v3512_v33, %v3215_v22  ;;  %vm5063_vm15 = vcmp.eq.s32.totalorder %v3512_v33, %v3218_v23 }
  0x97   :  { %2818 = vmatmul.msk.f32.gmra.mxu2 %vm5060_vm13, %v2916_v26  ;;  %2826 = vmatmul.msk.f32.gmra.mxu3 %vm5059_vm12, %v2916_v26  ;;  %vm5066_vm12 = vcmp.eq.s32.totalorder %v3512_v33, %v3208_v19  ;;  %vm5065_vm13 = vcmp.eq.s32.totalorder %v3512_v33, %v3212_v21 }
  0x98   :  { %1275 = vperm.xlu2 %2869, %v1270_v25   ;;  %656 = vmatpush.msra.mxu0 %v627_v34  ;;  %v1347_v25 = vperm.slane %v3812_v36, 5 }
  0x9a   :  { %657 = vmatpush.msra.mxu0 %v626_v35 }
  0x9c   :  { %658 = vmatpush.msra.mxu0 %v625_v38  ;;  %v752_v38 = vld [vmem:[%s5050_s8 + $0x30] sm:$0xff] }
  0x9e   :  { %2803 = vmatmul.msk.f32.gmra.mxu0 %vm5066_vm12, %v2916_v26  ;;  %2811 = vmatmul.msk.f32.gmra.mxu1 %vm5065_vm13, %v2916_v26  ;;  %vm5068_vm13 = vcmp.eq.s32.totalorder %v3579_v49, %v3215_v22  ;;  %vm5069_vm12 = vcmp.eq.s32.totalorder %v3579_v49, %v3218_v23 }
  0x9f   :  { %2819 = vmatmul.msk.f32.gmra.mxu2 %vm5064_vm14, %v2916_v26  ;;  %2827 = vmatmul.msk.f32.gmra.mxu3 %vm5063_vm15, %v2916_v26  ;;  %vm5070_vm15 = vcmp.eq.s32.totalorder %v3579_v49, %v3208_v19  ;;  %vm5067_vm14 = vcmp.eq.s32.totalorder %v3579_v49, %v3212_v21 }
  0xa0   :  { %1296 = vperm.xlu2 %2869, %v1291_v32   ;;  %659 = vmatpush.msra.mxu0 %v624_v41  ;;  %v753_v32 = vld [vmem:[%s5050_s8 + $0x38] sm:$0xff]  ;;  %v1368_v41 = vperm.slane %v3864_v51, 0 }
  0xa6   :  { %2804 = vmatmul.msk.f32.gmra.mxu0 %vm5070_vm15, %v2916_v26  ;;  %2812 = vmatmul.msk.f32.gmra.mxu1 %vm5067_vm14, %v2916_v26  ;;  %vm100_vm14 = vcmp.eq.s32.totalorder %v3614_v55, %v3208_v19  ;;  %vm103_vm15 = vcmp.eq.s32.totalorder %v3614_v55, %v3218_v23 }
  0xa7   :  { %2820 = vmatmul.msk.f32.gmra.mxu2 %vm5068_vm13, %v2916_v26  ;;  %2828 = vmatmul.msk.f32.gmra.mxu3 %vm5069_vm12, %v2916_v26  ;;  %vm101_vm13 = vcmp.eq.s32.totalorder %v3614_v55, %v3212_v21  ;;  %vm102_vm12 = vcmp.eq.s32.totalorder %v3614_v55, %v3215_v22  ;;  %v1305_v55 = vperm.slane %v3751_v18, 7 }
  0xa8   :  { %1317 = vperm.xlu2 %2869, %v1312_v39  }
  0xae   :  { %2805 = vmatmul.msk.f32.gmra.mxu0 %vm100_vm14, %v2916_v26  ;;  %2813 = vmatmul.msk.f32.gmra.mxu1 %vm101_vm13, %v2916_v26 }
  0xaf   :  { %2821 = vmatmul.msk.f32.gmra.mxu2 %vm102_vm12, %v2916_v26  ;;  %2829 = vmatmul.msk.f32.gmra.mxu3 %vm103_vm15, %v2916_v26 }
  0xb0   :  { %1338 = vperm.xlu2 %2869, %v1333_v43  }
  0xb6   :  { %2830 = vmatmul.msk.f32.vlgmr.msrb.gmra.mxu0 %vm72_vm0, %v2916_v26  ;;  %2838 = vmatmul.msk.f32.vlgmr.msrb.gmra.mxu1 %vm73_vm1, %v2916_v26  ;;  %vm5081_vm0 = vcmp.eq.s32.totalorder %v3402_v1, %v3208_v19  ;;  %vm5082_vm1 = vcmp.eq.s32.totalorder %v3402_v1, %v3212_v21 }
  0xb7   :  { %2846 = vmatmul.msk.f32.vlgmr.msrb.gmra.mxu2 %vm74_vm2, %v2916_v26  ;;  %2854 = vmatmul.msk.f32.vlgmr.msrb.gmra.mxu3 %vm75_vm3, %v2916_v26  ;;  %vm5083_vm2 = vcmp.eq.s32.totalorder %v3402_v1, %v3215_v22  ;;  %vm5084_vm3 = vcmp.eq.s32.totalorder %v3402_v1, %v3218_v23  ;;  %v1200_v1 = vperm.slane %v3665_v62, 0 }
  0xb9   :  { %1205 = vperm.xlu1 %2868, %v1200_v1  }
  0xbe   :  { %2831 = vmatmul.msk.f32.gmra.mxu0 %vm76_vm4, %v2916_v26  ;;  %2839 = vmatmul.msk.f32.gmra.mxu1 %vm77_vm5, %v2916_v26  ;;  %vm5085_vm4 = vcmp.eq.s32.totalorder %v3442_v9, %v3208_v19  ;;  %vm5086_vm5 = vcmp.eq.s32.totalorder %v3442_v9, %v3212_v21 }
  0xbf   :  { %2847 = vmatmul.msk.f32.gmra.mxu2 %vm78_vm6, %v2916_v26  ;;  %2855 = vmatmul.msk.f32.gmra.mxu3 %vm79_vm7, %v2916_v26  ;;  %vm5087_vm6 = vcmp.eq.s32.totalorder %v3442_v9, %v3215_v22  ;;  %vm5088_vm7 = vcmp.eq.s32.totalorder %v3442_v9, %v3218_v23  ;;  %v1151_v9 = vperm.slane %v3577_v47, 1 }
  0xc1   :  { %1226 = vperm.xlu1 %2868, %v1221_v31   ;;  %1156 = vperm.xlu0 %2867, %v1151_v9   ;;  %v754_v31 = vld [vmem:[%s5050_s8 + $0x40] sm:$0xff] }
  0xc2   :  { %773 = vmatpush.msra.mxu2 %v754_v31 }
  0xc4   :  { %774 = vmatpush.msra.mxu2 %v753_v32 }
  0xc6   :  { %2832 = vmatmul.msk.f32.gmra.mxu0 %vm80_vm8, %v2916_v26  ;;  %2840 = vmatmul.msk.f32.gmra.mxu1 %vm81_vm9, %v2916_v26  ;;  %vm5089_vm8 = vcmp.eq.s32.totalorder %v3512_v33, %v3208_v19  ;;  %vm5090_vm9 = vcmp.eq.s32.totalorder %v3512_v33, %v3212_v21 }
  0xc7   :  { %2848 = vmatmul.msk.f32.gmra.mxu2 %vm82_vm10, %v2916_v26  ;;  %2856 = vmatmul.msk.f32.gmra.mxu3 %vm83_vm11, %v2916_v26  ;;  %vm5091_vm10 = vcmp.eq.s32.totalorder %v3512_v33, %v3215_v22  ;;  %vm5092_vm11 = vcmp.eq.s32.totalorder %v3512_v33, %v3218_v23  ;;  %v1242_v33 = vperm.slane %v3665_v62, 6 }
  0xc8   :  { %775 = vmatpush.msra.mxu2 %v752_v38 }
  0xc9   :  { %1247 = vperm.xlu1 %2868, %v1242_v33   ;;  %1177 = vperm.xlu0 %2867, %v1172_v40  }
  0xce   :  { %2833 = vmatmul.msk.f32.gmra.mxu0 %vm5081_vm0, %v2916_v26  ;;  %2841 = vmatmul.msk.f32.gmra.mxu1 %vm5082_vm1, %v2916_v26  ;;  %vm5093_vm0 = vcmp.eq.s32.totalorder %v3579_v49, %v3208_v19  ;;  %vm5094_vm1 = vcmp.eq.s32.totalorder %v3579_v49, %v3212_v21  ;;  %v1354_v21 = vperm.slane %v3812_v36, 6 }
  0xcf   :  { %2849 = vmatmul.msk.f32.gmra.mxu2 %vm5083_vm2, %v2916_v26  ;;  %2857 = vmatmul.msk.f32.gmra.mxu3 %vm5084_vm3, %v2916_v26  ;;  %vm5095_vm2 = vcmp.eq.s32.totalorder %v3579_v49, %v3215_v22  ;;  %vm5096_vm3 = vcmp.eq.s32.totalorder %v3579_v49, %v3218_v23  ;;  %v1284_v49 = vperm.slane %v3751_v18, 4 }
  0xd0   :  { %1359 = vperm.xlu2 %2869, %v1354_v21  }
  0xd1   :  { %1268 = vperm.xlu1 %2868, %v1263_v42   ;;  %1198 = vperm.xlu0 %2867, %v1193_v44   ;;  %v751_v42 = vld [vmem:[%s5050_s8 + $0x28] sm:$0xff]  ;;  %v1298_v44 = vperm.slane %v3751_v18, 6 }
  0xd2   :  { %776 = vmatpush.msra.mxu2 %v751_v42 }
  0xd6   :  { %2834 = vmatmul.msk.f32.gmra.mxu0 %vm5085_vm4, %v2916_v26  ;;  %2842 = vmatmul.msk.f32.gmra.mxu1 %vm5086_vm5, %v2916_v26 }
  0xd7   :  { %2850 = vmatmul.msk.f32.gmra.mxu2 %vm5087_vm6, %v2916_v26  ;;  %2858 = vmatmul.msk.f32.gmra.mxu3 %vm5088_vm7, %v2916_v26 }
  0xd8   :  { %1380 = vperm.xlu2 %2869, %v1375_v56   ;;  %v1319_v56 = vperm.slane %v3812_v36, 1 }
  0xd9   :  { %1289 = vperm.xlu1 %2868, %v1284_v49   ;;  %1219 = vperm.xlu0 %2867, %v1214_v50  }
  0xde   :  { %2835 = vmatmul.msk.f32.gmra.mxu0 %vm5089_vm8, %v2916_v26  ;;  %2843 = vmatmul.msk.f32.gmra.mxu1 %vm5090_vm9, %v2916_v26 }
  0xdf   :  { %2851 = vmatmul.msk.f32.gmra.mxu2 %vm5091_vm10, %v2916_v26  ;;  %2859 = vmatmul.msk.f32.gmra.mxu3 %vm5092_vm11, %v2916_v26 }
  0xe0   :  { %1401 = vperm.xlu2 %2869, %v1396_v37  }
  0xe1   :  { %1310 = vperm.xlu1 %2868, %v1305_v55   ;;  %1240 = vperm.xlu0 %2867, %v1235_v58  }
  0xe6   :  { %2836 = vmatmul.msk.f32.gmra.mxu0 %vm5093_vm0, %v2916_v26  ;;  %2844 = vmatmul.msk.f32.gmra.mxu1 %vm5094_vm1, %v2916_v26 }
  0xe7   :  { %2852 = vmatmul.msk.f32.gmra.mxu2 %vm5095_vm2, %v2916_v26  ;;  %2860 = vmatmul.msk.f32.gmra.mxu3 %vm5096_vm3, %v2916_v26 }
  0xe8   :  { %1422 = vperm.xlu2 %2869, %v1417_v27   ;;  %v1382_v27 = vperm.slane %v3864_v51, 2 }
  0xe9   :  { %1331 = vperm.xlu1 %2868, %v1326_v5   ;;  %1261 = vperm.xlu0 %2867, %v1256_v10  }
  0xee   :  { %2837 = vmatmul.msk.f32.gmra.mxu0 %vm100_vm14, %v2916_v26  ;;  %2845 = vmatmul.msk.f32.gmra.mxu1 %vm101_vm13, %v2916_v26 }
  0xef   :  { %2853 = vmatmul.msk.f32.gmra.mxu2 %vm102_vm12, %v2916_v26  ;;  %2861 = vmatmul.msk.f32.gmra.mxu3 %vm103_vm15, %v2916_v26  ;;  %vm2345_vm12 = vcmp.ge.s32.totalorder %v3208_v19, 1 }
  0xf0   :  { %2872 = vset.pattern.permute.xlu2 %v2915_v0 }
  0xf1   :  { %1352 = vperm.xlu1 %2868, %v1347_v25   ;;  %1282 = vperm.xlu0 %2867, %v1277_v30  }
  0xf2   :  { %2320 = vperm.xlu2 %2872, %v3394_v61  }
  0xf3   :  { %v249_v45 = vpop.f32.mrf.mxu0  ;;  %v290_v46 = vpop.f32.mrf.mxu1 }
  0xf4   :  { %v291_v22 = vadd.f32 %v290_v46, %v249_v45  ;;  %v750_v45 = vld [vmem:[%s5050_s8 + $0x20] sm:$0xff]  ;;  %v749_v46 = vld [vmem:[%s5050_s8 + $0x18] sm:$0xff] }
  0xf5   :  { %777 = vmatpush.msra.mxu2 %v750_v45 }
  0xf7   :  { %778 = vmatpush.msra.mxu2 %v749_v46  ;;  %v697_v46 = vld [vmem:[%s5052_s6 + $0x60] sm:$0xff] }
  0xf9   :  { %1373 = vperm.xlu1 %2868, %v1368_v41   ;;  %1303 = vperm.xlu0 %2867, %v1298_v44  }
  0xfa   :  { %v331_v23 = vpop.f32.mrf.mxu2  ;;  %v372_v26 = vpop.f32.mrf.mxu3  ;;  %2326 = vperm.xlu2 %2872, %v3665_v62  }
  0xfb   :  { %v332_v52 = vadd.f32 %v331_v23, %v291_v22  ;;  %v252_v53 = vpop.f32.mrf.mxu0  ;;  %v293_v54 = vpop.f32.mrf.mxu1  ;;  %v748_v22 = vld [vmem:[%s5050_s8 + $0x10] sm:$0xff] }
  0xfc   :  { %v294_v59 = vadd.f32 %v293_v54, %v252_v53  ;;  %779 = vmatpush.msra.mxu2 %v748_v22  ;;  %v1389_v53 = vperm.slane %v3864_v51, 3  ;;  %v747_v54 = vld [vmem:[%s5050_s8 + $0x8] sm:$0xff] }
  0xfd   :  { %v373_v57 = vadd.f32 %v372_v26, %v332_v52 }
  0xfe   :  { %780 = vmatpush.msra.mxu2 %v747_v54 }
  0xff   :  { %660 = vmatmul.f32.vlgmr.msra.gmra.mxu0 %v373_v57  ;;  %v746_v57 = vld [vmem:[%s5050_s8] sm:$0xff] }
 0x100   :  { %781 = vmatpush.msra.mxu2 %v746_v57 }
 0x101   :  { %1394 = vperm.xlu1 %2868, %v1389_v53   ;;  %1324 = vperm.xlu0 %2867, %v1319_v56   ;;  %v693_v56 = vld [vmem:[%s5052_s6 + $0x40] sm:$0xff] }
 0x102   :  { %v334_v60 = vpop.f32.mrf.mxu2  ;;  %v375_v63 = vpop.f32.mrf.mxu3  ;;  %2332 = vperm.xlu2 %2872, %v3812_v36  }
 0x103   :  { %v335_v3 = vadd.f32 %v334_v60, %v294_v59  ;;  %v255_v24 = vpop.f32.mrf.mxu0  ;;  %v296_v4 = vpop.f32.mrf.mxu1 }
 0x104   :  { %v297_v13 = vadd.f32 %v296_v4, %v255_v24  ;;  %v1340_v4 = vperm.slane %v3812_v36, 4 }
 0x105   :  { %v376_v7 = vadd.f32 %v375_v63, %v335_v3  ;;  %v3931_v3 = vpop.permute.xlu1 %988 }
 0x107   :  { %663 = vmatmul.f32.gmra.mxu0 %v376_v7 }
 0x109   :  { %1415 = vperm.xlu1 %2868, %v1410_v2   ;;  %1345 = vperm.xlu0 %2867, %v1340_v4   ;;  %v690_v4 = vld [vmem:[%s5052_s6 + $0x28] sm:$0xff] }
 0x10a   :  { %v337_v14 = vpop.f32.mrf.mxu2  ;;  %v378_v48 = vpop.f32.mrf.mxu3 }
 0x10b   :  { %v338_v16 = vadd.f32 %v337_v14, %v297_v13  ;;  %v258_v20 = vpop.f32.mrf.mxu0  ;;  %v299_v1 = vpop.f32.mrf.mxu1 }
 0x10c   :  { %v300_v9 = vadd.f32 %v299_v1, %v258_v20 }
 0x10d   :  { %v379_v29 = vadd.f32 %v378_v48, %v338_v16  ;;  %v3936_v13 = vpop.permute.xlu1 %1002 }
 0x10f   :  { %666 = vmatmul.f32.gmra.mxu0 %v379_v29 }
 0x111   :  { %2871 = vset.pattern.permute.xlu1 %v2915_v0  ;;  %1366 = vperm.xlu0 %2867, %v1361_v12  }
 0x112   :  { %v340_v34 = vpop.f32.mrf.mxu2  ;;  %v381_v35 = vpop.f32.mrf.mxu3  ;;  %2317 = vperm.xlu1 %2871, %v3204_v17  }
 0x113   :  { %v341_v33 = vadd.f32 %v340_v34, %v300_v9  ;;  %v261_v39 = vpop.f32.mrf.mxu0  ;;  %v302_v40 = vpop.f32.mrf.mxu1  ;;  %v1403_v34 = vperm.slane %v3864_v51, 5 }
 0x114   :  { %v303_v49 = vadd.f32 %v302_v40, %v261_v39  ;;  %v699_v39 = vld [vmem:[%s5052_s6 + $0x70] sm:$0xff] }
 0x115   :  { %v382_v43 = vadd.f32 %v381_v35, %v341_v33  ;;  %v3941_v28 = vpop.permute.xlu1 %1016  ;;  %v700_v35 = vld [vmem:[%s5052_s6 + $0x78] sm:$0xff] }
 0x116   :  { %705 = vmatpush.msra.mxu1 %v700_v35 }
 0x117   :  { %669 = vmatmul.f32.gmra.mxu0 %v382_v43  ;;  %v698_v43 = vld [vmem:[%s5052_s6 + $0x68] sm:$0xff] }
 0x118   :  { %706 = vmatpush.msra.mxu1 %v699_v39 }
 0x119   :  { %1387 = vperm.xlu0 %2867, %v1382_v27  }
 0x11a   :  { %v343_v21 = vpop.f32.mrf.mxu2  ;;  %v384_v50 = vpop.f32.mrf.mxu3  ;;  %2323 = vperm.xlu1 %2871, %v3577_v47   ;;  %707 = vmatpush.msra.mxu1 %v698_v43 }
 0x11b   :  { %v344_v23 = vadd.f32 %v343_v21, %v303_v49  ;;  %v264_v26 = vpop.f32.mrf.mxu0  ;;  %v305_v52 = vpop.f32.mrf.mxu1  ;;  %v696_v49 = vld [vmem:[%s5052_s6 + $0x58] sm:$0xff] }
 0x11c   :  { %v306_v61 = vadd.f32 %v305_v52, %v264_v26  ;;  %708 = vmatpush.msra.mxu1 %v697_v46  ;;  %v2908_v26 = vld [vmem:[%s5046_s1] sm:$0xff] }
 0x11d   :  { %v385_v55 = vadd.f32 %v384_v50, %v344_v23  ;;  %v3955_v44 = vpop.permute.xlu1 %1037  ;;  %v695_v23 = vld [vmem:[%s5052_s6 + $0x50] sm:$0xff] }
 0x11e   :  { %709 = vmatpush.msra.mxu1 %v696_v49 }
 0x11f   :  { %672 = vmatmul.f32.gmra.mxu0 %v385_v55  ;;  %v694_v55 = vld [vmem:[%s5052_s6 + $0x48] sm:$0xff] }
 0x120   :  { %710 = vmatpush.msra.mxu1 %v695_v23  ;;  %v2873_v23 = vld [vmem:[%s5049_s5] ss:$0 sm:$0xff] }
 0x121   :  { %1408 = vperm.xlu0 %2867, %v1403_v34  }
 0x122   :  { %v346_v58 = vpop.f32.mrf.mxu2  ;;  %v387_v8 = vpop.f32.mrf.mxu3  ;;  %2329 = vperm.xlu1 %2871, %v3751_v18   ;;  %711 = vmatpush.msra.mxu1 %v694_v55 }
 0x123   :  { %v347_v59 = vadd.f32 %v346_v58, %v306_v61  ;;  %v267_v60 = vpop.f32.mrf.mxu0  ;;  %v308_v63 = vpop.f32.mrf.mxu1  ;;  %v692_v61 = vld [vmem:[%s5052_s6 + $0x38] sm:$0xff] }
 0x124   :  { %v309_v5 = vadd.f32 %v308_v63, %v267_v60  ;;  %712 = vmatpush.msra.mxu1 %v693_v56  ;;  %v691_v60 = vld [vmem:[%s5052_s6 + $0x30] sm:$0xff] }
 0x125   :  { %v388_v24 = vadd.f32 %v387_v8, %v347_v59  ;;  %v3976_v57 = vpop.permute.xlu1 %1058 }
 0x126   :  { %713 = vmatpush.msra.mxu1 %v692_v61 }
 0x127   :  { %675 = vmatmul.f32.gmra.mxu0 %v388_v24 }
 0x128   :  { %714 = vmatpush.msra.mxu1 %v691_v60 }
 0x129   :  { %2870 = vset.pattern.permute.xlu0 %v2915_v0 }
 0x12a   :  { %v349_v37 = vpop.f32.mrf.mxu2  ;;  %v390_v6 = vpop.f32.mrf.mxu3  ;;  %2314 = vperm.xlu0 %2870, %v2908_v26   ;;  %715 = vmatpush.msra.mxu1 %v690_v4 }
 0x12b   :  { %v350_v7 = vadd.f32 %v349_v37, %v309_v5  ;;  %v270_v62 = vpop.f32.mrf.mxu0  ;;  %v311_v10 = vpop.f32.mrf.mxu1  ;;  %v689_v37 = vld [vmem:[%s5052_s6 + $0x20] sm:$0xff] }
 0x12c   :  { %v312_v14 = vadd.f32 %v311_v10, %v270_v62  ;;  %716 = vmatpush.msra.mxu1 %v689_v37 }
 0x12d   :  { %v391_v11 = vadd.f32 %v390_v6, %v350_v7  ;;  %v688_v6 = vld [vmem:[%s5052_s6 + $0x18] sm:$0xff]  ;;  %v687_v7 = vld [vmem:[%s5052_s6 + $0x10] sm:$0xff]  ;;  %v3997_v62 = vpop.permute.xlu1 %1079 }
 0x12e   :  { %717 = vmatpush.msra.mxu1 %v688_v6 }
 0x12f   :  { %678 = vmatmul.f32.gmra.mxu0 %v391_v11 }
 0x130   :  { %718 = vmatpush.msra.mxu1 %v687_v7 }
 0x132   :  { %v352_v48 = vpop.f32.mrf.mxu2  ;;  %v393_v15 = vpop.f32.mrf.mxu3  ;;  %2335 = vperm.xlu0 %2870, %v3864_v51  }
 0x133   :  { %v353_v16 = vadd.f32 %v352_v48, %v312_v14  ;;  %v477_v20 = vpop.f32.mrf.mxu0  ;;  %v518_v1 = vpop.f32.mrf.mxu1 }
 0x134   :  { %v519_v36 = vadd.f32 %v518_v1, %v477_v20  ;;  %v685_v1 = vld [vmem:[%s5052_s6] sm:$0xff] }
 0x135   :  { %v394_v25 = vadd.f32 %v393_v15, %v353_v16  ;;  %v686_v16 = vld [vmem:[%s5052_s6 + $0x8] sm:$0xff] }
 0x136   :  { %719 = vmatpush.msra.mxu1 %v686_v16 }
 0x137   :  { %681 = vmatmul.f32.gmra.mxu0 %v394_v25 }
 0x138   :  { %720 = vmatpush.msra.mxu1 %v685_v1 }
 0x13a   :  { %v559_v29 = vpop.f32.mrf.mxu2  ;;  %v600_v30 = vpop.f32.mrf.mxu3 }
 0x13b   :  { %v560_v31 = vadd.f32 %v559_v29, %v519_v36  ;;  %v480_v32 = vpop.f32.mrf.mxu0  ;;  %v521_v17 = vpop.f32.mrf.mxu1 }
 0x13c   :  { %v522_v38 = vadd.f32 %v521_v17, %v480_v32  ;;  %v4005_v29 = vpop.permute.xlu1 %1100 }
 0x13d   :  { %v601_v9 = vadd.f32 %v600_v30, %v560_v31  ;;  %5097 = vst [vmem:[#allocation2_spill] sm:$0xff] %v4005_v29  ;;  %v4007_v30 = vpop.permute.xlu0 %981 }
 0x13f   :  { %782 = vmatmul.f32.vlgmr.msra.gmra.mxu2 %v601_v9 }
 0x142   :  { %v562_v33 = vpop.f32.mrf.mxu2  ;;  %v603_v47 = vpop.f32.mrf.mxu3 }
 0x143   :  { %v563_v40 = vadd.f32 %v562_v33, %v522_v38  ;;  %v483_v41 = vpop.f32.mrf.mxu0  ;;  %v524_v42 = vpop.f32.mrf.mxu1 }
 0x144   :  { %v525_v21 = vadd.f32 %v524_v42, %v483_v41 }
 0x145   :  { %v604_v45 = vadd.f32 %v603_v47, %v563_v40  ;;  %v4009_v47 = vpop.permute.xlu1 %1121  ;;  %v4011_v39 = vpop.permute.xlu0 %1030 }
 0x146   :  { %5098 = vst [vmem:[#allocation3_spill] sm:$0xff] %v4009_v47 }
 0x147   :  { %785 = vmatmul.f32.gmra.mxu2 %v604_v45 }
 0x14a   :  { %v565_v50 = vpop.f32.mrf.mxu2  ;;  %v606_v22 = vpop.f32.mrf.mxu3 }
 0x14b   :  { %v566_v52 = vadd.f32 %v565_v50, %v525_v21  ;;  %v486_v53 = vpop.f32.mrf.mxu0  ;;  %v527_v54 = vpop.f32.mrf.mxu1 }
 0x14c   :  { %v528_v58 = vadd.f32 %v527_v54, %v486_v53  ;;  %v4020_v53 = vpop.permute.xlu2 %995 }
 0x14d   :  { %v607_v0 = vadd.f32 %v606_v22, %v566_v52  ;;  %v4013_v50 = vpop.permute.xlu1 %1142  ;;  %v4015_v22 = vpop.permute.xlu0 %1051 }
 0x14e   :  { %5099 = vst [vmem:[#allocation4_spill] sm:$0xff] %v4013_v50 }
 0x14f   :  { %788 = vmatmul.f32.gmra.mxu2 %v607_v0 }
 0x152   :  { %v568_v8 = vpop.f32.mrf.mxu2  ;;  %v609_v59 = vpop.f32.mrf.mxu3 }
 0x153   :  { %v569_v63 = vadd.f32 %v568_v8, %v528_v58  ;;  %v489_v2 = vpop.f32.mrf.mxu0  ;;  %v530_v24 = vpop.f32.mrf.mxu1 }
 0x154   :  { %v531_v10 = vadd.f32 %v530_v24, %v489_v2  ;;  %v4026_v61 = vpop.permute.xlu2 %1009 }
 0x155   :  { %v610_v5 = vadd.f32 %v609_v59, %v569_v63  ;;  %v4022_v54 = vpop.permute.xlu1 %1163  ;;  %v4024_v55 = vpop.permute.xlu0 %1072 }
 0x156   :  { %5100 = vst [vmem:[#allocation5_spill] sm:$0xff] %v4022_v54 }
 0x157   :  { %791 = vmatmul.f32.gmra.mxu2 %v610_v5 }
 0x15a   :  { %v571_v11 = vpop.f32.mrf.mxu2  ;;  %v612_v12 = vpop.f32.mrf.mxu3 }
 0x15b   :  { %v572_v14 = vadd.f32 %v571_v11, %v531_v10  ;;  %v492_v48 = vpop.f32.mrf.mxu0  ;;  %v533_v15 = vpop.f32.mrf.mxu1 }
 0x15c   :  { %v534_v25 = vadd.f32 %v533_v15, %v492_v48  ;;  %v4032_v2 = vpop.permute.xlu2 %1023 }
 0x15d   :  { %v613_v20 = vadd.f32 %v612_v12, %v572_v14  ;;  %v4028_v58 = vpop.permute.xlu1 %1184  ;;  %v4030_v8 = vpop.permute.xlu0 %1093 }
 0x15e   :  { %5101 = vst [vmem:[#allocation6_spill] sm:$0xff] %v4028_v58 }
 0x15f   :  { %794 = vmatmul.f32.gmra.mxu2 %v613_v20  ;;  %5102 = vst [vmem:[#allocation7_spill] sm:$0xff] %v4030_v8 }
 0x162   :  { %v574_v27 = vpop.f32.mrf.mxu2  ;;  %v615_v36 = vpop.f32.mrf.mxu3 }
 0x163   :  { %v575_v31 = vadd.f32 %v574_v27, %v534_v25  ;;  %v495_v32 = vpop.f32.mrf.mxu0  ;;  %v536_v17 = vpop.f32.mrf.mxu1 }
 0x164   :  { %v537_v34 = vadd.f32 %v536_v17, %v495_v32  ;;  %v4038_v7 = vpop.permute.xlu2 %1044 }
 0x165   :  { %v616_v9 = vadd.f32 %v615_v36, %v575_v31  ;;  %v4034_v24 = vpop.permute.xlu1 %1205  ;;  %v4036_v5 = vpop.permute.xlu0 %1114 }
 0x166   :  { %5103 = vst [vmem:[#allocation8_spill] sm:$0xff] %v4034_v24 }
 0x167   :  { %797 = vmatmul.f32.gmra.mxu2 %v616_v9  ;;  %5104 = vst [vmem:[#allocation9_spill] sm:$0xff] %v4036_v5 }
 0x16a   :  { %v577_v35 = vpop.f32.mrf.mxu2  ;;  %v618_v38 = vpop.f32.mrf.mxu3 }
 0x16b   :  { %v578_v33 = vadd.f32 %v577_v35, %v537_v34  ;;  %v498_v41 = vpop.f32.mrf.mxu0  ;;  %v539_v42 = vpop.f32.mrf.mxu1  ;;  %v2874_v35 = vld [vmem:[%s5051_s9] ss:$0 sm:$0xff] }
 0x16c   :  { %v540_v43 = vadd.f32 %v539_v42, %v498_v41  ;;  %v4044_v48 = vpop.permute.xlu2 %1065 }
 0x16d   :  { %v619_v40 = vadd.f32 %v618_v38, %v578_v33  ;;  %v4040_v10 = vpop.permute.xlu1 %1226  ;;  %v4042_v11 = vpop.permute.xlu0 %1135 }
 0x16e   :  { %5105 = vst [vmem:[#allocation10_spill] sm:$0xff] %v4040_v10 }
 0x16f   :  { %800 = vmatmul.f32.gmra.mxu2 %v619_v40  ;;  %5106 = vst [vmem:[#allocation11_spill] sm:$0xff] %v4042_v11 }
 0x172   :  { %v580_v45 = vpop.f32.mrf.mxu2  ;;  %v621_v49 = vpop.f32.mrf.mxu3 }
 0x173   :  { %v581_v46 = vadd.f32 %v580_v45, %v540_v43 }
 0x174   :  { %v4050_v25 = vpop.permute.xlu2 %1086 }
 0x175   :  { %v622_v21 = vadd.f32 %v621_v49, %v581_v46  ;;  %v4046_v15 = vpop.permute.xlu1 %1247  ;;  %v4048_v16 = vpop.permute.xlu0 %1156  ;;  %5109 = vst [vmem:[#allocation14_spill] sm:$0xff] %v4050_v25 }
 0x176   :  { %5107 = vst [vmem:[#allocation12_spill] sm:$0xff] %v4046_v15 }
 0x177   :  { %803 = vmatmul.f32.gmra.mxu2 %v622_v21  ;;  %5108 = vst [vmem:[#allocation13_spill] sm:$0xff] %v4048_v16 }
 0x17c   :  { %v661_v26 = vpop.f32.mrf.mxu0  ;;  %v4056_v17 = vpop.permute.xlu2 %1107 }
 0x17d   :  { %v662_v52 = vadd.f32 %v2873_v23, %v661_v26  ;;  %v4052_v27 = vpop.permute.xlu1 %1268  ;;  %v4054_v36 = vpop.permute.xlu0 %1177  ;;  %5112 = vst [vmem:[#allocation17_spill] sm:$0xff] %v4056_v17 }
 0x17e   :  { %5110 = vst [vmem:[#allocation15_spill] sm:$0xff] %v4052_v27 }
 0x17f   :  { %721 = vmatmul.f32.vlgmr.msra.gmra.mxu1 %v662_v52  ;;  %5111 = vst [vmem:[#allocation16_spill] sm:$0xff] %v4054_v36 }
 0x184   :  { %v664_v0 = vpop.f32.mrf.mxu0  ;;  %v4069_v41 = vpop.permute.xlu2 %1128 }
 0x185   :  { %v665_v56 = vadd.f32 %v2873_v23, %v664_v0  ;;  %v4058_v9 = vpop.permute.xlu1 %1289  ;;  %v4060_v34 = vpop.permute.xlu0 %1198  ;;  %5115 = vst [vmem:[#allocation20_spill] sm:$0xff] %v4069_v41 }
 0x186   :  { %5113 = vst [vmem:[#allocation18_spill] sm:$0xff] %v4058_v9 }
 0x187   :  { %724 = vmatmul.f32.gmra.mxu1 %v665_v56  ;;  %5114 = vst [vmem:[#allocation19_spill] sm:$0xff] %v4060_v34 }
 0x18c   :  { %v667_v59 = vpop.f32.mrf.mxu0  ;;  %v4079_v21 = vpop.permute.xlu2 %1149 }
 0x18d   :  { %v668_v60 = vadd.f32 %v2873_v23, %v667_v59  ;;  %v4071_v42 = vpop.permute.xlu1 %1310  ;;  %v4073_v43 = vpop.permute.xlu0 %1219  ;;  %5118 = vst [vmem:[#allocation23_spill] sm:$0xff] %v4079_v21 }
 0x18e   :  { %5116 = vst [vmem:[#allocation21_spill] sm:$0xff] %v4071_v42 }
 0x18f   :  { %727 = vmatmul.f32.gmra.mxu1 %v668_v60  ;;  %5117 = vst [vmem:[#allocation22_spill] sm:$0xff] %v4073_v43 }
 0x194   :  { %v670_v63 = vpop.f32.mrf.mxu0  ;;  %v4089_v60 = vpop.permute.xlu2 %1170 }
 0x195   :  { %v671_v4 = vadd.f32 %v2873_v23, %v670_v63  ;;  %v4083_v26 = vpop.permute.xlu0 %1240  ;;  %5121 = vst [vmem:[#allocation26_spill] sm:$0xff] %v4089_v60 }
 0x196   :  { %5120 = vst [vmem:[#allocation25_spill] sm:$0xff] %v4083_v26 }
 0x197   :  { %730 = vmatmul.f32.gmra.mxu1 %v671_v4 }
 0x19c   :  { %v673_v37 = vpop.f32.mrf.mxu0 }
 0x19d   :  { %v674_v6 = vadd.f32 %v2873_v23, %v673_v37  ;;  %v4095_v37 = vpop.permute.xlu0 %1261 }
 0x19e   :  { %5123 = vst [vmem:[#allocation28_spill] sm:$0xff] %v4095_v37 }
 0x19f   :  { %733 = vmatmul.f32.gmra.mxu1 %v674_v6 }
 0x1a4   :  { %v676_v12 = vpop.f32.mrf.mxu0 }
 0x1a5   :  { %v677_v14 = vadd.f32 %v2873_v23, %v676_v12 }
 0x1a7   :  { %736 = vmatmul.f32.gmra.mxu1 %v677_v14 }
 0x1ac   :  { %v679_v20 = vpop.f32.mrf.mxu0 }
 0x1ad   :  { %v680_v1 = vadd.f32 %v2873_v23, %v679_v20  ;;  %v4101_v20 = vpop.permute.xlu2 %1191 }
 0x1ae   :  { %5124 = vst [vmem:[#allocation29_spill] sm:$0xff] %v4101_v20 }
 0x1af   :  { %739 = vmatmul.f32.gmra.mxu1 %v680_v1 }
 0x1b4   :  { %v682_v31 = vpop.f32.mrf.mxu0 }
 0x1b5   :  { %v683_v32 = vadd.f32 %v2873_v23, %v682_v31  ;;  %v4081_v23 = vpop.permute.xlu1 %1331 }
 0x1b6   :  { %5119 = vst [vmem:[#allocation24_spill] sm:$0xff] %v4081_v23 }
 0x1b7   :  { %742 = vmatmul.f32.gmra.mxu1 %v683_v32  ;;  %v4107_v32 = vpop.permute.xlu0 %1282 }
 0x1b8   :  { %5126 = vst [vmem:[#allocation31_spill] sm:$0xff] %v4107_v32 }
 0x1bd   :  { %v4091_v63 = vpop.permute.xlu1 %1352 }
 0x1be   :  { %5122 = vst [vmem:[#allocation27_spill] sm:$0xff] %v4091_v63 }
 0x1c2   :  { %v783_v38 = vpop.f32.mrf.mxu2 }
 0x1c3   :  { %v4065_v33 = vadd.f32 %v2874_v35, %v783_v38 }
 0x1c5   :  { %v1937_v40 = vmul.f32 %v4065_v33, %v4065_v33  ;;  %v4103_v1 = vpop.permute.xlu1 %1373 }
 0x1c6   :  { %5125 = vst [vmem:[#allocation30_spill] sm:$0xff] %v4103_v1 }
 0x1c7   :  { %1945 = vadd.xlane.f32.xlu1 %v1937_v40 }
 0x1ca   :  { %v786_v45 = vpop.f32.mrf.mxu2 }
 0x1cb   :  { %v4075_v46 = vadd.f32 %v2874_v35, %v786_v45 }
 0x1cd   :  { %v1938_v49 = vmul.f32 %v4075_v46, %v4075_v46 }
 0x1cf   :  { %1947 = vadd.xlane.f32.xlu2 %v1938_v49  ;;  %v4113_v49 = vpop.permute.xlu2 %1212 }
 0x1d0   :  { %5127 = vst [vmem:[#allocation32_spill] sm:$0xff] %v4113_v49 }
 0x1d2   :  { %v789_v52 = vpop.f32.mrf.mxu2 }
 0x1d3   :  { %v4085_v0 = vadd.f32 %v2874_v35, %v789_v52  ;;  %v4115_v52 = vpop.permute.xlu1 %1394 }
 0x1d4   :  { %5128 = vst [vmem:[#allocation33_spill] sm:$0xff] %v4115_v52 }
 0x1d5   :  { %v1939_v56 = vmul.f32 %v4085_v0, %v4085_v0 }
 0x1d7   :  { %1949 = vadd.xlane.f32.xlu0 %v1939_v56  ;;  %v4117_v56 = vpop.permute.xlu0 %1303 }
 0x1d8   :  { %5129 = vst [vmem:[#allocation34_spill] sm:$0xff] %v4117_v56 }
 0x1da   :  { %v792_v59 = vpop.f32.mrf.mxu2 }
 0x1db   :  { %v4093_v4 = vadd.f32 %v2874_v35, %v792_v59 }
 0x1dd   :  { %v1940_v6 = vmul.f32 %v4093_v4, %v4093_v4 }
 0x1df   :  { %1951 = vadd.xlane.f32.xlu1 %v1940_v6  ;;  %v4127_v1 = vpop.permute.xlu0 %1324 }
 0x1e0   :  { %5132 = vst [vmem:[#allocation37_spill] sm:$0xff] %v4127_v1 }
 0x1e2   :  { %v795_v12 = vpop.f32.mrf.mxu2 }
 0x1e3   :  { %v4099_v14 = vadd.f32 %v2874_v35, %v795_v12 }
 0x1e5   :  { %v1941_v31 = vmul.f32 %v4099_v14, %v4099_v14 }
 0x1e7   :  { %1953 = vadd.xlane.f32.xlu2 %v1941_v31  ;;  %v4123_v31 = vpop.permute.xlu2 %1233 }
 0x1e8   :  { %5130 = vst [vmem:[#allocation35_spill] sm:$0xff] %v4123_v31 }
 0x1ea   :  { %v798_v38 = vpop.f32.mrf.mxu2 }
 0x1eb   :  { %v4109_v40 = vadd.f32 %v2874_v35, %v798_v38  ;;  %v4125_v38 = vpop.permute.xlu1 %1415 }
 0x1ec   :  { %5131 = vst [vmem:[#allocation36_spill] sm:$0xff] %v4125_v38  ;;  %v4142_v38 = vpop.permute.xlu0 %1345 }
 0x1ed   :  { %v1942_v45 = vmul.f32 %v4109_v40, %v4109_v40  ;;  %5135 = vst [vmem:[#allocation40_spill] sm:$0xff] %v4142_v38 }
 0x1ef   :  { %1955 = vadd.xlane.f32.xlu0 %v1942_v45  ;;  %v2875_v45 = vld [vmem:[%s5053_s7] ss:$0 sm:$0xff]  ;;  %v4140_v42 = vpop.permute.xlu2 %1254 }
 0x1f0   :  { %5134 = vst [vmem:[#allocation39_spill] sm:$0xff] %v4140_v42 }
 0x1f2   :  { %v801_v59 = vpop.f32.mrf.mxu2 }
 0x1f3   :  { %v4119_v6 = vadd.f32 %v2874_v35, %v801_v59 }
 0x1f4   :  { %v4156_v37 = vpop.permute.xlu0 %1366 }
 0x1f5   :  { %v1943_v12 = vmul.f32 %v4119_v6, %v4119_v6  ;;  %5138 = vst [vmem:[#allocation43_spill] sm:$0xff] %v4156_v37 }
 0x1f7   :  { %1957 = vadd.xlane.f32.xlu1 %v1943_v12  ;;  %v4138_v12 = vpop.permute.xlu1 %2317 }
 0x1f8   :  { %5133 = vst [vmem:[#allocation38_spill] sm:$0xff] %v4138_v12  ;;  %v4154_v12 = vpop.permute.xlu2 %1275 }
 0x1f9   :  { %5137 = vst [vmem:[#allocation42_spill] sm:$0xff] %v4154_v12 }
 0x1fa   :  { %v804_v63 = vpop.f32.mrf.mxu2 }
 0x1fb   :  { %v4129_v23 = vadd.f32 %v2874_v35, %v804_v63 }
 0x1fc   :  { %v722_v52 = vpop.f32.mrf.mxu1 }
 0x1fd   :  { %v1944_v59 = vmul.f32 %v4129_v23, %v4129_v23  ;;  %v4136_v56 = vadd.f32 %v2875_v45, %v722_v52 }
 0x1ff   :  { %1959 = vadd.xlane.f32.xlu2 %v1944_v59  ;;  %v807_v63 = vmul.f32 %v4136_v56, %v4136_v56  ;;  %v4150_v59 = vpop.permute.xlu1 %2323 }
 0x200   :  { %5136 = vst [vmem:[#allocation41_spill] sm:$0xff] %v4150_v59  ;;  %v4172_v37 = vpop.permute.xlu2 %1296 }
 0x201   :  { %5142 = vst [vmem:[#allocation45_spill] sm:$0xff] %v4172_v37 }
 0x204   :  { %v725_v1 = vpop.f32.mrf.mxu1 }
 0x205   :  { %v4144_v35 = vadd.f32 %v2875_v45, %v725_v1 }
 0x207   :  { %815 = vadd.xlane.f32.xlu2 %v807_v63  ;;  %v808_v32 = vmul.f32 %v4144_v35, %v4144_v35  ;;  %v2330_v38 = vpop.permute.xlu1 %2329 }
 0x208   :  { %vm2342_vm13 = vcmp.eq.s32.totalorder %v3751_v18, %v2330_v38  ;;  %v4180_v38 = vpop.permute.xlu2 %1317 }
 0x209   :  { %817 = vadd.xlane.f32.xlu0 %v808_v32  ;;  %vm4164_vm14 = vmand %vm2342_vm13, %vm2345_vm12  ;;  %v5139_v32 = vmov 0  ;;  %5144 = vst [vmem:[#allocation47_spill] sm:$0xff] %v4180_v38 }
 0x20a   :  { %v5140_v32 = vsel %vm4164_vm14, 4294967295, %v5139_v32 }
 0x20b   :  { %5141 = vst [vmem:[#allocation44_spill] sm:$0xff] %v5140_v32 }
 0x20c   :  { %v728_v52 = vpop.f32.mrf.mxu1 }
 0x20d   :  { %v4152_v9 = vadd.f32 %v2875_v45, %v728_v52 }
 0x20f   :  { %v809_v1 = vmul.f32 %v4152_v9, %v4152_v9 }
 0x211   :  { %819 = vadd.xlane.f32.xlu1 %v809_v1  ;;  %v4174_v1 = vpop.permute.xlu0 %1387 }
 0x212   :  { %5143 = vst [vmem:[#allocation46_spill] sm:$0xff] %v4174_v1 }
 0x214   :  { %v731_v63 = vpop.f32.mrf.mxu1 }
 0x215   :  { %v4168_v52 = vadd.f32 %v2875_v45, %v731_v63 }
 0x217   :  { %v810_v59 = vmul.f32 %v4168_v52, %v4168_v52 }
 0x219   :  { %821 = vadd.xlane.f32.xlu2 %v810_v59  ;;  %v4182_v32 = vpop.permute.xlu0 %1408  ;;  %v4190_v59 = vpop.permute.xlu2 %1338 }
 0x21a   :  { %5145 = vst [vmem:[#allocation48_spill] sm:$0xff] %v4182_v32 }
 0x21b   :  { %5147 = vst [vmem:[#allocation50_spill] sm:$0xff] %v4190_v59 }
 0x21c   :  { %v734_v12 = vpop.f32.mrf.mxu1 }
 0x21d   :  { %v4176_v27 = vadd.f32 %v2875_v45, %v734_v12 }
 0x21f   :  { %v811_v18 = vmul.f32 %v4176_v27, %v4176_v27 }
 0x221   :  { %823 = vadd.xlane.f32.xlu2 %v811_v18  ;;  %v4188_v1 = vpop.permute.xlu0 %2314 }
 0x222   :  { %5146 = vst [vmem:[#allocation49_spill] sm:$0xff] %v4188_v1 }
 0x224   :  { %v737_v63 = vpop.f32.mrf.mxu1 }
 0x225   :  { %v4184_v42 = vadd.f32 %v2875_v45, %v737_v63  ;;  %v4199_v63 = vpop.permute.xlu2 %1359 }
 0x226   :  { %5148 = vst [vmem:[#allocation51_spill] sm:$0xff] %v4199_v63 }
 0x227   :  { %v812_v37 = vmul.f32 %v4184_v42, %v4184_v42 }
 0x229   :  { %825 = vadd.xlane.f32.xlu0 %v812_v37  ;;  %v2336_v32 = vpop.permute.xlu0 %2335  ;;  %v5149_v37 = vmov 0 }
 0x22a   :  { %vm2344_vm15 = vcmp.eq.s32.totalorder %v3864_v51, %v2336_v32 }
 0x22b   :  { %vm4203_vm4 = vmand %vm2344_vm15, %vm2345_vm12 }
 0x22c   :  { %v740_v12 = vpop.f32.mrf.mxu1  ;;  %v5150_v37 = vsel %vm4203_vm4, 4294967295, %v5149_v37 }
 0x22d   :  { %v4192_v26 = vadd.f32 %v2875_v45, %v740_v12  ;;  %5151 = vst [vmem:[#allocation52_spill] sm:$0xff] %v5150_v37  ;;  %v4209_v1 = vpop.permute.xlu2 %1380 }
 0x22e   :  { %5152 = vst [vmem:[#allocation53_spill] sm:$0xff] %v4209_v1 }
 0x22f   :  { %v813_v18 = vmul.f32 %v4192_v26, %v4192_v26 }
 0x231   :  { %827 = vadd.xlane.f32.xlu1 %v813_v18 }
 0x234   :  { %v743_v38 = vpop.f32.mrf.mxu1 }
 0x235   :  { %v4196_v15 = vadd.f32 %v2875_v45, %v743_v38  ;;  %v4211_v18 = vpop.permute.xlu2 %1401 }
 0x236   :  { %5153 = vst [vmem:[#allocation54_spill] sm:$0xff] %v4211_v18 }
 0x237   :  { %v814_v12 = vmul.f32 %v4196_v15, %v4196_v15 }
 0x239   :  { %829 = vadd.xlane.f32.xlu2 %v814_v12 }
 0x23a   :  { %v4225_v37 = vpop.xlane.xlu1 %1945 }
 0x23b   :  { %5160 = vst [vmem:[#allocation61_spill] sm:$0xff] %v4225_v37 }
 0x23d   :  { %v4213_v45 = vpop.permute.xlu2 %1422 }
 0x23e   :  { %5154 = vst [vmem:[#allocation55_spill] sm:$0xff] %v4213_v45 }
 0x245   :  { %v4215_v38 = vpop.permute.xlu2 %2320 }
 0x246   :  { %5155 = vst [vmem:[#allocation56_spill] sm:$0xff] %v4215_v38 }
 0x24a   :  { %v4229_v12 = vpop.xlane.xlu0 %1949 }
 0x24b   :  { %5162 = vst [vmem:[#allocation63_spill] sm:$0xff] %v4229_v12 }
 0x24d   :  { %v4217_v51 = vpop.permute.xlu2 %2326 }
 0x24e   :  { %5156 = vst [vmem:[#allocation57_spill] sm:$0xff] %v4217_v51 }
 0x252   :  { %v4231_v1 = vpop.xlane.xlu1 %1951 }
 0x253   :  { %5163 = vst [vmem:[#allocation64_spill] sm:$0xff] %v4231_v1 }
 0x255   :  { %v4219_v32 = vpop.permute.xlu2 %2332 }
 0x256   :  { %5157 = vst [vmem:[#allocation58_spill] sm:$0xff] %v4219_v32 }
 0x25d   :  { %v4221_v63 = vpop.xlane.xlu2 %1947 }
 0x25e   :  { %5158 = vst [vmem:[#allocation59_spill] sm:$0xff] %v4221_v63 }
 0x262   :  { %v4233_v18 = vpop.xlane.xlu0 %1955 }
 0x263   :  { %5164 = vst [vmem:[#allocation65_spill] sm:$0xff] %v4233_v18 }
 0x265   :  { %v4223_v59 = vpop.xlane.xlu2 %1953 }
 0x266   :  { %5159 = vst [vmem:[#allocation60_spill] sm:$0xff] %v4223_v59 }
 0x26a   :  { %v4237_v38 = vpop.xlane.xlu1 %1957 }
 0x26b   :  { %5165 = vst [vmem:[#allocation66_spill] sm:$0xff] %v4237_v38 }
 0x272   :  { %v4227_v31 = vpop.xlane.xlu2 %1959 }
 0x273   :  { %5161 = vst [vmem:[#allocation62_spill] sm:$0xff] %v4227_v31 }
 0x27a   :  { %v4235_v45 = vpop.xlane.xlu2 %815 }
 0x27c   :  { %v4239_v51 = vpop.xlane.xlu0 %817 }
 0x284   :  { %v4243_v63 = vpop.xlane.xlu1 %819 }
 0x28c   :  { %v4241_v32 = vpop.xlane.xlu2 %821 }
 0x294   :  { %v4245_v37 = vpop.xlane.xlu2 %823 }
 0x295   :  { %vm877_vm3 = vweird.f32 %v4245_v37 }
 0x29c   :  { %v826_v59 = vpop.xlane.xlu0 %825 }
 0x29d   :  { %2876 = vrsqrt.f32 %v826_v59  ;;  %vm887_vm0 = vweird.f32 %v826_v59 }
 0x2a3   :  { %v4248_v1 = vpop.eup %2876 }
 0x2a4   :  { %v828_v31 = vpop.xlane.xlu1 %827  ;;  %v882_v10 = vmul.f32 %v4248_v1, %v826_v59  ;;  %vm888_vm11 = vweird.f32 %v4248_v1 }
 0x2a5   :  { %2878 = vrsqrt.f32 %v828_v31  ;;  %vm897_vm7 = vweird.f32 %v828_v31  ;;  %vm889_vm1 = vmor %vm887_vm0, %vm888_vm11  ;;  %vm847_vm11 = vweird.f32 %v4239_v51 }
 0x2a6   :  { %2880 = vrsqrt.f32 %v4245_v37  ;;  %v883_v20 = vmul.f32 %v4248_v1, %v882_v10 }
 0x2a7   :  { %2882 = vrsqrt.f32 %v4241_v32 }
 0x2a8   :  { %v884_v21 = vmul.f32 0.5, %v883_v20 }
 0x2aa   :  { %v885_v17 = vsub.f32 1.5, %v884_v21 }
 0x2ab   :  { %v2879_v18 = vpop.eup %2878 }
 0x2ac   :  { %v892_v38 = vmul.f32 %v2879_v18, %v828_v31  ;;  %v830_v12 = vpop.xlane.xlu2 %829  ;;  %v4251_v43 = vpop.eup %2880  ;;  %vm898_vm5 = vweird.f32 %v2879_v18 }
 0x2ad   :  { %2884 = vrsqrt.f32 %v830_v12  ;;  %v872_v34 = vmul.f32 %v4251_v43, %v4245_v37  ;;  %v4257_v24 = vpop.eup %2882  ;;  %vm4272_vm8 = vmor %vm897_vm7, %vm898_vm5  ;;  %vm907_vm9 = vweird.f32 %v830_v12  ;;  %vm878_vm2 = vweird.f32 %v4251_v43 }
 0x2ae   :  { %v893_v49 = vmul.f32 %v2879_v18, %v892_v38  ;;  %2886 = vrsqrt.f32 %v4243_v63  ;;  %v862_v16 = vmul.f32 %v4257_v24, %v4241_v32  ;;  %vm879_vm13 = vmor %vm877_vm3, %vm878_vm2  ;;  %vm868_vm15 = vweird.f32 %v4257_v24 }
 0x2af   :  { %2888 = vrsqrt.f32 %v4239_v51  ;;  %v873_v54 = vmul.f32 %v4251_v43, %v872_v34  ;;  %vm867_vm5 = vweird.f32 %v4241_v32  ;;  %vm837_vm2 = vweird.f32 %v4235_v45 }
 0x2b0   :  { %v894_v36 = vmul.f32 0.5, %v893_v49  ;;  %2890 = vrsqrt.f32 %v4235_v45  ;;  %v863_v49 = vmul.f32 %v4257_v24, %v862_v16 }
 0x2b1   :  { %v874_v5 = vmul.f32 0.5, %v873_v54 }
 0x2b2   :  { %v895_v11 = vsub.f32 1.5, %v894_v36  ;;  %v864_v20 = vmul.f32 0.5, %v863_v49 }
 0x2b3   :  { %v2885_v58 = vpop.eup %2884  ;;  %v875_v29 = vsub.f32 1.5, %v874_v5 }
 0x2b4   :  { %v902_v60 = vmul.f32 %v2885_v58, %v830_v12  ;;  %v4264_v38 = vpop.eup %2886  ;;  %v896_v8 = vmul.f32 %v2879_v18, %v895_v11  ;;  %vm908_vm6 = vweird.f32 %v2885_v58  ;;  %v886_v11 = vmul.f32 %v4248_v1, %v885_v17 }
 0x2b5   :  { %v852_v10 = vmul.f32 %v4264_v38, %v4243_v63  ;;  %v4270_v47 = vpop.eup %2888  ;;  %vm909_vm10 = vmor %vm907_vm9, %vm908_vm6  ;;  %v865_v49 = vsub.f32 1.5, %v864_v20  ;;  %v876_v17 = vmul.f32 %v4251_v43, %v875_v29  ;;  %vm858_vm7 = vweird.f32 %v4264_v38 }
 0x2b6   :  { %v903_v50 = vmul.f32 %v2885_v58, %v902_v60  ;;  %v842_v16 = vmul.f32 %v4270_v47, %v4239_v51  ;;  %v900_v21 = vsel %vm4272_vm8, %v2879_v18, %v896_v8  ;;  %vm869_vm6 = vmor %vm867_vm5, %vm868_vm15  ;;  %vm857_vm8 = vweird.f32 %v4243_v63 }
 0x2b7   :  { %v853_v54 = vmul.f32 %v4264_v38, %v852_v10  ;;  %v917_v10 = vmin.f32 %v900_v21, 1e+08  ;;  %v880_v29 = vsel %vm879_vm13, %v4251_v43, %v876_v17  ;;  %vm859_vm9 = vmor %vm857_vm8, %vm858_vm7  ;;  %vm1744_vm13 = vcmask 523264  }
 0x2b8   :  { %v904_v41 = vmul.f32 0.5, %v903_v50  ;;  %v4276_v50 = vpop.eup %2890  ;;  %vm1424_vm15 = vcmp.eq.s32.totalorder %v4007_v30, %v3208_v19  ;;  %vm1426_vm5 = vcmp.eq.s32.totalorder %v4020_v53, %v3208_v19  ;;  %vm1427_vm7 = vcmp.eq.s32.totalorder %v3936_v13, %v3208_v19 }
 0x2b9   :  { %v832_v12 = vmul.f32 %v4276_v50, %v4235_v45  ;;  %v854_v25 = vmul.f32 0.5, %v853_v54  ;;  %v925_v18 = vmul.f32 %v917_v10, %v4192_v26  ;;  %vm1428_vm8 = vcmp.eq.s32.totalorder %v4026_v61, %v3208_v19 }
 0x2ba   :  { %v905_v34 = vsub.f32 1.5, %v904_v41 }
 0x2bb   :  { %v833_v8 = vmul.f32 %v4276_v50, %v832_v12 }
 0x2bc   :  { %v906_v60 = vmul.f32 %v2885_v58, %v905_v34  ;;  %v843_v34 = vmul.f32 %v4270_v47, %v842_v16  ;;  %v915_v16 = vmin.f32 %v880_v29, 1e+08 }
 0x2be   :  { %v910_v41 = vsel %vm909_vm10, %v2885_v58, %v906_v60  ;;  %v890_v58 = vsel %vm889_vm1, %v4248_v1, %v886_v11  ;;  %v844_v59 = vmul.f32 0.5, %v843_v34  ;;  %v855_v60 = vsub.f32 1.5, %v854_v25 }
 0x2bf   :  { %v918_v31 = vmin.f32 %v910_v41, 1e+08  ;;  %v916_v36 = vmin.f32 %v890_v58, 1e+08  ;;  %v834_v1 = vmul.f32 0.5, %v833_v8  ;;  %v923_v43 = vmul.f32 %v915_v16, %v4176_v27 }
 0x2c0   :  { %v845_v54 = vsub.f32 1.5, %v844_v59  ;;  %v856_v20 = vmul.f32 %v4264_v38, %v855_v60  ;;  %vm848_vm10 = vweird.f32 %v4270_v47  ;;  %vm838_vm1 = vweird.f32 %v4276_v50 }
 0x2c1   :  { %v926_v5 = vmul.f32 %v918_v31, %v4196_v15  ;;  %v866_v15 = vmul.f32 %v4257_v24, %v865_v49  ;;  %v924_v37 = vmul.f32 %v916_v36, %v4184_v42  ;;  %v835_v32 = vsub.f32 1.5, %v834_v1  ;;  %vm849_vm0 = vmor %vm847_vm11, %vm848_vm10 }
 0x2c2   :  { %v846_v11 = vmul.f32 %v4270_v47, %v845_v54  ;;  %v860_v42 = vsel %vm859_vm9, %v4264_v38, %v856_v20  ;;  %vm839_vm3 = vmor %vm837_vm2, %vm838_vm1  ;;  %vm1429_vm9 = vcmp.eq.s32.totalorder %v3941_v28, %v3208_v19  ;;  %vm1430_vm10 = vcmp.eq.s32.totalorder %v4032_v2, %v3208_v19 }
 0x2c3   :  { %935 = vmatpush.xpose.msra.mxu3 %v926_v5  ;;  %v870_v25 = vsel %vm869_vm6, %v4257_v24, %v866_v15  ;;  %v913_v41 = vmin.f32 %v860_v42, 1e+08  ;;  %v836_v63 = vmul.f32 %v4276_v50, %v835_v32  ;;  %vm1425_vm6 = vcmp.eq.s32.totalorder %v3931_v3, %v3208_v19 }
 0x2c4   :  { %v914_v26 = vmin.f32 %v870_v25, 1e+08  ;;  %v850_v27 = vsel %vm849_vm0, %v4270_v47, %v846_v11  ;;  %vm1432_vm11 = vcmp.eq.s32.totalorder %v3955_v44, %v3208_v19  ;;  %vm1431_vm0 = vcmp.eq.s32.totalorder %v4011_v39, %v3208_v19 }
 0x2c5   :  { %v921_v21 = vmul.f32 %v913_v41, %v4152_v9  ;;  %v912_v38 = vmin.f32 %v850_v27, 1e+08  ;;  %v840_v31 = vsel %vm839_vm3, %v4276_v50, %v836_v63  ;;  %vm1433_vm1 = vcmp.eq.s32.totalorder %v4038_v7, %v3208_v19 }
 0x2c6   :  { %v922_v24 = vmul.f32 %v914_v26, %v4168_v52  ;;  %v911_v52 = vmin.f32 %v840_v31, 1e+08  ;;  %vm1435_vm2 = vcmp.eq.s32.totalorder %v3976_v57, %v3208_v19  ;;  %vm1434_vm3 = vcmp.eq.s32.totalorder %v4015_v22, %v3208_v19 }
 0x2c7   :  { %936 = vmatpush.xpose.msra.mxu3 %v925_v18  ;;  %v920_v51 = vmul.f32 %v912_v38, %v4144_v35 }
 0x2c8   :  { %v919_v12 = vmul.f32 %v911_v52, %v4136_v56 }
 0x2cb   :  { %937 = vmatpush.xpose.msra.mxu3 %v924_v37 }
 0x2cf   :  { %938 = vmatpush.xpose.msra.mxu3 %v923_v43 }
 0x2d3   :  { %939 = vmatpush.xpose.msra.mxu3 %v922_v24 }
 0x2d7   :  { %940 = vmatpush.xpose.msra.mxu3 %v921_v21 }
 0x2db   :  { %941 = vmatpush.xpose.msra.mxu3 %v920_v51 }
 0x2df   :  { %942 = vmatpush.xpose.msra.mxu3 %v919_v12 }
 0x2e2   :  { %943 = vmatmul.f32.vlgmr.msra.gmra.mxu3 %v4065_v33 }
 0x2ea   :  { %946 = vmatmul.f32.gmra.mxu3 %v4075_v46 }
 0x2f2   :  { %949 = vmatmul.f32.gmra.mxu3 %v4085_v0 }
 0x2fa   :  { %952 = vmatmul.f32.gmra.mxu3 %v4093_v4 }
 0x302   :  { %955 = vmatmul.f32.gmra.mxu3 %v4099_v14 }
 0x30a   :  { %958 = vmatmul.f32.gmra.mxu3 %v4109_v40 }
 0x312   :  { %961 = vmatmul.f32.gmra.mxu3 %v4119_v6 }
 0x31a   :  { %964 = vmatmul.f32.gmra.mxu3 %v4129_v23 }
 0x365   :  { %v944_v47 = vpop.f32.mrf.mxu3 }
 0x366   :  { %v1552_v9 = vperm.slane %v944_v47, 0  ;;  %v1497_v56 = vrot.slane %v944_v47, 2  ;;  %v1496_v35 = vrot.slane %v944_v47, 1  ;;  %v1498_v33 = vrot.slane %v944_v47, 3 }
 0x367   :  { %v1500_v46 = vrot.slane %v944_v47, 5  ;;  %v1499_v14 = vrot.slane %v944_v47, 4  ;;  %v1501_v49 = vrot.slane %v944_v47, 6  ;;  %v1502_v58 = vrot.slane %v944_v47, 7 }
 0x368   :  { %v1680_v0 = vsel %vm1424_vm15, %v1552_v9, 0.0  ;;  %v1554_v4 = vperm.slane %v1497_v56, 0  ;;  %v1553_v45 = vperm.slane %v1496_v35, 0  ;;  %v1555_v50 = vperm.slane %v1498_v33, 0 }
 0x369   :  { %v1745_v23 = vsel %vm1744_vm13, %v1680_v0, 0.0  ;;  %v1557_v5 = vperm.slane %v1500_v46, 0  ;;  %v1556_v10 = vperm.slane %v1499_v14, 0  ;;  %v1558_v18 = vperm.slane %v1501_v49, 0  ;;  %v5169_v0 = vld [vmem:[#allocation2_spill] sm:$0xff] }
 0x36a   :  { %1746 = vadd.xlane.f32.xlu0 %v1745_v23  ;;  %v1682_v40 = vsel %vm1426_vm5, %v1554_v4, 0.0  ;;  %v1681_v6 = vsel %vm1425_vm6, %v1553_v45, 0.0  ;;  %v1683_v53 = vsel %vm1427_vm7, %v1555_v50, 0.0  ;;  %v1559_v60 = vperm.slane %v1502_v58, 0  ;;  %v5170_v4 = vld [vmem:[#allocation7_spill] sm:$0xff]  ;;  %v5173_v58 = vld [vmem:[#allocation9_spill] sm:$0xff] }
 0x36b   :  { %v1751_v34 = vsel %vm1744_vm13, %v1682_v40, 0.0  ;;  %v1748_v30 = vsel %vm1744_vm13, %v1681_v6, 0.0  ;;  %v1685_v3 = vsel %vm1429_vm9, %v1557_v5, 0.0  ;;  %v1684_v17 = vsel %vm1428_vm8, %v1556_v10, 0.0 }
 0x36c   :  { %1752 = vadd.xlane.f32.xlu2 %v1751_v34  ;;  %1749 = vadd.xlane.f32.xlu1 %v1748_v30  ;;  %v1754_v59 = vsel %vm1744_vm13, %v1683_v53, 0.0  ;;  %v1760_v36 = vsel %vm1744_vm13, %v1685_v3, 0.0  ;;  %v1757_v13 = vsel %vm1744_vm13, %v1684_v17, 0.0  ;;  %v1686_v28 = vsel %vm1430_vm10, %v1558_v18, 0.0  ;;  %v5171_v53 = vld [vmem:[#allocation17_spill] sm:$0xff]  ;;  %v5172_v17 = vld [vmem:[#allocation3_spill] sm:$0xff] }
 0x36d   :  { %v947_v8 = vpop.f32.mrf.mxu3  ;;  %v1687_v29 = vsel %vm1431_vm0, %v1559_v60, 0.0  ;;  %v1763_v54 = vsel %vm1744_vm13, %v1686_v28, 0.0  ;;  %vm1436_vm15 = vcmp.eq.s32.totalorder %v4044_v48, %v3208_v19  ;;  %vm1438_vm5 = vcmp.eq.s32.totalorder %v3997_v62, %v3208_v19  ;;  %v5168_v62 = vld [vmem:[#allocation14_spill] sm:$0xff] }
 0x36e   :  { %v1560_v15 = vperm.slane %v947_v8, 0  ;;  %v1503_v61 = vrot.slane %v947_v8, 1  ;;  %v1505_v37 = vrot.slane %v947_v8, 3  ;;  %v1504_v16 = vrot.slane %v947_v8, 2 }
 0x36f   :  { %v1766_v25 = vsel %vm1744_vm13, %v1687_v29, 0.0  ;;  %v1506_v39 = vrot.slane %v947_v8, 4  ;;  %v1508_v42 = vrot.slane %v947_v8, 6  ;;  %v1507_v24 = vrot.slane %v947_v8, 5 }
 0x370   :  { %v1688_v1 = vsel %vm1432_vm11, %v1560_v15, 0.0  ;;  %v1561_v20 = vperm.slane %v1503_v61, 0  ;;  %v1563_v43 = vperm.slane %v1505_v37, 0  ;;  %v1562_v26 = vperm.slane %v1504_v16, 0 }
 0x371   :  { %v1769_v2 = vsel %vm1744_vm13, %v1688_v1, 0.0  ;;  %v1564_v63 = vperm.slane %v1506_v39, 0  ;;  %v1566_v21 = vperm.slane %v1508_v42, 0  ;;  %v1565_v38 = vperm.slane %v1507_v24, 0  ;;  %v5174_v1 = vld [vmem:[#allocation20_spill] sm:$0xff] }
 0x372   :  { %1755 = vadd.xlane.f32.xlu0 %v1754_v59  ;;  %v1689_v44 = vsel %vm1433_vm1, %v1561_v20, 0.0  ;;  %v1691_v32 = vsel %vm1435_vm2, %v1563_v43, 0.0  ;;  %v1690_v11 = vsel %vm1434_vm3, %v1562_v26, 0.0  ;;  %v1509_v31 = vrot.slane %v947_v8, 7  ;;  %v5176_v20 = vld [vmem:[#allocation11_spill] sm:$0xff] }
 0x373   :  { %v1772_v41 = vsel %vm1744_vm13, %v1689_v44, 0.0  ;;  %v1778_v27 = vsel %vm1744_vm13, %v1691_v32, 0.0  ;;  %v1775_v7 = vsel %vm1744_vm13, %v1690_v11, 0.0  ;;  %v1692_v22 = vsel %vm1436_vm15, %v1564_v63, 0.0 }
 0x374   :  { %1761 = vadd.xlane.f32.xlu2 %v1760_v36  ;;  %1758 = vadd.xlane.f32.xlu1 %v1757_v13  ;;  %vm1437_vm6 = vcmp.eq.s32.totalorder %v4024_v55, %v3208_v19  ;;  %v1694_v51 = vsel %vm1438_vm5, %v1566_v21, 0.0  ;;  %v1781_v47 = vsel %vm1744_vm13, %v1692_v22, 0.0  ;;  %v1567_v9 = vperm.slane %v1509_v31, 0  ;;  %v5179_v21 = vld [vmem:[#allocation13_spill] sm:$0xff] }
 0x375   :  { %v950_v57 = vpop.f32.mrf.mxu3  ;;  %v1693_v52 = vsel %vm1437_vm6, %v1565_v38, 0.0  ;;  %v1787_v56 = vsel %vm1744_vm13, %v1694_v51, 0.0  ;;  %vm1439_vm7 = vcmp.eq.s32.totalorder %v5168_v62, %v3208_v19  ;;  %vm1441_vm8 = vcmp.eq.s32.totalorder %v5169_v0, %v3208_v19  ;;  %v5181_v62 = vld [vmem:[#allocation6_spill] sm:$0xff] }
 0x376   :  { %v1510_v12 = vrot.slane %v950_v57, 1  ;;  %v1784_v48 = vsel %vm1744_vm13, %v1693_v52, 0.0  ;;  %v1568_v35 = vperm.slane %v950_v57, 0  ;;  %v1695_v46 = vsel %vm1439_vm7, %v1567_v9, 0.0 }
 0x377   :  { %v1511_v55 = vrot.slane %v950_v57, 2  ;;  %vm1440_vm9 = vcmp.eq.s32.totalorder %v5170_v4, %v3208_v19  ;;  %v1512_v23 = vrot.slane %v950_v57, 3  ;;  %v1513_v40 = vrot.slane %v950_v57, 4 }
 0x378   :  { %v1569_v33 = vperm.slane %v1510_v12, 0  ;;  %v1696_v45 = vsel %vm1440_vm9, %v1568_v35, 0.0  ;;  %v1790_v6 = vsel %vm1744_vm13, %v1695_v46, 0.0  ;;  %vm1442_vm10 = vcmp.eq.s32.totalorder %v5171_v53, %v3208_v19  ;;  %v5182_v46 = vld [vmem:[#allocation16_spill] sm:$0xff] }
 0x379   :  { %v1570_v50 = vperm.slane %v1511_v55, 0  ;;  %v1793_v34 = vsel %vm1744_vm13, %v1696_v45, 0.0  ;;  %v1571_v5 = vperm.slane %v1512_v23, 0  ;;  %v1572_v10 = vperm.slane %v1513_v40, 0  ;;  %v5184_v53 = vld [vmem:[#allocation8_spill] sm:$0xff] }
 0x37a   :  { %1764 = vadd.xlane.f32.xlu0 %v1763_v54  ;;  %v1697_v14 = vsel %vm1441_vm8, %v1569_v33, 0.0  ;;  %v1514_v3 = vrot.slane %v950_v57, 5  ;;  %vm1444_vm11 = vcmp.eq.s32.totalorder %v5172_v17, %v3208_v19  ;;  %vm1443_vm0 = vcmp.eq.s32.totalorder %v5173_v58, %v3208_v19  ;;  %v5175_v54 = vld [vmem:[#allocation4_spill] sm:$0xff] }
 0x37b   :  { %v1796_v30 = vsel %vm1744_vm13, %v1697_v14, 0.0  ;;  %v1698_v49 = vsel %vm1442_vm10, %v1570_v50, 0.0  ;;  %v1699_v8 = vsel %vm1443_vm0, %v1571_v5, 0.0  ;;  %v1700_v59 = vsel %vm1444_vm11, %v1572_v10, 0.0 }
 0x37c   :  { %1767 = vadd.xlane.f32.xlu1 %v1766_v25  ;;  %1770 = vadd.xlane.f32.xlu2 %v1769_v2  ;;  %v1515_v18 = vrot.slane %v950_v57, 6  ;;  %v1516_v36 = vrot.slane %v950_v57, 7  ;;  %v1799_v13 = vsel %vm1744_vm13, %v1698_v49, 0.0  ;;  %v1573_v60 = vperm.slane %v1514_v3, 0  ;;  %v5185_v49 = vld [vmem:[#allocation19_spill] sm:$0xff] }
 0x37d   :  { %v1802_v15 = vsel %vm1744_vm13, %v1699_v8, 0.0  ;;  %v1805_v28 = vsel %vm1744_vm13, %v1700_v59, 0.0  ;;  %vm1445_vm1 = vcmp.eq.s32.totalorder %v5174_v1, %v3208_v19  ;;  %v953_v37 = vpop.f32.mrf.mxu3  ;;  %vm1447_vm2 = vcmp.eq.s32.totalorder %v5175_v54, %v3208_v19  ;;  %v5187_v1 = vld [vmem:[#allocation10_spill] sm:$0xff] }
 0x37e   :  { %v1574_v61 = vperm.slane %v1515_v18, 0  ;;  %v1575_v29 = vperm.slane %v1516_v36, 0  ;;  %v1701_v16 = vsel %vm1445_vm1, %v1573_v60, 0.0  ;;  %vm1446_vm3 = vcmp.eq.s32.totalorder %v5176_v20, %v3208_v19 }
 0x37f   :  { %v1518_v43 = vrot.slane %v953_v37, 2  ;;  %v1517_v26 = vrot.slane %v953_v37, 1  ;;  %v1808_v44 = vsel %vm1744_vm13, %v1701_v16, 0.0  ;;  %v1576_v39 = vperm.slane %v953_v37, 0 }
 0x380   :  { %v1702_v25 = vsel %vm1446_vm3, %v1574_v61, 0.0  ;;  %v1703_v2 = vsel %vm1447_vm2, %v1575_v29, 0.0  ;;  %vm1449_vm6 = vcmp.eq.s32.totalorder %v5179_v21, %v3208_v19  ;;  %v1521_v22 = vrot.slane %v953_v37, 5 }
 0x381   :  { %v1811_v32 = vsel %vm1744_vm13, %v1702_v25, 0.0  ;;  %v1814_v11 = vsel %vm1744_vm13, %v1703_v2, 0.0  ;;  %v1578_v42 = vperm.slane %v1518_v43, 0  ;;  %v1577_v24 = vperm.slane %v1517_v26, 0 }
 0x382   :  { %1773 = vadd.xlane.f32.xlu0 %v1772_v41  ;;  %v5177_v41 = vld [vmem:[#allocation23_spill] sm:$0xff]  ;;  %v1520_v31 = vrot.slane %v953_v37, 4  ;;  %v1581_v9 = vperm.slane %v1521_v22, 0  ;;  %v1522_v33 = vrot.slane %v953_v37, 6  ;;  %vm1453_vm8 = vcmp.eq.s32.totalorder %v5181_v62, %v3208_v19 }
 0x383   :  { %vm1448_vm15 = vcmp.eq.s32.totalorder %v5177_v41, %v3208_v19  ;;  %v1705_v57 = vsel %vm1449_vm6, %v1577_v24, 0.0  ;;  %vm1452_vm9 = vcmp.eq.s32.totalorder %v5182_v46, %v3208_v19  ;;  %v1523_v4 = vrot.slane %v953_v37, 7 }
 0x384   :  { %1779 = vadd.xlane.f32.xlu2 %v1778_v27  ;;  %1776 = vadd.xlane.f32.xlu1 %v1775_v7  ;;  %v1704_v63 = vsel %vm1448_vm15, %v1576_v39, 0.0  ;;  %v1519_v27 = vrot.slane %v953_v37, 3  ;;  %v5178_v7 = vld [vmem:[#allocation5_spill] sm:$0xff]  ;;  %v1709_v55 = vsel %vm1453_vm8, %v1581_v9, 0.0  ;;  %v1582_v23 = vperm.slane %v1522_v33, 0  ;;  %v5188_v37 = vld [vmem:[#allocation22_spill] sm:$0xff] }
 0x385   :  { %vm1450_vm5 = vcmp.eq.s32.totalorder %v5178_v7, %v3208_v19  ;;  %v1817_v51 = vsel %vm1744_vm13, %v1704_v63, 0.0  ;;  %v956_v45 = vpop.f32.mrf.mxu3  ;;  %v1832_v40 = vsel %vm1744_vm13, %v1709_v55, 0.0  ;;  %v1583_v50 = vperm.slane %v1523_v4, 0  ;;  %v5190_v63 = vld [vmem:[#allocation12_spill] sm:$0xff] }
 0x386   :  { %v1706_v38 = vsel %vm1450_vm5, %v1578_v42, 0.0  ;;  %v1579_v52 = vperm.slane %v1519_v27, 0  ;;  %v1524_v10 = vrot.slane %v956_v45, 1  ;;  %vm1456_vm11 = vcmp.eq.s32.totalorder %v5184_v53, %v3208_v19  ;;  %v5191_v27 = vld [vmem:[#allocation25_spill] sm:$0xff] }
 0x387   :  { %v1823_v12 = vsel %vm1744_vm13, %v1706_v38, 0.0  ;;  %vm1455_vm0 = vcmp.eq.s32.totalorder %v5185_v49, %v3208_v19  ;;  %v1526_v58 = vrot.slane %v956_v45, 3  ;;  %v1525_v8 = vrot.slane %v956_v45, 2 }
 0x388   :  { %v1711_v3 = vsel %vm1455_vm0, %v1583_v50, 0.0  ;;  %v1585_v18 = vperm.slane %v1524_v10, 0  ;;  %v1527_v29 = vrot.slane %v956_v45, 4  ;;  %vm1459_vm2 = vcmp.eq.s32.totalorder %v5187_v1, %v3208_v19 }
 0x389   :  { %v1838_v36 = vsel %vm1744_vm13, %v1711_v3, 0.0  ;;  %v1587_v60 = vperm.slane %v1526_v58, 0  ;;  %vm1458_vm3 = vcmp.eq.s32.totalorder %v5188_v37, %v3208_v19  ;;  %v1529_v20 = vrot.slane %v956_v45, 6 }
 0x38a   :  { %1782 = vadd.xlane.f32.xlu0 %v1781_v47  ;;  %v1820_v47 = vsel %vm1744_vm13, %v1705_v57, 0.0  ;;  %v1528_v25 = vrot.slane %v956_v45, 5  ;;  %v1588_v43 = vperm.slane %v1527_v29, 0  ;;  %v1530_v41 = vrot.slane %v956_v45, 7  ;;  %v5200_v29 = vld [vmem:[#allocation34_spill] sm:$0xff] }
 0x38b   :  { %v1715_v16 = vsel %vm1459_vm2, %v1587_v60, 0.0  ;;  %v1590_v39 = vperm.slane %v1529_v20, 0  ;;  %vm1462_vm5 = vcmp.eq.s32.totalorder %v5190_v63, %v3208_v19  ;;  %vm1461_vm6 = vcmp.eq.s32.totalorder %v5191_v27, %v3208_v19  ;;  %v5202_v63 = vld [vmem:[#allocation24_spill] sm:$0xff]  ;;  %v5203_v27 = vld [vmem:[#allocation37_spill] sm:$0xff] }
 0x38c   :  { %1788 = vadd.xlane.f32.xlu2 %v1787_v56  ;;  %1785 = vadd.xlane.f32.xlu1 %v1784_v48  ;;  %v1580_v56 = vperm.slane %v1520_v31, 0  ;;  %v5180_v48 = vld [vmem:[#allocation26_spill] sm:$0xff]  ;;  %v1850_v26 = vsel %vm1744_vm13, %v1715_v16, 0.0  ;;  %v1591_v22 = vperm.slane %v1530_v41, 0 }
 0x38d   :  { %vm1451_vm7 = vcmp.eq.s32.totalorder %v5180_v48, %v3208_v19  ;;  %v959_v42 = vpop.f32.mrf.mxu3  ;;  %v1718_v7 = vsel %vm1462_vm5, %v1590_v39, 0.0  ;;  %v5193_v48 = vld [vmem:[#allocation15_spill] sm:$0xff]  ;;  %vm1474_vm5 = vcmp.eq.s32.totalorder %v5202_v63, %v3208_v19 }
 0x38e   :  { %v1707_v35 = vsel %vm1451_vm7, %v1579_v52, 0.0  ;;  %v1708_v0 = vsel %vm1452_vm9, %v1580_v56, 0.0  ;;  %v1531_v38 = vrot.slane %v959_v42, 1  ;;  %v1859_v31 = vsel %vm1744_vm13, %v1718_v7, 0.0 }
 0x38f   :  { %v1826_v14 = vsel %vm1744_vm13, %v1707_v35, 0.0  ;;  %v1592_v52 = vperm.slane %v959_v42, 0  ;;  %v1532_v56 = vrot.slane %v959_v42, 2  ;;  %vm1465_vm8 = vcmp.eq.s32.totalorder %v5193_v48, %v3208_v19  ;;  %v5194_v35 = vld [vmem:[#allocation28_spill] sm:$0xff]  ;;  %v5204_v48 = vld [vmem:[#allocation50_spill] sm:$0xff] }
 0x390   :  { %vm1464_vm9 = vcmp.eq.s32.totalorder %v5194_v35, %v3208_v19  ;;  %v1533_v46 = vrot.slane %v959_v42, 3  ;;  %v1534_v55 = vrot.slane %v959_v42, 4  ;;  %v1536_v49 = vrot.slane %v959_v42, 6 }
 0x391   :  { %v1720_v33 = vsel %vm1464_vm9, %v1592_v52, 0.0  ;;  %v1594_v4 = vperm.slane %v1532_v56, 0  ;;  %v1537_v3 = vrot.slane %v959_v42, 7 }
 0x392   :  { %1791 = vadd.xlane.f32.xlu0 %v1790_v6  ;;  %v1829_v6 = vsel %vm1744_vm13, %v1708_v0, 0.0 }
 0x394   :  { %1794 = vadd.xlane.f32.xlu1 %v1793_v34  ;;  %1797 = vadd.xlane.f32.xlu2 %v1796_v30  ;;  %v1584_v34 = vperm.slane %v956_v45, 0  ;;  %v5183_v30 = vld [vmem:[#allocation29_spill] sm:$0xff]  ;;  %v1865_v45 = vsel %vm1744_vm13, %v1720_v33, 0.0 }
 0x395   :  { %vm1454_vm10 = vcmp.eq.s32.totalorder %v5183_v30, %v3208_v19  ;;  %v5196_v30 = vld [vmem:[#allocation18_spill] sm:$0xff]  ;;  %v962_v60 = vpop.f32.mrf.mxu3 }
 0x396   :  { %v1710_v5 = vsel %vm1454_vm10, %v1582_v23, 0.0  ;;  %v1712_v17 = vsel %vm1456_vm11, %v1584_v34, 0.0  ;;  %v1595_v23 = vperm.slane %v1533_v46, 0  ;;  %v1535_v34 = vrot.slane %v959_v42, 5  ;;  %v5205_v46 = vld [vmem:[#allocation27_spill] sm:$0xff] }
 0x397   :  { %v1835_v59 = vsel %vm1744_vm13, %v1710_v5, 0.0  ;;  %vm1468_vm11 = vcmp.eq.s32.totalorder %v5196_v30, %v3208_v19  ;;  %v5197_v5 = vld [vmem:[#allocation31_spill] sm:$0xff]  ;;  %v1539_v20 = vrot.slane %v962_v60, 2  ;;  %v1540_v41 = vrot.slane %v962_v60, 3 }
 0x398   :  { %vm1467_vm0 = vcmp.eq.s32.totalorder %v5197_v5, %v3208_v19  ;;  %v1597_v58 = vperm.slane %v1535_v34, 0 }
 0x399   :  { %v1723_v10 = vsel %vm1467_vm0, %v1595_v23, 0.0  ;;  %v1602_v39 = vperm.slane %v1539_v20, 0  ;;  %v1603_v52 = vperm.slane %v1540_v41, 0  ;;  %v1544_v23 = vrot.slane %v962_v60, 7 }
 0x39a   :  { %1800 = vadd.xlane.f32.xlu0 %v1799_v13  ;;  %v1841_v13 = vsel %vm1744_vm13, %v1712_v17, 0.0 }
 0x39b   :  { %v1607_v5 = vperm.slane %v1544_v23, 0 }
 0x39c   :  { %1803 = vadd.xlane.f32.xlu1 %v1802_v15  ;;  %1806 = vadd.xlane.f32.xlu2 %v1805_v28  ;;  %v1586_v15 = vperm.slane %v1525_v8, 0  ;;  %v5186_v28 = vld [vmem:[#allocation32_spill] sm:$0xff]  ;;  %v1874_v8 = vsel %vm1744_vm13, %v1723_v10, 0.0 }
 0x39d   :  { %vm1457_vm1 = vcmp.eq.s32.totalorder %v5186_v28, %v3208_v19 }
 0x39e   :  { %v1713_v61 = vsel %vm1457_vm1, %v1585_v18, 0.0  ;;  %v1714_v54 = vsel %vm1458_vm3, %v1586_v15, 0.0  ;;  %v1598_v18 = vperm.slane %v1536_v49, 0  ;;  %vm1470_vm3 = vcmp.eq.s32.totalorder %v5200_v29, %v3208_v19 }
 0x39f   :  { %v1844_v2 = vsel %vm1744_vm13, %v1713_v61, 0.0  ;;  %v5199_v61 = vld [vmem:[#allocation21_spill] sm:$0xff] }
 0x3a0   :  { %vm1471_vm2 = vcmp.eq.s32.totalorder %v5199_v61, %v3208_v19  ;;  %v1726_v16 = vsel %vm1470_vm3, %v1598_v18, 0.0 }
 0x3a2   :  { %1809 = vadd.xlane.f32.xlu0 %v1808_v44  ;;  %v1847_v44 = vsel %vm1744_vm13, %v1714_v54, 0.0 }
 0x3a4   :  { %1812 = vadd.xlane.f32.xlu1 %v1811_v32  ;;  %1815 = vadd.xlane.f32.xlu2 %v1814_v11  ;;  %v1589_v32 = vperm.slane %v1528_v25, 0  ;;  %v5189_v11 = vld [vmem:[#allocation35_spill] sm:$0xff]  ;;  %v1538_v25 = vrot.slane %v962_v60, 1 }
 0x3a5   :  { %vm1460_vm15 = vcmp.eq.s32.totalorder %v5189_v11, %v3208_v19  ;;  %v5201_v11 = vld [vmem:[#allocation47_spill] sm:$0xff] }
 0x3a6   :  { %v1716_v24 = vsel %vm1460_vm15, %v1588_v43, 0.0  ;;  %v1717_v21 = vsel %vm1461_vm6, %v1589_v32, 0.0  ;;  %v1600_v43 = vperm.slane %v962_v60, 0  ;;  %v1601_v32 = vperm.slane %v1538_v25, 0 }
 0x3a7   :  { %v1853_v57 = vsel %vm1744_vm13, %v1716_v24, 0.0  ;;  %vm1472_vm15 = vcmp.eq.s32.totalorder %v5201_v11, %v3208_v19  ;;  %vm1473_vm6 = vcmp.eq.s32.totalorder %v5203_v27, %v3208_v19  ;;  %v5212_v11 = vld [vmem:[#allocation33_spill] sm:$0xff] }
 0x3a8   :  { %v1728_v24 = vsel %vm1472_vm15, %v1600_v43, 0.0 }
 0x3aa   :  { %1818 = vadd.xlane.f32.xlu0 %v1817_v51  ;;  %v1856_v51 = vsel %vm1744_vm13, %v1717_v21, 0.0 }
 0x3ac   :  { %1824 = vadd.xlane.f32.xlu2 %v1823_v12  ;;  %1821 = vadd.xlane.f32.xlu1 %v1820_v47  ;;  %v1593_v12 = vperm.slane %v1531_v38, 0  ;;  %v5192_v47 = vld [vmem:[#allocation39_spill] sm:$0xff]  ;;  %v1730_v38 = vsel %vm1474_vm5, %v1602_v39, 0.0 }
 0x3ad   :  { %vm1463_vm7 = vcmp.eq.s32.totalorder %v5192_v47, %v3208_v19 }
 0x3ae   :  { %v1719_v9 = vsel %vm1463_vm7, %v1591_v22, 0.0  ;;  %v1721_v62 = vsel %vm1465_vm8, %v1593_v12, 0.0  ;;  %v1542_v22 = vrot.slane %v962_v60, 5  ;;  %v1895_v12 = vsel %vm1744_vm13, %v1730_v38, 0.0 }
 0x3af   :  { %v1862_v0 = vsel %vm1744_vm13, %v1719_v9, 0.0  ;;  %vm1475_vm7 = vcmp.eq.s32.totalorder %v5204_v48, %v3208_v19  ;;  %vm1477_vm8 = vcmp.eq.s32.totalorder %v5205_v46, %v3208_v19  ;;  %v5214_v48 = vld [vmem:[#allocation54_spill] sm:$0xff] }
 0x3b0   :  { %v1605_v9 = vperm.slane %v1542_v22, 0  ;;  %v1731_v33 = vsel %vm1475_vm7, %v1603_v52, 0.0  ;;  %vm1484_vm15 = vcmp.eq.s32.totalorder %v5214_v48, %v3208_v19 }
 0x3b2   :  { %1827 = vadd.xlane.f32.xlu0 %v1826_v14  ;;  %v1868_v14 = vsel %vm1744_vm13, %v1721_v62, 0.0  ;;  %v1543_v62 = vrot.slane %v962_v60, 6 }
 0x3b4   :  { %1833 = vadd.xlane.f32.xlu2 %v1832_v40  ;;  %1830 = vadd.xlane.f32.xlu1 %v1829_v6  ;;  %v1596_v40 = vperm.slane %v1534_v55, 0  ;;  %v5195_v6 = vld [vmem:[#allocation42_spill] sm:$0xff]  ;;  %v5206_v55 = vld [vmem:[#allocation40_spill] sm:$0xff] }
 0x3b5   :  { %vm1466_vm10 = vcmp.eq.s32.totalorder %v5195_v6, %v3208_v19  ;;  %vm1476_vm9 = vcmp.eq.s32.totalorder %v5206_v55, %v3208_v19  ;;  %v1898_v6 = vsel %vm1744_vm13, %v1731_v33, 0.0 }
 0x3b6   :  { %v1722_v50 = vsel %vm1466_vm10, %v1594_v4, 0.0  ;;  %v1724_v53 = vsel %vm1468_vm11, %v1596_v40, 0.0  ;;  %v4503_v40 = vpop.f32.mrf.mxu3 }
 0x3b7   :  { %v1871_v17 = vsel %vm1744_vm13, %v1722_v50, 0.0  ;;  %v1606_v50 = vperm.slane %v1543_v62, 0  ;;  %v1608_v10 = vperm.slane %v4503_v40, 0  ;;  %v1546_v61 = vrot.slane %v4503_v40, 2 }
 0x3b8   :  { %v1549_v22 = vrot.slane %v4503_v40, 5  ;;  %v1551_v55 = vrot.slane %v4503_v40, 7 }
 0x3ba   :  { %1836 = vadd.xlane.f32.xlu0 %v1835_v59  ;;  %v1877_v59 = vsel %vm1744_vm13, %v1724_v53, 0.0  ;;  %v5207_v53 = vld [vmem:[#allocation51_spill] sm:$0xff] }
 0x3bb   :  { %vm1478_vm10 = vcmp.eq.s32.totalorder %v5207_v53, %v3208_v19  ;;  %v1615_v53 = vperm.slane %v1551_v55, 0 }
 0x3bc   :  { %1839 = vadd.xlane.f32.xlu1 %v1838_v36  ;;  %1842 = vadd.xlane.f32.xlu2 %v1841_v13  ;;  %v1599_v36 = vperm.slane %v1537_v3, 0  ;;  %v5198_v13 = vld [vmem:[#allocation45_spill] sm:$0xff]  ;;  %v1734_v3 = vsel %vm1478_vm10, %v1606_v50, 0.0 }
 0x3bd   :  { %vm1469_vm1 = vcmp.eq.s32.totalorder %v5198_v13, %v3208_v19  ;;  %v1907_v29 = vsel %vm1744_vm13, %v1734_v3, 0.0 }
 0x3be   :  { %v1725_v28 = vsel %vm1469_vm1, %v1597_v58, 0.0  ;;  %v1727_v54 = vsel %vm1471_vm2, %v1599_v36, 0.0  ;;  %v5208_v58 = vld [vmem:[#allocation30_spill] sm:$0xff]  ;;  %vm1483_vm2 = vcmp.eq.s32.totalorder %v5212_v11, %v3208_v19 }
 0x3bf   :  { %vm1480_vm11 = vcmp.eq.s32.totalorder %v5208_v58, %v3208_v19 }
 0x3c2   :  { %1845 = vadd.xlane.f32.xlu0 %v1844_v2  ;;  %v1880_v2 = vsel %vm1744_vm13, %v1725_v28, 0.0  ;;  %v1547_v28 = vrot.slane %v4503_v40, 3 }
 0x3c4   :  { %1851 = vadd.xlane.f32.xlu2 %v1850_v26  ;;  %1848 = vadd.xlane.f32.xlu1 %v1847_v44  ;;  %v1883_v26 = vsel %vm1744_vm13, %v1726_v16, 0.0  ;;  %v1886_v44 = vsel %vm1744_vm13, %v1727_v54, 0.0  ;;  %v1611_v25 = vperm.slane %v1547_v28, 0 }
 0x3c6   :  { %v1739_v27 = vsel %vm1483_vm2, %v1611_v25, 0.0 }
 0x3ca   :  { %1854 = vadd.xlane.f32.xlu0 %v1853_v57  ;;  %v1729_v57 = vsel %vm1473_vm6, %v1601_v32, 0.0  ;;  %v1548_v32 = vrot.slane %v4503_v40, 4 }
 0x3cb   :  { %v1892_v47 = vsel %vm1744_vm13, %v1729_v57, 0.0  ;;  %v1550_v57 = vrot.slane %v4503_v40, 6 }
 0x3cc   :  { %1860 = vadd.xlane.f32.xlu2 %v1859_v31  ;;  %1857 = vadd.xlane.f32.xlu1 %v1856_v51  ;;  %v1541_v31 = vrot.slane %v962_v60, 4  ;;  %v1889_v51 = vsel %vm1744_vm13, %v1728_v24, 0.0  ;;  %v1736_v60 = vsel %vm1480_vm11, %v1608_v10, 0.0  ;;  %v5213_v24 = vld [vmem:[#allocation46_spill] sm:$0xff]  ;;  %v1612_v52 = vperm.slane %v1548_v32, 0  ;;  %v5217_v10 = vld [vmem:[#allocation59_spill] sm:$0xff] }
 0x3cd   :  { %v1913_v20 = vsel %vm1744_vm13, %v1736_v60, 0.0  ;;  %vm1482_vm3 = vcmp.eq.s32.totalorder %v5213_v24, %v3208_v19  ;;  %vm1977_vm11 = vweird.f32 %v5217_v10 }
 0x3ce   :  { %v1604_v56 = vperm.slane %v1541_v31, 0  ;;  %v1740_v46 = vsel %vm1484_vm15, %v1612_v52, 0.0  ;;  %v5219_v52 = vld [vmem:[#allocation63_spill] sm:$0xff] }
 0x3cf   :  { %vm1987_vm2 = vweird.f32 %v5219_v52 }
 0x3d2   :  { %1863 = vadd.xlane.f32.xlu0 %v1862_v0 }
 0x3d4   :  { %1866 = vadd.xlane.f32.xlu1 %v1865_v45  ;;  %1869 = vadd.xlane.f32.xlu2 %v1868_v14  ;;  %v1733_v45 = vsel %vm1477_vm8, %v1605_v9, 0.0  ;;  %v1732_v14 = vsel %vm1476_vm9, %v1604_v56, 0.0  ;;  %v1614_v9 = vperm.slane %v1550_v57, 0  ;;  %v1613_v56 = vperm.slane %v1549_v22, 0 }
 0x3d5   :  { %v1904_v34 = vsel %vm1744_vm13, %v1733_v45, 0.0  ;;  %v1901_v30 = vsel %vm1744_vm13, %v1732_v14, 0.0  ;;  %v5215_v45 = vld [vmem:[#allocation36_spill] sm:$0xff] }
 0x3d6   :  { %vm1486_vm5 = vcmp.eq.s32.totalorder %v5215_v45, %v3208_v19  ;;  %v5216_v14 = vld [vmem:[#allocation48_spill] sm:$0xff] }
 0x3d7   :  { %vm1485_vm6 = vcmp.eq.s32.totalorder %v5216_v14, %v3208_v19  ;;  %v1742_v50 = vsel %vm1486_vm5, %v1614_v9, 0.0 }
 0x3da   :  { %1872 = vadd.xlane.f32.xlu0 %v1871_v17  ;;  %v1545_v17 = vrot.slane %v4503_v40, 1  ;;  %v1931_v40 = vsel %vm1744_vm13, %v1742_v50, 0.0 }
 0x3dc   :  { %1875 = vadd.xlane.f32.xlu1 %v1874_v8  ;;  %1878 = vadd.xlane.f32.xlu2 %v1877_v59  ;;  %v5209_v8 = vld [vmem:[#allocation43_spill] sm:$0xff]  ;;  %v5210_v59 = vld [vmem:[#allocation61_spill] sm:$0xff]  ;;  %v1609_v16 = vperm.slane %v1545_v17, 0 }
 0x3dd   :  { %v4463_v15 = vpop.xlane.xlu0 %1746  ;;  %vm1479_vm0 = vcmp.eq.s32.totalorder %v5209_v8, %v3208_v19  ;;  %2892 = vrsqrt.f32 %v5210_v59  ;;  %v5218_v17 = vld [vmem:[#allocation55_spill] sm:$0xff]  ;;  %vm1967_vm9 = vweird.f32 %v5210_v59 }
 0x3de   :  { %v1735_v13 = vsel %vm1479_vm0, %v1607_v5, 0.0  ;;  %v1925_v5 = vsel %vm1744_vm13, %v1740_v46, 0.0  ;;  %2894 = vrsqrt.f32 %v5217_v10  ;;  %vm1487_vm7 = vcmp.eq.s32.totalorder %v5218_v17, %v3208_v19 }
 0x3df   :  { %v4469_v1 = vpop.xlane.xlu2 %1752  ;;  %v4471_v37 = vpop.xlane.xlu1 %1749  ;;  %v1910_v54 = vsel %vm1744_vm13, %v1735_v13, 0.0  ;;  %v1743_v13 = vsel %vm1487_vm7, %v1615_v53, 0.0  ;;  %2896 = vrsqrt.f32 %v5219_v52 }
 0x3e2   :  { %1881 = vadd.xlane.f32.xlu0 %v1880_v2  ;;  %v1610_v2 = vperm.slane %v1546_v61, 0 }
 0x3e3   :  { %v2893_v43 = vpop.eup %2892 }
 0x3e4   :  { %1884 = vadd.xlane.f32.xlu1 %v1883_v26  ;;  %1887 = vadd.xlane.f32.xlu2 %v1886_v44  ;;  %v5211_v26 = vld [vmem:[#allocation53_spill] sm:$0xff]  ;;  %v1738_v38 = vsel %vm1482_vm3, %v1610_v2, 0.0  ;;  %v1962_v31 = vmul.f32 %v2893_v43, %v5210_v59  ;;  %v2895_v61 = vpop.eup %2894  ;;  %vm1968_vm8 = vweird.f32 %v2893_v43 }
 0x3e5   :  { %v4478_v42 = vpop.xlane.xlu0 %1755  ;;  %vm1481_vm1 = vcmp.eq.s32.totalorder %v5211_v26, %v3208_v19  ;;  %vm1969_vm10 = vmor %vm1967_vm9, %vm1968_vm8 }
 0x3e6   :  { %v1737_v39 = vsel %vm1481_vm1, %v1609_v16, 0.0  ;;  %v1963_v33 = vmul.f32 %v2893_v43, %v1962_v31  ;;  %v1934_v16 = vsel %vm1744_vm13, %v1743_v13, 0.0 }
 0x3e7   :  { %v4484_v7 = vpop.xlane.xlu2 %1761  ;;  %v4486_v21 = vpop.xlane.xlu1 %1758 }
 0x3ea   :  { %1890 = vadd.xlane.f32.xlu0 %v1889_v51  ;;  %v1916_v51 = vsel %vm1744_vm13, %v1737_v39, 0.0 }
 0x3ec   :  { %1896 = vadd.xlane.f32.xlu2 %v1895_v12  ;;  %1893 = vadd.xlane.f32.xlu1 %v1892_v47  ;;  %v1922_v12 = vsel %vm1744_vm13, %v1739_v27, 0.0  ;;  %v1919_v47 = vsel %vm1744_vm13, %v1738_v38, 0.0 }
 0x3ed   :  { %v4493_v35 = vpop.xlane.xlu0 %1764 }
 0x3ef   :  { %v4499_v0 = vpop.xlane.xlu1 %1767  ;;  %v4501_v4 = vpop.xlane.xlu2 %1770 }
 0x3f2   :  { %1899 = vadd.xlane.f32.xlu0 %v1898_v6 }
 0x3f4   :  { %1905 = vadd.xlane.f32.xlu2 %v1904_v34  ;;  %1902 = vadd.xlane.f32.xlu1 %v1901_v30  ;;  %v1741_v34 = vsel %vm1485_vm6, %v1613_v56, 0.0  ;;  %v1964_v30 = vmul.f32 0.5, %v1963_v33 }
 0x3f5   :  { %v4511_v49 = vpop.xlane.xlu0 %1773  ;;  %v1928_v3 = vsel %vm1744_vm13, %v1741_v34, 0.0  ;;  %vm1978_vm13 = vweird.f32 %v2895_v61 }
 0x3f6   :  { %v1965_v58 = vsub.f32 1.5, %v1964_v30  ;;  %vm1979_vm0 = vmor %vm1977_vm11, %vm1978_vm13 }
 0x3f7   :  { %v4519_v18 = vpop.xlane.xlu2 %1779  ;;  %v4521_v36 = vpop.xlane.xlu1 %1776 }
 0x3fa   :  { %1908 = vadd.xlane.f32.xlu0 %v1907_v29  ;;  %v1966_v29 = vmul.f32 %v2893_v43, %v1965_v58 }
 0x3fc   :  { %1911 = vadd.xlane.f32.xlu1 %v1910_v54  ;;  %1914 = vadd.xlane.f32.xlu2 %v1913_v20  ;;  %v1972_v54 = vmul.f32 %v2895_v61, %v5217_v10  ;;  %v1970_v20 = vsel %vm1969_vm10, %v2893_v43, %v1966_v29 }
 0x3fd   :  { %v4530_v44 = vpop.xlane.xlu0 %1782  ;;  %v2041_v32 = vmin.f32 %v1970_v20, 1e+08 }
 0x3fe   :  { %v1973_v2 = vmul.f32 %v2895_v61, %v1972_v54 }
 0x3ff   :  { %v4537_v41 = vpop.xlane.xlu2 %1788  ;;  %v4539_v63 = vpop.xlane.xlu1 %1785  ;;  %v2058_v24 = vperm.slane %v2041_v32, 1  ;;  %v2057_v27 = vperm.slane %v2041_v32, 0  ;;  %v2059_v57 = vperm.slane %v2041_v32, 2  ;;  %v2061_v33 = vperm.slane %v2041_v32, 4 }
 0x400   :  { %v1974_v11 = vmul.f32 0.5, %v1973_v2  ;;  %v2062_v55 = vperm.slane %v2041_v32, 5  ;;  %v2064_v17 = vperm.slane %v2041_v32, 7  ;;  %v2063_v58 = vperm.slane %v2041_v32, 6 }
 0x401   :  { %v2186_v59 = vmul.f32 %v2058_v24, %v4471_v37  ;;  %v2185_v31 = vmul.f32 %v2057_v27, %v4463_v15  ;;  %v2060_v37 = vperm.slane %v2041_v32, 3  ;;  %v4594_v15 = vpop.eup %2896  ;;  %v2189_v45 = vmul.f32 %v2061_v33, %v4486_v21 }
 0x402   :  { %1917 = vadd.xlane.f32.xlu0 %v1916_v51  ;;  %v1975_v22 = vsub.f32 1.5, %v1974_v11  ;;  %v2190_v30 = vmul.f32 %v2062_v55, %v4484_v7  ;;  %v2192_v13 = vmul.f32 %v2064_v17, %v4499_v0  ;;  %vm1988_vm1 = vweird.f32 %v4594_v15 }
 0x403   :  { %v2249_v56 = vmul.f32 10.0, %v2185_v31  ;;  %v2188_v14 = vmul.f32 %v2060_v37, %v4478_v42  ;;  %v2253_v53 = vmul.f32 10.0, %v2189_v45  ;;  %vm1989_vm3 = vmor %vm1987_vm2, %vm1988_vm1 }
 0x404   :  { %1923 = vadd.xlane.f32.xlu2 %v1922_v12  ;;  %1920 = vadd.xlane.f32.xlu1 %v1919_v47  ;;  %v2187_v12 = vmul.f32 %v2059_v57, %v4469_v1  ;;  %v2250_v47 = vmul.f32 10.0, %v2186_v59  ;;  %v1976_v9 = vmul.f32 %v2895_v61, %v1975_v22  ;;  %v2256_v2 = vmul.f32 10.0, %v2192_v13 }
 0x405   :  { %v4549_v62 = vpop.xlane.xlu0 %1791 }
 0x406   :  { %v2251_v48 = vmul.f32 10.0, %v2187_v12  ;;  %v1980_v1 = vsel %vm1979_vm0, %v2895_v61, %v1976_v9  ;;  %v2191_v61 = vmul.f32 %v2063_v58, %v4493_v35  ;;  %v5220_v12 = vld [vmem:[#allocation64_spill] sm:$0xff] }
 0x407   :  { %v4556_v23 = vpop.xlane.xlu1 %1794  ;;  %v4558_v6 = vpop.xlane.xlu2 %1797  ;;  %v4605_v10 = vmin.f32 %v1980_v1, 1e+08  ;;  %2898 = vrsqrt.f32 %v5220_v12  ;;  %vm1997_vm5 = vweird.f32 %v5220_v12 }
 0x408   :  { %v2255_v11 = vmul.f32 10.0, %v2191_v61 }
 0x409   :  { %v2065_v7 = vperm.slane %v4605_v10, 0  ;;  %v2067_v24 = vperm.slane %v4605_v10, 2  ;;  %v2066_v0 = vperm.slane %v4605_v10, 1  ;;  %v2068_v35 = vperm.slane %v4605_v10, 3 }
 0x40a   :  { %1926 = vadd.xlane.f32.xlu0 %v1925_v5  ;;  %v1982_v5 = vmul.f32 %v4594_v15, %v5219_v52  ;;  %v2069_v37 = vperm.slane %v4605_v10, 4  ;;  %v2071_v45 = vperm.slane %v4605_v10, 6  ;;  %v2072_v58 = vperm.slane %v4605_v10, 7 }
 0x40b   :  { %v2193_v54 = vmul.f32 %v2065_v7, %v4501_v4  ;;  %v2195_v59 = vmul.f32 %v2067_v24, %v4521_v36  ;;  %v2194_v4 = vmul.f32 %v2066_v0, %v4511_v49  ;;  %v2070_v49 = vperm.slane %v4605_v10, 5 }
 0x40c   :  { %1932 = vadd.xlane.f32.xlu2 %v1931_v40  ;;  %1929 = vadd.xlane.f32.xlu1 %v1928_v3  ;;  %v2252_v40 = vmul.f32 10.0, %v2188_v14  ;;  %v2254_v3 = vmul.f32 10.0, %v2190_v30  ;;  %v1983_v21 = vmul.f32 %v4594_v15, %v1982_v5  ;;  %v2197_v52 = vmul.f32 %v2069_v37, %v4530_v44 }
 0x40d   :  { %v4566_v8 = vpop.xlane.xlu0 %1800  ;;  %v2257_v32 = vmul.f32 10.0, %v2193_v54  ;;  %v2198_v1 = vmul.f32 %v2070_v49, %v4539_v63 }
 0x40e   :  { %v1984_v20 = vmul.f32 0.5, %v1983_v21 }
 0x40f   :  { %v4568_v60 = vpop.xlane.xlu1 %1803  ;;  %v4570_v28 = vpop.xlane.xlu2 %1806 }
 0x410   :  { %v1985_v27 = vsub.f32 1.5, %v1984_v20 }
 0x412   :  { %1935 = vadd.xlane.f32.xlu0 %v1934_v16  ;;  %v1986_v9 = vmul.f32 %v4594_v15, %v1985_v27 }
 0x414   :  { %v1990_v33 = vsel %vm1989_vm3, %v4594_v15, %v1986_v9  ;;  %v2199_v15 = vmul.f32 %v2071_v45, %v4537_v41  ;;  %v2200_v41 = vmul.f32 %v2072_v58, %v4549_v62  ;;  %vm2674_vm3 = vcmask 1041409  }
 0x415   :  { %v4575_v25 = vpop.xlane.xlu0 %1809  ;;  %v2043_v5 = vmin.f32 %v1990_v33, 1e+08 }
 0x416   :  { %v2263_v17 = vmul.f32 10.0, %v2199_v15  ;;  %v2264_v10 = vmul.f32 10.0, %v2200_v41 }
 0x417   :  { %v4577_v26 = vpop.xlane.xlu1 %1812  ;;  %v4579_v39 = vpop.xlane.xlu2 %1815  ;;  %v2073_v21 = vperm.slane %v2043_v5, 0  ;;  %v2074_v7 = vperm.slane %v2043_v5, 1  ;;  %v2076_v27 = vperm.slane %v2043_v5, 3  ;;  %v2079_v33 = vperm.slane %v2043_v5, 6 }
 0x419   :  { %v2201_v13 = vmul.f32 %v2073_v21, %v4556_v23  ;;  %v2202_v54 = vmul.f32 %v2074_v7, %v4558_v6  ;;  %v2075_v23 = vperm.slane %v2043_v5, 2  ;;  %v2204_v62 = vmul.f32 %v2076_v27, %v4568_v60 }
 0x41b   :  { %v2266_v24 = vmul.f32 10.0, %v2202_v54  ;;  %v2203_v6 = vmul.f32 %v2075_v23, %v4566_v8 }
 0x41d   :  { %v4581_v38 = vpop.xlane.xlu0 %1818 }
 0x41f   :  { %v4585_v43 = vpop.xlane.xlu2 %1824  ;;  %v4587_v51 = vpop.xlane.xlu1 %1821 }
 0x424   :  { %2422 = vperm.xlu2 %2872, %v2250_v47   ;;  %v2196_v47 = vmul.f32 %v2068_v35, %v4519_v18  ;;  %v4639_v18 = vpop.eup %2898 }
 0x425   :  { %v4592_v46 = vpop.xlane.xlu0 %1827  ;;  %2419 = vperm.xlu1 %2871, %v2249_v56   ;;  %v2259_v56 = vmul.f32 10.0, %v2195_v59  ;;  %v2077_v59 = vperm.slane %v2043_v5, 4  ;;  %vm1998_vm15 = vweird.f32 %v4639_v18 }
 0x426   :  { %2425 = vperm.xlu0 %2870, %v2251_v48   ;;  %v2258_v48 = vmul.f32 10.0, %v2194_v4  ;;  %v2260_v36 = vmul.f32 10.0, %v2196_v47  ;;  %vm1999_vm6 = vmor %vm1997_vm5, %vm1998_vm15  ;;  %vm2676_vm15 = vcmask 1042434   ;;  %vm2678_vm5 = vcmask 1043459  }
 0x427   :  { %v4598_v50 = vpop.xlane.xlu2 %1833  ;;  %v4600_v34 = vpop.xlane.xlu1 %1830  ;;  %v2205_v9 = vmul.f32 %v2077_v59, %v4570_v28  ;;  %v2078_v28 = vperm.slane %v2043_v5, 5 }
 0x429   :  { %v2269_v8 = vmul.f32 10.0, %v2205_v9  ;;  %v2206_v15 = vmul.f32 %v2078_v28, %v4575_v25 }
 0x42c   :  { %2431 = vperm.xlu2 %2872, %v2253_v53   ;;  %v1992_v53 = vmul.f32 %v4639_v18, %v5220_v12 }
 0x42d   :  { %v4608_v42 = vpop.xlane.xlu0 %1836  ;;  %2428 = vperm.xlu1 %2871, %v2252_v40   ;;  %v2262_v40 = vmul.f32 10.0, %v2198_v1  ;;  %v2207_v1 = vmul.f32 %v2079_v33, %v4577_v26 }
 0x42e   :  { %2434 = vperm.xlu0 %2870, %v2254_v3   ;;  %v2261_v3 = vmul.f32 10.0, %v2197_v52  ;;  %v1993_v63 = vmul.f32 %v4639_v18, %v1992_v53  ;;  %v2080_v52 = vperm.slane %v2043_v5, 7 }
 0x42f   :  { %v4613_v29 = vpop.xlane.xlu1 %1839  ;;  %v4615_v16 = vpop.xlane.xlu2 %1842 }
 0x430   :  { %v1994_v20 = vmul.f32 0.5, %v1993_v63 }
 0x432   :  { %v1995_v0 = vsub.f32 1.5, %v1994_v20  ;;  %v5222_v20 = vld [vmem:[#allocation65_spill] sm:$0xff] }
 0x433   :  { %vm2017_vm13 = vweird.f32 %v5222_v20 }
 0x434   :  { %2440 = vperm.xlu2 %2872, %v2256_v2  }
 0x435   :  { %v4620_v57 = vpop.xlane.xlu0 %1845  ;;  %2437 = vperm.xlu1 %2871, %v2255_v11   ;;  %v5221_v11 = vld [vmem:[#allocation60_spill] sm:$0xff] }
 0x436   :  { %2443 = vperm.xlu0 %2870, %v2257_v32   ;;  %2900 = vrsqrt.f32 %v5221_v11  ;;  %v2265_v32 = vmul.f32 10.0, %v2201_v13  ;;  %vm2007_vm8 = vweird.f32 %v5221_v11 }
 0x437   :  { %v4625_v22 = vpop.xlane.xlu2 %1851  ;;  %v4627_v31 = vpop.xlane.xlu1 %1848  ;;  %2902 = vrsqrt.f32 %v5222_v20 }
 0x43c   :  { %2449 = vperm.xlu2 %2872, %v2259_v56   ;;  %v4669_v47 = vpop.eup %2900  ;;  %v1996_v56 = vmul.f32 %v4639_v18, %v1995_v0 }
 0x43d   :  { %v4637_v55 = vpop.xlane.xlu0 %1854  ;;  %2446 = vperm.xlu1 %2871, %v2258_v48   ;;  %v2268_v48 = vmul.f32 10.0, %v2204_v62  ;;  %v2002_v60 = vmul.f32 %v4669_v47, %v5221_v11  ;;  %vm2008_vm7 = vweird.f32 %v4669_v47 }
 0x43e   :  { %2452 = vperm.xlu0 %2870, %v2260_v36   ;;  %v2267_v36 = vmul.f32 10.0, %v2203_v6  ;;  %v2000_v37 = vsel %vm1999_vm6, %v4639_v18, %v1996_v56  ;;  %v2270_v18 = vmul.f32 10.0, %v2206_v15  ;;  %vm2009_vm9 = vmor %vm2007_vm8, %vm2008_vm7  ;;  %vm2680_vm7 = vcmask 1044484  }
 0x43f   :  { %v4644_v14 = vpop.xlane.xlu2 %1860  ;;  %v4646_v30 = vpop.xlane.xlu1 %1857  ;;  %v2003_v12 = vmul.f32 %v4669_v47, %v2002_v60 }
 0x441   :  { %v2004_v21 = vmul.f32 0.5, %v2003_v12 }
 0x443   :  { %v2005_v25 = vsub.f32 1.5, %v2004_v21 }
 0x444   :  { %2458 = vperm.xlu2 %2872, %v2262_v40   ;;  %v2044_v40 = vmin.f32 %v2000_v37, 1e+08 }
 0x445   :  { %v4653_v44 = vpop.xlane.xlu0 %1863  ;;  %2455 = vperm.xlu1 %2871, %v2261_v3   ;;  %v2208_v3 = vmul.f32 %v2080_v52, %v4579_v39 }
 0x446   :  { %2461 = vperm.xlu0 %2870, %v2263_v17   ;;  %v2271_v17 = vmul.f32 10.0, %v2207_v1  ;;  %v2082_v58 = vperm.slane %v2044_v40, 1  ;;  %v2081_v13 = vperm.slane %v2044_v40, 0  ;;  %v2083_v26 = vperm.slane %v2044_v40, 2 }
 0x447   :  { %v4657_v61 = vpop.xlane.xlu2 %1869  ;;  %v4660_v2 = vpop.xlane.xlu1 %1866  ;;  %v2272_v63 = vmul.f32 10.0, %v2208_v3  ;;  %v2084_v23 = vperm.slane %v2044_v40, 3  ;;  %v2086_v62 = vperm.slane %v2044_v40, 5  ;;  %v2088_v37 = vperm.slane %v2044_v40, 7 }
 0x448   :  { %v2210_v5 = vmul.f32 %v2082_v58, %v4587_v51  ;;  %v2209_v54 = vmul.f32 %v2081_v13, %v4581_v38  ;;  %v2085_v51 = vperm.slane %v2044_v40, 4  ;;  %v4701_v38 = vpop.eup %2902 }
 0x449   :  { %v2212_v6 = vmul.f32 %v2084_v23, %v4592_v46  ;;  %v2012_v60 = vmul.f32 %v4701_v38, %v5222_v20  ;;  %v2216_v28 = vmul.f32 %v2088_v37, %v4613_v29  ;;  %vm2018_vm10 = vweird.f32 %v4701_v38 }
 0x44a   :  { %v2273_v27 = vmul.f32 10.0, %v2209_v54  ;;  %v2213_v59 = vmul.f32 %v2085_v51, %v4600_v34  ;;  %vm2019_vm11 = vmor %vm2017_vm13, %vm2018_vm10  ;;  %vm2682_vm10 = vcmask 1045509   ;;  %vm2684_vm13 = vcmask 1046534  }
 0x44b   :  { %v2276_v34 = vmul.f32 10.0, %v2212_v6  ;;  %v2013_v46 = vmul.f32 %v4701_v38, %v2012_v60 }
 0x44c   :  { %2467 = vperm.xlu2 %2872, %v2265_v32   ;;  %v2211_v32 = vmul.f32 %v2083_v26, %v4585_v43 }
 0x44d   :  { %v4663_v35 = vpop.xlane.xlu0 %1872  ;;  %2464 = vperm.xlu1 %2871, %v2264_v10   ;;  %v2274_v10 = vmul.f32 10.0, %v2210_v5  ;;  %v2014_v15 = vmul.f32 0.5, %v2013_v46  ;;  %v5223_v5 = vld [vmem:[#allocation66_spill] sm:$0xff] }
 0x44e   :  { %2470 = vperm.xlu0 %2870, %v2266_v24   ;;  %v2006_v24 = vmul.f32 %v4669_v47, %v2005_v25  ;;  %v2275_v0 = vmul.f32 10.0, %v2211_v32  ;;  %2904 = vrsqrt.f32 %v5223_v5  ;;  %vm2027_vm1 = vweird.f32 %v5223_v5 }
 0x44f   :  { %v4667_v4 = vpop.xlane.xlu2 %1878  ;;  %v4677_v49 = vpop.xlane.xlu1 %1875  ;;  %v2015_v29 = vsub.f32 1.5, %v2014_v15 }
 0x450   :  { %v2010_v43 = vsel %vm2009_vm9, %v4669_v47, %v2006_v24  ;;  %v2087_v47 = vperm.slane %v2044_v40, 6 }
 0x451   :  { %v2016_v54 = vmul.f32 %v4701_v38, %v2015_v29 }
 0x452   :  { %v2215_v1 = vmul.f32 %v2087_v47, %v4608_v42 }
 0x454   :  { %2476 = vperm.xlu2 %2872, %v2268_v48   ;;  %v2214_v48 = vmul.f32 %v2086_v62, %v4598_v50  ;;  %v4747_v51 = vpop.eup %2904 }
 0x455   :  { %v4680_v45 = vpop.xlane.xlu0 %1881  ;;  %2473 = vperm.xlu1 %2871, %v2267_v36   ;;  %v4715_v36 = vmin.f32 %v2010_v43, 1e+08  ;;  %vm2028_vm0 = vweird.f32 %v4747_v51 }
 0x456   :  { %2479 = vperm.xlu0 %2870, %v2269_v8   ;;  %v2277_v8 = vmul.f32 10.0, %v2213_v59  ;;  %v2278_v33 = vmul.f32 10.0, %v2214_v48  ;;  %vm2029_vm2 = vmor %vm2027_vm1, %vm2028_vm0  ;;  %vm2686_vm0 = vcmask 1047559   ;;  %vm2753_vm1 = vcmask 64512  }
 0x457   :  { %v4685_v53 = vpop.xlane.xlu2 %1887  ;;  %v4688_v7 = vpop.xlane.xlu1 %1884  ;;  %v2089_v50 = vperm.slane %v4715_v36, 0  ;;  %v2090_v58 = vperm.slane %v4715_v36, 1  ;;  %v2092_v42 = vperm.slane %v4715_v36, 3  ;;  %v2095_v23 = vperm.slane %v4715_v36, 6 }
 0x459   :  { %v2217_v12 = vmul.f32 %v2089_v50, %v4615_v16  ;;  %v2218_v16 = vmul.f32 %v2090_v58, %v4620_v57  ;;  %v2220_v25 = vmul.f32 %v2092_v42, %v4625_v22  ;;  %v2094_v57 = vperm.slane %v4715_v36, 5 }
 0x45a   :  { %v2093_v22 = vperm.slane %v4715_v36, 4  ;;  %v2223_v6 = vmul.f32 %v2095_v23, %v4644_v14 }
 0x45b   :  { %v2281_v40 = vmul.f32 10.0, %v2217_v12  ;;  %v2222_v20 = vmul.f32 %v2094_v57, %v4646_v30  ;;  %v2096_v30 = vperm.slane %v4715_v36, 7  ;;  %v5224_v12 = vld [vmem:[#allocation62_spill] sm:$0xff] }
 0x45c   :  { %2485 = vperm.xlu2 %2872, %v2271_v17   ;;  %v2280_v17 = vmul.f32 10.0, %v2216_v28  ;;  %v2221_v62 = vmul.f32 %v2093_v22, %v4637_v55  ;;  %2906 = vrsqrt.f32 %v5224_v12  ;;  %vm2037_vm8 = vweird.f32 %v5224_v12 }
 0x45d   :  { %2482 = vperm.xlu1 %2871, %v2270_v18   ;;  %v4691_v41 = vpop.xlane.xlu0 %1890  ;;  %v2279_v18 = vmul.f32 10.0, %v2215_v1  ;;  %v2286_v48 = vmul.f32 10.0, %v2222_v20  ;;  %v2224_v14 = vmul.f32 %v2096_v30, %v4653_v44 }
 0x45e   :  { %2488 = vperm.xlu0 %2870, %v2272_v63   ;;  %v2091_v63 = vperm.slane %v4715_v36, 2  ;;  %v2285_v60 = vmul.f32 10.0, %v2221_v62 }
 0x45f   :  { %v4694_v39 = vpop.xlane.xlu2 %1896  ;;  %v4706_v9 = vpop.xlane.xlu1 %1893  ;;  %v2288_v36 = vmul.f32 10.0, %v2224_v14 }
 0x460   :  { %v2219_v13 = vmul.f32 %v2091_v63, %v4627_v31  ;;  %v2284_v31 = vmul.f32 10.0, %v2220_v25 }
 0x462   :  { %v2283_v32 = vmul.f32 10.0, %v2219_v13  ;;  %v4775_v42 = vpop.eup %2906 }
 0x463   :  { %vm2038_vm6 = vweird.f32 %v4775_v42 }
 0x464   :  { %2494 = vperm.xlu2 %2872, %v2274_v10   ;;  %v2282_v10 = vmul.f32 10.0, %v2218_v16  ;;  %vm4820_vm9 = vmor %vm2037_vm8, %vm2038_vm6 }
 0x465   :  { %2491 = vperm.xlu1 %2871, %v2273_v27   ;;  %v4711_v11 = vpop.xlane.xlu0 %1899 }
 0x466   :  { %2497 = vperm.xlu0 %2870, %v2275_v0   ;;  %v2020_v0 = vsel %vm2019_vm11, %v4701_v38, %v2016_v54  ;;  %v2022_v38 = vmul.f32 %v4747_v51, %v5223_v5 }
 0x467   :  { %v4708_v56 = vpop.xlane.xlu2 %1905  ;;  %v4724_v3 = vpop.xlane.xlu1 %1902  ;;  %v2046_v43 = vmin.f32 %v2020_v0, 1e+08 }
 0x469   :  { %v2098_v46 = vperm.slane %v2046_v43, 1  ;;  %v2101_v29 = vperm.slane %v2046_v43, 4  ;;  %v2104_v0 = vperm.slane %v2046_v43, 7 }
 0x46b   :  { %v2226_v50 = vmul.f32 %v2098_v46, %v4657_v61  ;;  %v2229_v13 = vmul.f32 %v2101_v29, %v4667_v4  ;;  %v2102_v4 = vperm.slane %v2046_v43, 5 }
 0x46c   :  { %2503 = vperm.xlu2 %2872, %v2277_v8   ;;  %v2287_v8 = vmul.f32 10.0, %v2223_v6  ;;  %v2232_v6 = vmul.f32 %v2104_v0, %v4685_v53 }
 0x46d   :  { %2500 = vperm.xlu1 %2871, %v2276_v34   ;;  %v4726_v21 = vpop.xlane.xlu0 %1908  ;;  %v2097_v34 = vperm.slane %v2046_v43, 0  ;;  %v2230_v5 = vmul.f32 %v2102_v4, %v4680_v45 }
 0x46e   :  { %2506 = vperm.xlu0 %2870, %v2278_v33   ;;  %v2023_v33 = vmul.f32 %v4747_v51, %v2022_v38 }
 0x46f   :  { %v4721_v52 = vpop.xlane.xlu2 %1914  ;;  %v4740_v24 = vpop.xlane.xlu1 %1911  ;;  %v2225_v55 = vmul.f32 %v2097_v34, %v4660_v2  ;;  %v2099_v2 = vperm.slane %v2046_v43, 2 }
 0x470   :  { %v2024_v1 = vmul.f32 0.5, %v2023_v33 }
 0x471   :  { %v2289_v15 = vmul.f32 10.0, %v2225_v55  ;;  %v2227_v44 = vmul.f32 %v2099_v2, %v4663_v35  ;;  %v2032_v35 = vmul.f32 %v4775_v42, %v5224_v12 }
 0x473   :  { %v2033_v22 = vmul.f32 %v4775_v42, %v2032_v35 }
 0x474   :  { %2512 = vperm.xlu2 %2872, %v2280_v17   ;;  %v2290_v17 = vmul.f32 10.0, %v2226_v50 }
 0x475   :  { %2509 = vperm.xlu1 %2871, %v2279_v18   ;;  %v4743_v27 = vpop.xlane.xlu0 %1917  ;;  %v2100_v18 = vperm.slane %v2046_v43, 3 }
 0x476   :  { %2515 = vperm.xlu0 %2870, %v2281_v40   ;;  %v2025_v40 = vsub.f32 1.5, %v2024_v1 }
 0x477   :  { %v4733_v26 = vpop.xlane.xlu2 %1923  ;;  %v4759_v37 = vpop.xlane.xlu1 %1920  ;;  %v2228_v63 = vmul.f32 %v2100_v18, %v4677_v49  ;;  %v2291_v49 = vmul.f32 10.0, %v2227_v44 }
 0x478   :  { %v2026_v25 = vmul.f32 %v4747_v51, %v2025_v40 }
 0x479   :  { %v2292_v54 = vmul.f32 10.0, %v2228_v63 }
 0x47c   :  { %2521 = vperm.xlu2 %2872, %v2283_v32   ;;  %v2293_v32 = vmul.f32 10.0, %v2229_v13 }
 0x47d   :  { %2518 = vperm.xlu1 %2871, %v2282_v10   ;;  %v4762_v47 = vpop.xlane.xlu0 %1926  ;;  %v2103_v10 = vperm.slane %v2046_v43, 6 }
 0x47e   :  { %2524 = vperm.xlu0 %2870, %v2284_v31   ;;  %v2030_v31 = vsel %vm2029_vm2, %v4747_v51, %v2026_v25  ;;  %v2034_v51 = vmul.f32 0.5, %v2033_v22 }
 0x47f   :  { %v4752_v59 = vpop.xlane.xlu2 %1932  ;;  %v4771_v58 = vpop.xlane.xlu1 %1929  ;;  %v2231_v57 = vmul.f32 %v2103_v10, %v4688_v7  ;;  %v4791_v62 = vmin.f32 %v2030_v31, 1e+08  ;;  %v2296_v7 = vmul.f32 10.0, %v2232_v6  ;;  %v2909_v10 = vld [vmem:[%s5046_s1] sm:$0xff]  ;;  %v5227_v31 = vld [vmem:[#allocation49_spill] sm:$0xff] }
 0x480   :  { %v2035_v55 = vsub.f32 1.5, %v2034_v51  ;;  %vm2337_vm11 = vcmp.eq.s32.totalorder %v2909_v10, %v5227_v31 }
 0x481   :  { %v2106_v43 = vperm.slane %v4791_v62, 1  ;;  %v2105_v45 = vperm.slane %v4791_v62, 0  ;;  %v2107_v33 = vperm.slane %v4791_v62, 2  ;;  %v2109_v63 = vperm.slane %v4791_v62, 4  ;;  %vm2346_vm2 = vmand %vm2337_vm11, %vm2345_vm12 }
 0x482   :  { %v2036_v18 = vmul.f32 %v4775_v42, %v2035_v55  ;;  %v2108_v29 = vperm.slane %v4791_v62, 3  ;;  %v2110_v25 = vperm.slane %v4791_v62, 5 }
 0x483   :  { %v2234_v53 = vmul.f32 %v2106_v43, %v4706_v9  ;;  %v2233_v46 = vmul.f32 %v2105_v45, %v4691_v41 }
 0x484   :  { %2530 = vperm.xlu2 %2872, %v2286_v48   ;;  %v2295_v48 = vmul.f32 10.0, %v2231_v57  ;;  %v2040_v12 = vsel %vm4820_vm9, %v4775_v42, %v2036_v18  ;;  %v2236_v35 = vmul.f32 %v2108_v29, %v4711_v11 }
 0x485   :  { %2527 = vperm.xlu1 %2871, %v2285_v60   ;;  %v4778_v16 = vpop.xlane.xlu0 %1935  ;;  %v2294_v60 = vmul.f32 10.0, %v2230_v5  ;;  %v2298_v9 = vmul.f32 10.0, %v2234_v53  ;;  %v2297_v41 = vmul.f32 10.0, %v2233_v46  ;;  %v4842_v0 = vmin.f32 %v2040_v12, 1e+08  ;;  %v5228_v12 = vld [vmem:[#allocation38_spill] sm:$0xff] }
 0x486   :  { %2533 = vperm.xlu0 %2870, %v2287_v8  }
 0x487   :  { %v4765_v28 = vpop.permute.xlu2 %2422  ;;  %v2118_v29 = vperm.slane %v4842_v0, 5  ;;  %v2119_v13 = vperm.slane %v4842_v0, 6 }
 0x488   :  { %v2611_v34 = vperm.slane %v4765_v28, %v3208_v19 }
 0x489   :  { %v2247_v10 = vmul.f32 %v2119_v13, %v4752_v59  ;;  %v2120_v59 = vperm.slane %v4842_v0, 7 }
 0x48c   :  { %2539 = vperm.xlu2 %2872, %v2289_v15   ;;  %v2235_v15 = vmul.f32 %v2107_v33, %v4694_v39 }
 0x48d   :  { %2536 = vperm.xlu1 %2871, %v2288_v36  }
 0x48e   :  { %2542 = vperm.xlu0 %2870, %v2290_v17   ;;  %v2299_v2 = vmul.f32 10.0, %v2235_v15 }
 0x48f   :  { %v4773_v61 = vpop.permute.xlu2 %2431 }
 0x490   :  { %v2614_v39 = vperm.slane %v4773_v61, %v3208_v19 }
 0x494   :  { %2548 = vperm.xlu2 %2872, %v2292_v54   ;;  %v2237_v54 = vmul.f32 %v2109_v63, %v4724_v3  ;;  %v2238_v3 = vmul.f32 %v2110_v25, %v4708_v56  ;;  %v2246_v25 = vmul.f32 %v2118_v29, %v4771_v58 }
 0x495   :  { %2545 = vperm.xlu1 %2871, %v2291_v49  }
 0x496   :  { %2551 = vperm.xlu0 %2870, %v2293_v32   ;;  %v2301_v22 = vmul.f32 10.0, %v2237_v54  ;;  %v2302_v6 = vmul.f32 10.0, %v2238_v3 }
 0x497   :  { %v4789_v23 = vpop.permute.xlu2 %2440  ;;  %v2420_v20 = vpop.permute.xlu1 %2419 }
 0x498   :  { %v2426_v38 = vpop.permute.xlu0 %2425  ;;  %v2610_v8 = vperm.slane %v2420_v20, %v3208_v19  ;;  %v2617_v42 = vperm.slane %v4789_v23, %v3208_v19  ;;  %v2300_v20 = vmul.f32 10.0, %v2236_v35  ;;  %v2111_v23 = vperm.slane %v4791_v62, 6 }
 0x499   :  { %v2612_v30 = vperm.slane %v2426_v38, %v3208_v19  ;;  %v2112_v38 = vperm.slane %v4791_v62, 7 }
 0x49a   :  { %v2675_v14 = vsel %vm2674_vm3, %v2611_v34, %v2610_v8  ;;  %v2239_v8 = vmul.f32 %v2111_v23, %v4726_v21  ;;  %v2114_v21 = vperm.slane %v4842_v0, 1 }
 0x49b   :  { %v2677_v17 = vsel %vm2676_vm15, %v2612_v30, %v2675_v14  ;;  %v2240_v51 = vmul.f32 %v2112_v38, %v4740_v24  ;;  %v2115_v24 = vperm.slane %v4842_v0, 2 }
 0x49c   :  { %2557 = vperm.xlu2 %2872, %v2295_v48   ;;  %v2303_v30 = vmul.f32 10.0, %v2239_v8 }
 0x49d   :  { %2554 = vperm.xlu1 %2871, %v2294_v60   ;;  %v2113_v60 = vperm.slane %v4842_v0, 0  ;;  %v2304_v33 = vmul.f32 10.0, %v2240_v51 }
 0x49e   :  { %2560 = vperm.xlu0 %2870, %v2296_v7  }
 0x49f   :  { %v4804_v50 = vpop.permute.xlu2 %2449  ;;  %v2429_v1 = vpop.permute.xlu1 %2428  ;;  %v2241_v45 = vmul.f32 %v2113_v60, %v4721_v52  ;;  %v2116_v52 = vperm.slane %v4842_v0, 3 }
 0x4a0   :  { %v2613_v28 = vperm.slane %v2429_v1, %v3208_v19  ;;  %v2435_v36 = vpop.permute.xlu0 %2434  ;;  %v2620_v14 = vperm.slane %v4804_v50, %v3208_v19  ;;  %v2243_v1 = vmul.f32 %v2115_v24, %v4759_v37 }
 0x4a1   :  { %v2615_v44 = vperm.slane %v2435_v36, %v3208_v19  ;;  %v2305_v55 = vmul.f32 10.0, %v2241_v45  ;;  %v2244_v18 = vmul.f32 %v2116_v52, %v4733_v26 }
 0x4a2   :  { %v2679_v40 = vsel %vm2678_vm5, %v2613_v28, %v2677_v17  ;;  %v2242_v28 = vmul.f32 %v2114_v21, %v4743_v27  ;;  %v2307_v50 = vmul.f32 10.0, %v2243_v1 }
 0x4a3   :  { %v2681_v61 = vsel %vm2680_vm7, %v2614_v39, %v2679_v40  ;;  %v2308_v39 = vmul.f32 10.0, %v2244_v18 }
 0x4a4   :  { %2566 = vperm.xlu2 %2872, %v2298_v9   ;;  %v2683_v11 = vsel %vm2682_vm10, %v2615_v44, %v2681_v61  ;;  %v2306_v63 = vmul.f32 10.0, %v2242_v28  ;;  %v2117_v44 = vperm.slane %v4842_v0, 4  ;;  %v2910_v61 = vld [vmem:[%s5046_s1 + $0x8] sm:$0xff] }
 0x4a5   :  { %2563 = vperm.xlu1 %2871, %v2297_v41   ;;  %vm2338_vm6 = vcmp.eq.s32.totalorder %v2910_v61, %v5228_v12 }
 0x4a6   :  { %2569 = vperm.xlu0 %2870, %v2299_v2   ;;  %v2245_v35 = vmul.f32 %v2117_v44, %v4762_v47  ;;  %vm2347_vm8 = vmand %vm2338_vm6, %vm2345_vm12  ;;  %v2912_v44 = vld [vmem:[%s5046_s1 + $0x18] sm:$0xff] }
 0x4a7   :  { %v4831_v49 = vpop.permute.xlu2 %2458  ;;  %v2438_v32 = vpop.permute.xlu1 %2437 }
 0x4a8   :  { %v2616_v4 = vperm.slane %v2438_v32, %v3208_v19  ;;  %v2444_v57 = vpop.permute.xlu0 %2443  ;;  %v2623_v27 = vperm.slane %v4831_v49, %v3208_v19 }
 0x4a9   :  { %v2618_v53 = vperm.slane %v2444_v57, %v3208_v19 }
 0x4aa   :  { %v2685_v5 = vsel %vm2684_vm13, %v2616_v4, %v2683_v11  ;;  %v2310_v4 = vmul.f32 10.0, %v2246_v25 }
 0x4ab   :  { %v2687_v56 = vsel %vm2686_vm0, %v2617_v42, %v2685_v5  ;;  %v2309_v42 = vmul.f32 10.0, %v2245_v35  ;;  %v2248_v5 = vmul.f32 %v2120_v59, %v4778_v16 }
 0x4ac   :  { %v2745_v48 = vsel %vm2346_vm2, -inf, %v2687_v56  ;;  %2575 = vperm.xlu2 %2872, %v2301_v22   ;;  %v2311_v22 = vmul.f32 10.0, %v2247_v10 }
 0x4ad   :  { %2754 = vst.msk [vmem:[%s5054_s10] sm:$0xff] %vm2753_vm1, %v2745_v48  ;;  %2572 = vperm.xlu1 %2871, %v2300_v20   ;;  %v2312_v51 = vmul.f32 10.0, %v2248_v5 }
 0x4ae   :  { %2578 = vperm.xlu0 %2870, %v2302_v6  }
 0x4af   :  { %v4857_v7 = vpop.permute.xlu2 %2467  ;;  %v2447_v43 = vpop.permute.xlu1 %2446 }
 0x4b0   :  { %v2619_v62 = vperm.slane %v2447_v43, %v3208_v19  ;;  %v2453_v34 = vpop.permute.xlu0 %2452  ;;  %v2626_v6 = vperm.slane %v4857_v7, %v3208_v19 }
 0x4b1   :  { %v2621_v15 = vperm.slane %v2453_v34, %v3208_v19  ;;  %v2911_v34 = vld [vmem:[%s5046_s1 + $0x10] sm:$0xff] }
 0x4b2   :  { %v2688_v46 = vsel %vm2674_vm3, %v2619_v62, %v2618_v53 }
 0x4b3   :  { %v2689_v36 = vsel %vm2676_vm15, %v2620_v14, %v2688_v46 }
 0x4b4   :  { %2584 = vperm.xlu2 %2872, %v2304_v33   ;;  %v2690_v2 = vsel %vm2678_vm5, %v2621_v15, %v2689_v36  ;;  %v5229_v33 = vld [vmem:[#allocation56_spill] sm:$0xff] }
 0x4b5   :  { %2581 = vperm.xlu1 %2871, %v2303_v30   ;;  %vm2339_vm9 = vcmp.eq.s32.totalorder %v2911_v34, %v5229_v33 }
 0x4b6   :  { %2587 = vperm.xlu0 %2870, %v2305_v55   ;;  %vm2348_vm11 = vmand %vm2339_vm9, %vm2345_vm12 }
 0x4b7   :  { %v2477_v9 = vpop.permute.xlu2 %2476  ;;  %v2456_v17 = vpop.permute.xlu1 %2455 }
 0x4b8   :  { %v2622_v41 = vperm.slane %v2456_v17, %v3208_v19  ;;  %v2462_v40 = vpop.permute.xlu0 %2461  ;;  %v2629_v0 = vperm.slane %v2477_v9, %v3208_v19 }
 0x4b9   :  { %v2624_v26 = vperm.slane %v2462_v40, %v3208_v19 }
 0x4ba   :  { %v2691_v37 = vsel %vm2680_vm7, %v2622_v41, %v2690_v2 }
 0x4bb   :  { %v2692_v54 = vsel %vm2682_vm10, %v2623_v27, %v2691_v37 }
 0x4bc   :  { %2593 = vperm.xlu2 %2872, %v2307_v50   ;;  %v2693_v58 = vsel %vm2684_vm13, %v2624_v26, %v2692_v54  ;;  %v5230_v26 = vld [vmem:[#allocation41_spill] sm:$0xff] }
 0x4bd   :  { %2590 = vperm.xlu1 %2871, %v2306_v63   ;;  %vm2340_vm2 = vcmp.eq.s32.totalorder %v2912_v44, %v5230_v26 }
 0x4be   :  { %2596 = vperm.xlu0 %2870, %v2308_v39   ;;  %vm2349_vm6 = vmand %vm2340_vm2, %vm2345_vm12 }
 0x4bf   :  { %v2486_v49 = vpop.permute.xlu2 %2485  ;;  %v2465_v32 = vpop.permute.xlu1 %2464 }
 0x4c0   :  { %v2625_v31 = vperm.slane %v2465_v32, %v3208_v19  ;;  %v2471_v3 = vpop.permute.xlu0 %2470  ;;  %v2632_v53 = vperm.slane %v2486_v49, %v3208_v19 }
 0x4c1   :  { %v2627_v47 = vperm.slane %v2471_v3, %v3208_v19 }
 0x4c2   :  { %v2694_v57 = vsel %vm2686_vm0, %v2625_v31, %v2693_v58 }
 0x4c3   :  { %v2746_v11 = vsel %vm2347_vm8, -inf, %v2694_v57  ;;  %v2695_v23 = vsel %vm2674_vm3, %v2627_v47, %v2626_v6 }
 0x4c4   :  { %2755 = vst.msk [vmem:[%s5054_s10 + $0x8] sm:$0xff] %vm2753_vm1, %v2746_v11  ;;  %2602 = vperm.xlu2 %2872, %v2310_v4  }
 0x4c5   :  { %2599 = vperm.xlu1 %2871, %v2309_v42  }
 0x4c6   :  { %2605 = vperm.xlu0 %2870, %v2311_v22  }
 0x4c7   :  { %v2495_v20 = vpop.permute.xlu2 %2494  ;;  %v2474_v56 = vpop.permute.xlu1 %2473 }
 0x4c8   :  { %v2628_v38 = vperm.slane %v2474_v56, %v3208_v19  ;;  %v2480_v48 = vpop.permute.xlu0 %2479  ;;  %v2635_v36 = vperm.slane %v2495_v20, %v3208_v19 }
 0x4c9   :  { %v2630_v8 = vperm.slane %v2480_v48, %v3208_v19 }
 0x4ca   :  { %v2696_v60 = vsel %vm2676_vm15, %v2628_v38, %v2695_v23 }
 0x4cb   :  { %v2697_v16 = vsel %vm2678_vm5, %v2629_v0, %v2696_v60  ;;  %v5231_v60 = vld [vmem:[#allocation57_spill] sm:$0xff] }
 0x4cc   :  { %v2698_v30 = vsel %vm2680_vm7, %v2630_v8, %v2697_v16 }
 0x4cd   :  { %2608 = vperm.xlu1 %2871, %v2312_v51   ;;  %v2913_v51 = vld [vmem:[%s5046_s1 + $0x20] sm:$0xff] }
 0x4ce   :  { %vm2341_vm8 = vcmp.eq.s32.totalorder %v2913_v51, %v5231_v60 }
 0x4cf   :  { %v2504_v43 = vpop.permute.xlu2 %2503  ;;  %v2483_v45 = vpop.permute.xlu1 %2482  ;;  %vm2350_vm9 = vmand %vm2341_vm8, %vm2345_vm12 }
 0x4d0   :  { %v2631_v62 = vperm.slane %v2483_v45, %v3208_v19  ;;  %v2489_v7 = vpop.permute.xlu0 %2488  ;;  %v2638_v37 = vperm.slane %v2504_v43, %v3208_v19 }
 0x4d1   :  { %v2633_v55 = vperm.slane %v2489_v7, %v3208_v19 }
 0x4d2   :  { %v2699_v24 = vsel %vm2682_vm10, %v2631_v62, %v2698_v30 }
 0x4d3   :  { %v2700_v46 = vsel %vm2684_vm13, %v2632_v53, %v2699_v24 }
 0x4d4   :  { %v2701_v21 = vsel %vm2686_vm0, %v2633_v55, %v2700_v46 }
 0x4d5   :  { %v2747_v14 = vsel %vm2348_vm11, -inf, %v2701_v21 }
 0x4d6   :  { %2756 = vst.msk [vmem:[%s5054_s10 + $0x10] sm:$0xff] %vm2753_vm1, %v2747_v14 }
 0x4d7   :  { %v2513_v52 = vpop.permute.xlu2 %2512  ;;  %v2492_v1 = vpop.permute.xlu1 %2491 }
 0x4d8   :  { %v2498_v15 = vpop.permute.xlu0 %2497  ;;  %v2634_v28 = vperm.slane %v2492_v1, %v3208_v19  ;;  %v2641_v54 = vperm.slane %v2513_v52, %v3208_v19 }
 0x4d9   :  { %v2636_v9 = vperm.slane %v2498_v15, %v3208_v19 }
 0x4da   :  { %v2702_v17 = vsel %vm2674_vm3, %v2635_v36, %v2634_v28 }
 0x4db   :  { %v2703_v2 = vsel %vm2676_vm15, %v2636_v9, %v2702_v17 }
 0x4df   :  { %v2522_v18 = vpop.permute.xlu2 %2521  ;;  %v2501_v41 = vpop.permute.xlu1 %2500 }
 0x4e0   :  { %v2637_v40 = vperm.slane %v2501_v41, %v3208_v19  ;;  %v2507_v50 = vpop.permute.xlu0 %2506  ;;  %v2644_v42 = vperm.slane %v2522_v18, %v3208_v19 }
 0x4e1   :  { %v2639_v39 = vperm.slane %v2507_v50, %v3208_v19 }
 0x4e2   :  { %v2704_v63 = vsel %vm2678_vm5, %v2637_v40, %v2703_v2 }
 0x4e3   :  { %v2705_v29 = vsel %vm2680_vm7, %v2638_v37, %v2704_v63 }
 0x4e4   :  { %v2706_v61 = vsel %vm2682_vm10, %v2639_v39, %v2705_v29 }
 0x4e7   :  { %v2510_v27 = vpop.permute.xlu1 %2509  ;;  %v2531_v12 = vpop.permute.xlu2 %2530 }
 0x4e8   :  { %v2640_v13 = vperm.slane %v2510_v27, %v3208_v19  ;;  %v2516_v25 = vpop.permute.xlu0 %2515  ;;  %v2647_v6 = vperm.slane %v2531_v12, %v3208_v19 }
 0x4e9   :  { %v2642_v58 = vperm.slane %v2516_v25, %v3208_v19 }
 0x4ea   :  { %v2707_v35 = vsel %vm2684_vm13, %v2640_v13, %v2706_v61 }
 0x4eb   :  { %v2708_v49 = vsel %vm2686_vm0, %v2641_v54, %v2707_v35 }
 0x4ec   :  { %v2748_v32 = vsel %vm2349_vm6, -inf, %v2708_v49 }
 0x4ed   :  { %2757 = vst.msk [vmem:[%s5054_s10 + $0x18] sm:$0xff] %vm2753_vm1, %v2748_v32 }
 0x4ef   :  { %v2519_v10 = vpop.permute.xlu1 %2518  ;;  %v2540_v4 = vpop.permute.xlu2 %2539 }
 0x4f0   :  { %v2643_v31 = vperm.slane %v2519_v10, %v3208_v19  ;;  %v2525_v3 = vpop.permute.xlu0 %2524  ;;  %v2650_v53 = vperm.slane %v2540_v4, %v3208_v19  ;;  %v5233_v4 = vld [vmem:[#allocation58_spill] sm:$0xff] }
 0x4f1   :  { %v2645_v11 = vperm.slane %v2525_v3, %v3208_v19 }
 0x4f2   :  { %v2709_v57 = vsel %vm2674_vm3, %v2643_v31, %v2642_v58  ;;  %v2914_v58 = vld [vmem:[%s5046_s1 + $0x30] sm:$0xff] }
 0x4f3   :  { %v2710_v22 = vsel %vm2676_vm15, %v2644_v42, %v2709_v57 }
 0x4f4   :  { %v2711_v20 = vsel %vm2678_vm5, %v2645_v11, %v2710_v22 }
 0x4f7   :  { %v2528_v59 = vpop.permute.xlu1 %2527  ;;  %v2549_v38 = vpop.permute.xlu2 %2548 }
 0x4f8   :  { %v2646_v47 = vperm.slane %v2528_v59, %v3208_v19  ;;  %v2534_v5 = vpop.permute.xlu0 %2533  ;;  %v2653_v21 = vperm.slane %v2549_v38, %v3208_v19 }
 0x4f9   :  { %v2648_v48 = vperm.slane %v2534_v5, %v3208_v19 }
 0x4fa   :  { %v2712_v56 = vsel %vm2680_vm7, %v2646_v47, %v2711_v20 }
 0x4fb   :  { %v2713_v23 = vsel %vm2682_vm10, %v2647_v6, %v2712_v56 }
 0x4fc   :  { %v2714_v43 = vsel %vm2684_vm13, %v2648_v48, %v2713_v23 }
 0x4ff   :  { %v2537_v0 = vpop.permute.xlu1 %2536  ;;  %v2558_v34 = vpop.permute.xlu2 %2557 }
 0x500   :  { %v2649_v8 = vperm.slane %v2537_v0, %v3208_v19  ;;  %v2543_v16 = vpop.permute.xlu0 %2542  ;;  %v2656_v36 = vperm.slane %v2558_v34, %v3208_v19 }
 0x501   :  { %v2651_v7 = vperm.slane %v2543_v16, %v3208_v19 }
 0x502   :  { %v2715_v45 = vsel %vm2686_vm0, %v2649_v8, %v2714_v43 }
 0x503   :  { %v2749_v62 = vsel %vm2350_vm9, -inf, %v2715_v45  ;;  %v2716_v24 = vsel %vm2674_vm3, %v2651_v7, %v2650_v53 }
 0x504   :  { %2758 = vst.msk [vmem:[%s5054_s10 + $0x20] sm:$0xff] %vm2753_vm1, %v2749_v62 }
 0x507   :  { %v2546_v33 = vpop.permute.xlu1 %2545  ;;  %v2567_v9 = vpop.permute.xlu2 %2566 }
 0x508   :  { %v2652_v30 = vperm.slane %v2546_v33, %v3208_v19  ;;  %v2552_v55 = vpop.permute.xlu0 %2551  ;;  %v2659_v44 = vperm.slane %v2567_v9, %v3208_v19 }
 0x509   :  { %v2654_v14 = vperm.slane %v2552_v55, %v3208_v19 }
 0x50a   :  { %v2717_v46 = vsel %vm2676_vm15, %v2652_v30, %v2716_v24 }
 0x50b   :  { %v2718_v52 = vsel %vm2678_vm5, %v2653_v21, %v2717_v46 }
 0x50c   :  { %v2719_v17 = vsel %vm2680_vm7, %v2654_v14, %v2718_v52 }
 0x50f   :  { %v2555_v1 = vpop.permute.xlu1 %2554  ;;  %v2576_v29 = vpop.permute.xlu2 %2575 }
 0x510   :  { %v2655_v15 = vperm.slane %v2555_v1, %v3208_v19  ;;  %v2561_v28 = vpop.permute.xlu0 %2560  ;;  %v2662_v49 = vperm.slane %v2576_v29, %v3208_v19 }
 0x511   :  { %v2657_v18 = vperm.slane %v2561_v28, %v3208_v19 }
 0x512   :  { %v2720_v41 = vsel %vm2682_vm10, %v2655_v15, %v2719_v17 }
 0x513   :  { %v2721_v40 = vsel %vm2684_vm13, %v2656_v36, %v2720_v41 }
 0x514   :  { %v2722_v50 = vsel %vm2686_vm0, %v2657_v18, %v2721_v40 }
 0x515   :  { %v2750_v63 = vsel %vm4164_vm14, -inf, %v2722_v50  ;;  %vm2343_vm14 = vcmp.eq.s32.totalorder %v2914_v58, %v5233_v4 }
 0x516   :  { %2759 = vst.msk [vmem:[%s5054_s10 + $0x28] sm:$0xff] %vm2753_vm1, %v2750_v63  ;;  %vm2352_vm11 = vmand %vm2343_vm14, %vm2345_vm12 }
 0x517   :  { %v2564_v37 = vpop.permute.xlu1 %2563  ;;  %v2585_v32 = vpop.permute.xlu2 %2584 }
 0x518   :  { %v2570_v39 = vpop.permute.xlu0 %2569  ;;  %v2658_v27 = vperm.slane %v2564_v37, %v3208_v19  ;;  %v2665_v11 = vperm.slane %v2585_v32, %v3208_v19 }
 0x519   :  { %v2660_v26 = vperm.slane %v2570_v39, %v3208_v19 }
 0x51a   :  { %v2723_v13 = vsel %vm2674_vm3, %v2659_v44, %v2658_v27 }
 0x51b   :  { %v2724_v12 = vsel %vm2676_vm15, %v2660_v26, %v2723_v13 }
 0x51f   :  { %v2573_v25 = vpop.permute.xlu1 %2572  ;;  %v2594_v20 = vpop.permute.xlu2 %2593 }
 0x520   :  { %v2661_v54 = vperm.slane %v2573_v25, %v3208_v19  ;;  %v2579_v61 = vpop.permute.xlu0 %2578  ;;  %v2668_v51 = vperm.slane %v2594_v20, %v3208_v19 }
 0x521   :  { %v2663_v10 = vperm.slane %v2579_v61, %v3208_v19 }
 0x522   :  { %v2725_v35 = vsel %vm2678_vm5, %v2661_v54, %v2724_v12 }
 0x523   :  { %v2726_v31 = vsel %vm2680_vm7, %v2662_v49, %v2725_v35 }
 0x524   :  { %v2727_v22 = vsel %vm2682_vm10, %v2663_v10, %v2726_v31 }
 0x527   :  { %v2582_v3 = vpop.permute.xlu1 %2581  ;;  %v2603_v43 = vpop.permute.xlu2 %2602 }
 0x528   :  { %v2664_v57 = vperm.slane %v2582_v3, %v3208_v19  ;;  %v2588_v42 = vpop.permute.xlu0 %2587  ;;  %v2671_v34 = vperm.slane %v2603_v43, %v3208_v19 }
 0x529   :  { %v2666_v48 = vperm.slane %v2588_v42, %v3208_v19 }
 0x52a   :  { %v2728_v59 = vsel %vm2684_vm13, %v2664_v57, %v2727_v22 }
 0x52b   :  { %v2729_v47 = vsel %vm2686_vm0, %v2665_v11, %v2728_v59 }
 0x52c   :  { %v2751_v5 = vsel %vm2352_vm11, -inf, %v2729_v47 }
 0x52d   :  { %2760 = vst.msk [vmem:[%s5054_s10 + $0x30] sm:$0xff] %vm2753_vm1, %v2751_v5 }
 0x52f   :  { %v2591_v56 = vpop.permute.xlu1 %2590 }
 0x530   :  { %v2667_v6 = vperm.slane %v2591_v56, %v3208_v19  ;;  %v2597_v38 = vpop.permute.xlu0 %2596 }
 0x531   :  { %v2669_v60 = vperm.slane %v2597_v38, %v3208_v19 }
 0x532   :  { %v2730_v23 = vsel %vm2674_vm3, %v2667_v6, %v2666_v48 }
 0x533   :  { %v2731_v0 = vsel %vm2676_vm15, %v2668_v51, %v2730_v23 }
 0x534   :  { %v2732_v45 = vsel %vm2678_vm5, %v2669_v60, %v2731_v0 }
 0x537   :  { %v2600_v8 = vpop.permute.xlu1 %2599 }
 0x538   :  { %v2670_v16 = vperm.slane %v2600_v8, %v3208_v19  ;;  %v2606_v62 = vpop.permute.xlu0 %2605 }
 0x539   :  { %v2672_v33 = vperm.slane %v2606_v62, %v3208_v19 }
 0x53a   :  { %v2733_v7 = vsel %vm2680_vm7, %v2670_v16, %v2732_v45 }
 0x53b   :  { %v2734_v53 = vsel %vm2682_vm10, %v2671_v34, %v2733_v7 }
 0x53c   :  { %v2735_v24 = vsel %vm2684_vm13, %v2672_v33, %v2734_v53 }
 0x53f   :  { %v2609_v30 = vpop.permute.xlu1 %2608 }
 0x540   :  { %v2673_v55 = vperm.slane %v2609_v30, %v3208_v19 }
 0x542   :  { %v2736_v46 = vsel %vm2686_vm0, %v2673_v55, %v2735_v24 }
 0x543   :  { %v2752_v14 = vsel %vm4203_vm4, -inf, %v2736_v46 }
 0x544   :  { %2761 = vst.msk [vmem:[%s5054_s10 + $0x38] sm:$0xff] %vm2753_vm1, %v2752_v14 }

</bundles_post_ra>
